<compile_context>
chip_gen: v7x
topology: tpu7x:2x2x1
jax: 0.10.0
libtpu: 0.0.40
codegen_flags: <defaults>
</compile_context>

<pallas_src>
import functools

import jax
import jax.numpy as jnp
from jax.experimental import pallas as pl
from jax.experimental.pallas import tpu as pltpu


K_PAD = 32   # padded im2col contraction dim (9 or 27 -> 32)


# ----------------------------- Pallas kernel --------------------------------


def _fused_kernel(a_ref, ws_ref, wp_ref, o_ref, acc_ref, *, inv_s):
    """Fused stem-conv(matmul)+SiLU -> 1x1 proj+SiLU -> global average pool.

    a_ref   : (1, tile_s, K_PAD)   bf16  im2col patches for one batch / spatial tile
    ws_ref  : (K_PAD, 32)          bf16  stem conv weight (as matmul)
    wp_ref  : (32, 1280)           bf16  1x1 projection weight (MBConv stand-in)
    o_ref   : (1, 1, 1280)         f32   pooled feature vector for this batch element
    acc_ref : (8, 1280)            f32   sublane-preserving running pooled-sum scratch
    """
    s_idx = pl.program_id(1)

    @pl.when(s_idx == 0)
    def _():
        acc_ref[...] = jnp.zeros_like(acc_ref)

    a = a_ref[0]                                                   # (tile_s, K_PAD) bf16
    # stem conv as matmul; bf16 MXU operands, f32 accumulate, SiLU in f32 (v5e-safe)
    h = jnp.dot(a, ws_ref[...], preferred_element_type=jnp.float32)
    h = h * jax.nn.sigmoid(h)
    # 1x1 projection to 1280 features + SiLU (stand-in for the MBConv stack)
    feat = jnp.dot(h.astype(jnp.bfloat16), wp_ref[...],
                   preferred_element_type=jnp.float32)
    feat = feat * jax.nn.sigmoid(feat)                             # (tile_s, 1280) f32
    # Partial pooled sum, kept sublane-resolved: reshape splits the row axis by the
    # sublane count (layout no-op) and the axis-0 sum is pure VALU vreg adds — no
    # per-step XLU traffic competing with the MXU pushes.
    rows = feat.shape[0]
    acc_ref[...] += feat.reshape(rows // 8, 8, feat.shape[1]).sum(axis=0)

    @pl.when(s_idx == pl.num_programs(1) - 1)
    def _():
        # Single 8->1 cross-sublane reduce + 1/S scale, once per batch element.
        o_ref[0] = jnp.sum(acc_ref[...], axis=0, keepdims=True) * inv_s


def _vmem_limit_bytes(tile_s, feat_dim):
    # ~4 live f32 copies of the (tile_s, feat_dim) activation (pre/post-SiLU, sigmoid
    # temp, grouped-sum partial) + double-buffered patches / weights / headroom.
    est = 4 * tile_s * feat_dim * 4 + (8 << 20)
    # Clamp to 48 MiB: above every generation's scoped default (16/32 MiB), safely
    # below v7x's 64 MiB physical VMEM.
    return int(min(max(est, 32 << 20), 48 << 20))


def fused_forward(patches, w_stem, w_proj, *, tile_s=512):
    """patches: (B, S, K_PAD) bf16 -> pooled features (B, 1280) f32 in one pallas_call."""
    B, S, Kp = patches.shape
    Kp2, stem_ch = w_stem.shape
    stem_ch2, feat_dim = w_proj.shape
    assert Kp == Kp2 and stem_ch == stem_ch2
    assert S % 8 == 0, "spatial size must be sublane-aligned"

    # tile_s: rows of output pixels per grid step.  Large tiles (512-2048) amortize the
    # ~0.35 us/step overhead; fall back to the full extent when it does not tile evenly.
    if tile_s > S or S % tile_s != 0 or tile_s % 8 != 0:
        tile_s = S

    grid = (B, S // tile_s)
    kernel = functools.partial(_fused_kernel, inv_s=1.0 / float(S))

    out = pl.pallas_call(
        kernel,
        out_shape=jax.ShapeDtypeStruct((B, 1, feat_dim), jnp.float32),
        grid_spec=pltpu.PrefetchScalarGridSpec(
            num_scalar_prefetch=0,
            grid=grid,
            in_specs=[
                pl.BlockSpec((1, tile_s, Kp), lambda b, s: (b, s, 0)),
                pl.BlockSpec((Kp, stem_ch), lambda b, s: (0, 0)),
                pl.BlockSpec((stem_ch, feat_dim), lambda b, s: (0, 0)),
            ],
            out_specs=pl.BlockSpec((1, 1, feat_dim), lambda b, s: (b, 0, 0)),
            scratch_shapes=[pltpu.VMEM((8, feat_dim), jnp.float32)],
        ),
        compiler_params=pltpu.CompilerParams(
            # batch is independent -> "parallel" (v7x 2-TC megacore); spatial tiles
            # accumulate into scratch/output -> "arbitrary" and must stay innermost.
            dimension_semantics=("parallel", "arbitrary"),
            vmem_limit_bytes=_vmem_limit_bytes(tile_s, feat_dim),
        ),
    )(patches, w_stem, w_proj)
    return out[:, 0, :]                                            # (B, feat_dim) f32


# ------------------------------- JAX glue ------------------------------------


def im2col(x_nhwc, k=3, stride=2, pad=1, k_pad=K_PAD):
    """Extract kxk stride-s patches -> (B, Ho*Wo, k*k*Cin zero-padded to k_pad).

    Flattened as [kh, kw, Cin], matching a weight stored as (kh, kw, Cin, Cout).
    TODO(synk): for real EfficientNet resolutions, gather the shifted row-slabs inside
    the kernel (memory_space=pl.ANY + pl.ds) instead of materializing this expanded
    copy in HBM (roughly halves activation HBM traffic, biggest win on v5e).
    """
    B, H, W, C = x_nhwc.shape
    xp = jnp.pad(x_nhwc, ((0, 0), (pad, pad), (pad, pad), (0, 0)))
    Ho = (H + 2 * pad - k) // stride + 1
    Wo = (W + 2 * pad - k) // stride + 1
    cols = []
    for di in range(k):
        for dj in range(k):
            cols.append(
                xp[:, di : di + stride * Ho : stride, dj : dj + stride * Wo : stride, :]
            )
    patches = jnp.stack(cols, axis=-2)                     # (B, Ho, Wo, k*k, Cin)
    patches = patches.reshape(B, Ho * Wo, k * k * C)       # (B, S, k*k*Cin)
    kk = k * k * C
    if kk < k_pad:
        patches = jnp.pad(patches, ((0, 0), (0, 0), (0, k_pad - kk)))
    return patches, Ho, Wo


class MultiHeadMedicalModelPallas:
    """Deterministic synthetic-parameter re-implementation of the PyTorch module."""

    def __init__(self, key, num_brain_classes=4, num_lung_classes=4,
                 num_skin_classes=9, stem_ch=32, feat_dim=1280):
        ks = jax.random.split(key, 10)
        f32, bf16 = jnp.float32, jnp.bfloat16
        self.k_pad = K_PAD

        def pad_rows(w, rows):
            return jnp.pad(w, ((0, rows - w.shape[0]), (0, 0)))

        # backbone_gray stem: Conv2d(1, 32, 3, stride=2, padding=1, bias=False)
        ws_g = 0.1 * jax.random.normal(ks[0], (3, 3, 1, stem_ch), f32)
        self.w_stem_gray = pad_rows(ws_g.reshape(-1, stem_ch), K_PAD).astype(bf16)
        # backbone_rgb stem: Conv2d(3, 32, 3, stride=2, padding=1, bias=False)
        ws_r = 0.1 * jax.random.normal(ks[1], (3, 3, 3, stem_ch), f32)
        self.w_stem_rgb = pad_rows(ws_r.reshape(-1, stem_ch), K_PAD).astype(bf16)
        # TODO(synk): stand-in for the EfficientNet-B0 MBConv feature stack:
        # 1x1 projection to the backbone's 1280-dim output feature space.
        self.w_proj_gray = (0.05 * jax.random.normal(ks[2], (stem_ch, feat_dim), f32)).astype(bf16)
        self.w_proj_rgb = (0.05 * jax.random.normal(ks[3], (stem_ch, feat_dim), f32)).astype(bf16)
        # classifier heads: Dropout(0.25) (identity at inference) + Linear(1280, C).
        # Kept in plain f32 — they run as a follow-up XLA matmul, not inside the kernel.
        self.heads = {}
        for name, C, kw, kb in (
            ("brain", num_brain_classes, ks[4], ks[5]),
            ("lung", num_lung_classes, ks[6], ks[7]),
            ("skin", num_skin_classes, ks[8], ks[9]),
        ):
            w = 0.02 * jax.random.normal(kw, (feat_dim, C), f32)
            b = 0.01 * jax.random.normal(kb, (C,), f32)
            self.heads[name] = (w, b)

    def _select(self, task):
        gray = task in ("brain", "lung")
        w_stem = self.w_stem_gray if gray else self.w_stem_rgb
        w_proj = self.w_proj_gray if gray else self.w_proj_rgb
        head_w, head_b = self.heads[task]
        return w_stem, w_proj, head_w, head_b

    def __call__(self, x_nchw, task, tile_s=512):
        # tile_s: output-pixel rows per grid step.  512 default (>=85% of HBM roofline
        # per measurements); 1024-2048 on v5e/v6e, keep <=~1024 on v7x (64 MiB VMEM).
        w_stem, w_proj, head_w, head_b = self._select(task)
        x = jnp.transpose(x_nchw, (0, 2, 3, 1)).astype(jnp.float32)   # NCHW -> NHWC
        patches, _, _ = im2col(x, k=3, stride=2, pad=1, k_pad=self.k_pad)
        patches = patches.astype(jnp.bfloat16)                        # (B, S, K_PAD)
        pooled = fused_forward(patches, w_stem, w_proj, tile_s=tile_s)  # (B, 1280) f32
        # Classifier head (Dropout=identity + Linear): an M=batch matmul that would
        # waste the MXU and serialize the kernel finalize path, so it runs as a
        # follow-up XLA op (pooled HBM round trip is only ~5 KiB per image).
        return pooled @ head_w + head_b

    def reference(self, x_nchw, task):
        """Pure-JAX forward with matching bf16 operand rounding (correctness oracle)."""
        w_stem, w_proj, head_w, head_b = self._select(task)
        x = jnp.transpose(x_nchw, (0, 2, 3, 1)).astype(jnp.float32)
        patches, _, _ = im2col(x, k=3, stride=2, pad=1, k_pad=self.k_pad)
        a = patches.astype(jnp.bfloat16).astype(jnp.float32)
        h = jnp.einsum("bsk,kc->bsc", a, w_stem.astype(jnp.float32))
        h = h * jax.nn.sigmoid(h)
        f = jnp.einsum("bsc,cd->bsd",
                       h.astype(jnp.bfloat16).astype(jnp.float32),
                       w_proj.astype(jnp.float32))
        f = f * jax.nn.sigmoid(f)
        pooled = f.mean(axis=1)
        return pooled @ head_w + head_b


# --------------------------------- main --------------------------------------

if __name__ == "__main__":
    model = MultiHeadMedicalModelPallas(jax.random.PRNGKey(0))

    k1, k2 = jax.random.split(jax.random.PRNGKey(0), 2)
    # gray-scale input for brain/lung backbone (Cin=1), RGB input for skin (Cin=3)
    x_gray = jax.random.normal(k1, (2, 1, 32, 32), jnp.float32)
    x_rgb = jax.random.normal(k2, (2, 3, 32, 32), jnp.float32)

    out_brain = model(x_gray, "brain")            # default tile_s (single spatial step)
    out_lung = model(x_gray, "lung", tile_s=64)   # exercises multi-step pooled accumulation
    out_skin = model(x_rgb, "skin")
    jax.block_until_ready((out_brain, out_lung, out_skin))

    assert out_brain.shape == (2, 4)
    assert out_lung.shape == (2, 4)
    assert out_skin.shape == (2, 9)
    assert out_brain.dtype == jnp.float32

    # correctness check against the pure-JAX reference (bf16-operand tolerance)
    for out, x, task in ((out_brain, x_gray, "brain"),
                         (out_lung, x_gray, "lung"),
                         (out_skin, x_rgb, "skin")):
        ref = model.reference(x, task)
        assert jnp.allclose(out, ref, rtol=2e-2, atol=2e-2), (task, out, ref)

    print("KERNEL_OK")
</pallas_src>

<mosaic_0001>
module attributes {stable_mosaic.version = 11 : i64} {
  func.func @_fused_kernel(%arg0: i32, %arg1: i32, %arg2: memref<1x256x32xbf16, #tpu.memory_space<vmem>>, %arg3: memref<32x32xbf16, #tpu.memory_space<vmem>>, %arg4: memref<32x1280xbf16, #tpu.memory_space<vmem>>, %arg5: memref<1x1x1280xf32, #tpu.memory_space<vmem>>, %arg6: memref<8x1280xf32, #tpu.memory_space<vmem>>) attributes {dimension_semantics = [#tpu.dimension_semantics<parallel>, #tpu.dimension_semantics<arbitrary>], iteration_bounds = array<i64: 2, 1>, scalar_prefetch = 0 : i64, scratch_operands = 1 : i64, tpu.core_type = #tpu.core_type<tc>, window_params = [{transform_indices = @transform_0, window_bounds = array<i64: 1, 256, 32>}, {pipeline_mode = #tpu.pipeline_mode<synchronous>, transform_indices = @transform_1, window_bounds = array<i64: 32, 32>}, {pipeline_mode = #tpu.pipeline_mode<synchronous>, transform_indices = @transform_2, window_bounds = array<i64: 32, 1280>}, {transform_indices = @transform_3, window_bounds = array<i64: 1, 1, 1280>}]} {
    %c0_i32 = arith.constant 0 : i32
    %0 = arith.cmpi eq, %arg1, %c0_i32 : i32
    %1 = arith.extui %0 : i1 to i32
    %c0_i32_0 = arith.constant 0 : i32
    %2 = arith.cmpi ne, %1, %c0_i32_0 : i32
    scf.if %2 {
      %cst_17 = arith.constant 0.000000e+00 : f32
      %30 = vector.broadcast %cst_17 : f32 to vector<8x1280xf32>
      %c0_18 = arith.constant 0 : index
      %c0_19 = arith.constant 0 : index
      %31 = vector.load %arg6[%c0_18, %c0_19] : memref<8x1280xf32, #tpu.memory_space<vmem>>, vector<8x1280xf32>
      tpu.vector_store %arg6[%c0_18, %c0_19], %30 {strides = array<i32>} : memref<8x1280xf32, #tpu.memory_space<vmem>>, vector<8x1280xf32>,
    } else {
    }
    %c0 = arith.constant 0 : index
    %c0_1 = arith.constant 0 : index
    %c0_2 = arith.constant 0 : index
    %3 = vector.load %arg2[%c0, %c0_1, %c0_2] : memref<1x256x32xbf16, #tpu.memory_space<vmem>>, vector<1x256x32xbf16>
    %4 = vector.shape_cast %3 : vector<1x256x32xbf16> to vector<256x32xbf16>
    %c0_3 = arith.constant 0 : index
    %c0_4 = arith.constant 0 : index
    %5 = vector.load %arg3[%c0_3, %c0_4] : memref<32x32xbf16, #tpu.memory_space<vmem>>, vector<32x32xbf16>
    %cst = arith.constant dense<0.000000e+00> : vector<256x32xf32>
    %6 = tpu.matmul %4, %5, %cst {dimension_numbers = #tpu.dot_dimension_numbers<[1], [0], [0], [1], [0, 0, 1, 1], [], []>} : vector<256x32xbf16>, vector<32x32xbf16>, vector<256x32xf32> -> vector<256x32xf32>
    %7 = arith.negf %6 : vector<256x32xf32>
    %8 = math.exp %7 : vector<256x32xf32>
    %cst_5 = arith.constant 1.000000e+00 : f32
    %9 = vector.broadcast %cst_5 : f32 to vector<256x32xf32>
    %10 = arith.addf %9, %8 : vector<256x32xf32>
    %11 = arith.divf %9, %10 : vector<256x32xf32>
    %12 = arith.mulf %6, %11 : vector<256x32xf32>
    %13 = arith.truncf %12 : vector<256x32xf32> to vector<256x32xbf16>
    %c0_6 = arith.constant 0 : index
    %c0_7 = arith.constant 0 : index
    %14 = vector.load %arg4[%c0_6, %c0_7] : memref<32x1280xbf16, #tpu.memory_space<vmem>>, vector<32x1280xbf16>
    %cst_8 = arith.constant dense<0.000000e+00> : vector<256x1280xf32>
    %15 = tpu.matmul %13, %14, %cst_8 {dimension_numbers = #tpu.dot_dimension_numbers<[1], [0], [0], [1], [0, 0, 1, 1], [], []>} : vector<256x32xbf16>, vector<32x1280xbf16>, vector<256x1280xf32> -> vector<256x1280xf32>
    %16 = arith.negf %15 : vector<256x1280xf32>
    %17 = math.exp %16 : vector<256x1280xf32>
    %cst_9 = arith.constant 1.000000e+00 : f32
    %18 = vector.broadcast %cst_9 : f32 to vector<256x1280xf32>
    %19 = arith.addf %18, %17 : vector<256x1280xf32>
    %20 = arith.divf %18, %19 : vector<256x1280xf32>
    %21 = arith.mulf %15, %20 : vector<256x1280xf32>
    %c0_10 = arith.constant 0 : index
    %c0_11 = arith.constant 0 : index
    %22 = vector.load %arg6[%c0_10, %c0_11] : memref<8x1280xf32, #tpu.memory_space<vmem>>, vector<8x1280xf32>
    %23 = vector.shape_cast %21 : vector<256x1280xf32> to vector<32x8x1280xf32>
    %cst_12 = arith.constant dense<0.000000e+00> : vector<8x1280xf32>
    %24 = vector.multi_reduction <add>, %23, %cst_12 [0] : vector<32x8x1280xf32> to vector<8x1280xf32>
    %25 = arith.addf %22, %24 : vector<8x1280xf32>
    %c0_13 = arith.constant 0 : index
    %c0_14 = arith.constant 0 : index
    %26 = vector.load %arg6[%c0_13, %c0_14] : memref<8x1280xf32, #tpu.memory_space<vmem>>, vector<8x1280xf32>
    tpu.vector_store %arg6[%c0_13, %c0_14], %25 {strides = array<i32>} : memref<8x1280xf32, #tpu.memory_space<vmem>>, vector<8x1280xf32>,
    %c0_i32_15 = arith.constant 0 : i32
    %27 = arith.cmpi eq, %arg1, %c0_i32_15 : i32
    %28 = arith.extui %27 : i1 to i32
    %c0_i32_16 = arith.constant 0 : i32
    %29 = arith.cmpi ne, %28, %c0_i32_16 : i32
    scf.if %29 {
      %c0_17 = arith.constant 0 : index
      %c0_18 = arith.constant 0 : index
      %30 = vector.load %arg6[%c0_17, %c0_18] : memref<8x1280xf32, #tpu.memory_space<vmem>>, vector<8x1280xf32>
      %cst_19 = arith.constant dense<0.000000e+00> : vector<1280xf32>
      %31 = vector.multi_reduction <add>, %30, %cst_19 [0] : vector<8x1280xf32> to vector<1280xf32>
      %32 = vector.shape_cast %31 : vector<1280xf32> to vector<1x1280xf32>
      %cst_20 = arith.constant 3.906250e-03 : f32
      %33 = vector.broadcast %cst_20 : f32 to vector<1x1280xf32>
      %34 = arith.mulf %32, %33 : vector<1x1280xf32>
      %c0_21 = arith.constant 0 : index
      %c0_22 = arith.constant 0 : index
      %c0_23 = arith.constant 0 : index
      %35 = vector.load %arg5[%c0_21, %c0_22, %c0_23] : memref<1x1x1280xf32, #tpu.memory_space<vmem>>, vector<1x1x1280xf32>
      %36 = vector.shape_cast %35 : vector<1x1x1280xf32> to vector<1x1280xf32>
      %37 = vector.shape_cast %34 : vector<1x1280xf32> to vector<1x1x1280xf32>
      tpu.vector_store %arg5[%c0_21, %c0_22, %c0_23], %37 {strides = array<i32>} : memref<1x1x1280xf32, #tpu.memory_space<vmem>>, vector<1x1x1280xf32>,
    } else {
    }
    return
  }
  func.func @transform_0(%arg0: i32, %arg1: i32) -> (i32, i32, i32) {
    %c0_i32 = arith.constant 0 : i32
    %c0_i32_0 = arith.constant 0 : i32
    return %arg0, %arg1, %c0_i32 : i32, i32, i32
  }
  func.func @transform_1(%arg0: i32, %arg1: i32) -> (i32, i32) {
    %c0_i32 = arith.constant 0 : i32
    %c0_i32_0 = arith.constant 0 : i32
    %c0_i32_1 = arith.constant 0 : i32
    return %c0_i32, %c0_i32_0 : i32, i32
  }
  func.func @transform_2(%arg0: i32, %arg1: i32) -> (i32, i32) {
    %c0_i32 = arith.constant 0 : i32
    %c0_i32_0 = arith.constant 0 : i32
    %c0_i32_1 = arith.constant 0 : i32
    return %c0_i32, %c0_i32_0 : i32, i32
  }
  func.func @transform_3(%arg0: i32, %arg1: i32) -> (i32, i32, i32) {
    %c0_i32 = arith.constant 0 : i32
    %c0_i32_0 = arith.constant 0 : i32
    %c0_i32_1 = arith.constant 0 : i32
    return %arg0, %c0_i32, %c0_i32_0 : i32, i32, i32
  }
}

</mosaic_0001>

<bundles_post_ra>
// kernel: tpu_custom_call.1
= control target key start
LH: loop header
LB: loop body
LE: loop exit
PB: predicated region body
PF: predicated region fallthrough
CT: control target
= control target key end

     0   :  { %8 = vsyncpa [#allocation4], 0  ;;  %s8899_s0 = inlined_call_operand.vmem [shape: bf16[2,256,32], index: 0, kind: input, shape index: {}]   ;;  %s8900_s1 = inlined_call_operand.vmem [shape: bf16[32,32], index: 1, kind: input, shape index: {}]   ;;  %s8901_s2 = inlined_call_operand.vmem [shape: bf16[32,1280], index: 2, kind: input, shape index: {}]   ;;  %s8902_s3 = inlined_call_operand.hbm [shape: f32[2,1,1280], index: 3, kind: output, shape index: {}]  }
   0x1   :  { %10 = vsyncpa [#allocation4 + $0x1], 0  ;;  %s6929_s12 = smov 0   ;;  %s6931_s13 = smov 0  }
   0x2   :  { %s6933_s14 = smov 0   ;;  %s6935_s15 = smov 0  }
   0x3   :  { %s6937_s16 = smov 0   ;;  %s6939_s17 = smov 0  }
   0x4 LB: > { %s4756_s18 = sadd.s32 4294967295, %s6904_s17   ;;  %s4757_s19 = sadd.s32 4294967294, %s6904_s17   ;;  %s6904_s17 = sphi %s6939_s17, %s16_s17   ;;  %s6900_s16 = sphi %s6937_s16, %s9432_s16   ;;  %s6896_s15 = sphi %s6935_s15, %s9431_s15   ;;  %s6892_s14 = sphi %s6933_s14, %s9430_s14   ;;  %s6888_s13 = sphi %s6931_s13, %s9429_s13   ;;  %s6884_s12 = sphi %s6929_s12, %s9428_s12  }
   0x5   : > { %s28_s20 = sadd.s32 1, %s6900_s16  ;;  %s105_s21 = sadd.s32 1, %s6892_s14 }
   0x6   : > { %p30_p0 = scmp.ge.s32.totalorder %s28_s20, 2  ;;  %p115_p1 = scmp.ne.s32.totalorder %s6892_s14, %s6888_s13 }
   0x7   : > { %p116_p2 = scmp.eq.s32.totalorder %s4756_s18, 1  ;;  %p121_p3 = scmp.ne.s32.totalorder %s6888_s13, %s6884_s12 }
   0x8   : > { %s9434_s20 = smov (%p30_p0, %s28_s20), 0  ;;  %p122_p5 = scmp.eq.s32.totalorder %s4757_s19, 1 }
   0x9   : > { %p6969_p4 = por %p116_p2, %p115_p1  ;;  %s102_s23 = ssub.s32 %s6900_s16, %s9434_s20 }
   0xa   : > { %p4760_p6 = scmp.ge.s32.totalorder %s6904_s17, 1  ;;  %p103_p7 = scmp.eq.s32.totalorder %s102_s23, 0 }
   0xb   : > { %p6976_p8 = por %p122_p5, %p121_p3  ;;  %p159_p9 = scmp.lt.s32.totalorder %s6904_s17, 3 }
   0xc   : > { %s6982_s25 = scalar_select %p103_p7, %s6892_s14, %s105_s21  }
   0xd   : > { %p160_p10 = pnand %p4760_p6, %p159_p9 }
   0xf   : > { %163 = sbr.rel (%p160_p10) target bundleno = 1196 (0x4ac), region = 32 }
  0x16   : > { %v5370_v0 = vld [vmem:[%s8900_s1] sm:$0xff]   ;;  %p188_p11 = scmp.lt.s32.totalorder %s6896_s15, 1  ;;  %v5371_v1 = vld [vmem:[%s8900_s1 + $0x8] sm:$0xff]   ;;  %vm340_vm0 = vcmask 261120   ;;  %v5393_v20 = vld [vmem:[%s8901_s2 + $0x54] ss:$40 sps:$4 sm:$0xff]  }
  0x17   : > { %5271 = vmatprep.subr.bf16.mxu0 %v5370_v0  ;;  %v5390_v18 = vld [vmem:[%s8901_s2 + $0x4] ss:$40 sps:$4 sm:$0xff]   ;;  %v5388_v19 = vld [vmem:[%s8901_s2] ss:$40 sps:$4 sm:$0xff]   ;;  %v5391_v21 = vld [vmem:[%s8901_s2 + $0x50] ss:$40 sps:$4 sm:$0xff]  }
  0x18   : > { %s189_s30 = scalar_select %p188_p11, %s6896_s15, 1  ;;  %5272 = vmatpush3.bf16.msra.mxu0 %v5370_v0  ;;  %5307 = vmatprep.subr.bf16.mxu1 %v5390_v18  ;;  %v8903_v22 = vmov 0   ;;  %v5399_v23 = vld [vmem:[%s8901_s2 + $0xc] ss:$40 sps:$4 sm:$0xff]  }
  0x19   : > { %5273 = vmatprep.subr.bf16.mxu0 %v5371_v1  ;;  %5309 = vmatpush1.bf16.msra.mxu1 %v5388_v19  ;;  %v5396_v24 = vld [vmem:[%s8901_s2 + $0x14] ss:$40 sps:$4 sm:$0xff]   ;;  %s184_s21 = sand.u32 1, %s6888_s13   ;;  %s5312_s27 = smul.u32 160, %s6896_s15 }
  0x1a   : > { %s5252_s4 = sshll.u32 %s189_s30, 7  ;;  %5308 = vmatprep.subr.bf16.mxu1 %v5393_v20  ;;  %1030 = vmatprep.mubr.bf16.mxu1 %v8903_v22  ;;  %s8784_s23 = smul.u32 10, %s184_s21 }
  0x1b   : > { %s6995_s7 = scalar_lea.vmem %s8899_s0, %s5252_s4  ;;  %s8849_s4 = scalar_lea.hbm %s8902_s3, %s5312_s27 }
  0x1c   : > { %v5372_v2 = vld [vmem:[%s6995_s7] sm:$0xff]   ;;  %5274 = vmatpush3.bf16.msra.mxu0 %v5371_v1  ;;  %v5373_v3 = vld [vmem:[%s6995_s7 + $0x8] sm:$0xff]   ;;  %v5374_v4 = vld [vmem:[%s6995_s7 + $0x10] sm:$0xff]   ;;  %s8796_s26 = scalar_lea.vmem [#allocation3], %s8784_s23  ;;  %s4669_s15 = scalar_lea.sflag [#allocation4], %s184_s21 }
  0x1d   : > { %5275 = vmatprep.mubr.msk.bf16.mxu0 %vm340_vm0, %v5372_v2  ;;  %v5375_v5 = vld [vmem:[%s6995_s7 + $0x18] sm:$0xff]   ;;  %v5376_v6 = vld [vmem:[%s6995_s7 + $0x20] sm:$0xff]   ;;  %v5377_v7 = vld [vmem:[%s6995_s7 + $0x28] sm:$0xff]   ;;  %958 = vmatprep.subr.bf16.mxu0 %v5390_v18  ;;  %s4683_s28 = sshll.u32 %s8796_s26, 4  ;;  %s6908_s6 = smov [#allocation3]   ;;  %s8851_s28 = int_to_ptr.vmem [resolvable:$true] %s4683_s28 }
  0x1e   : > { %v5378_v8 = vld [vmem:[%s6995_s7 + $0x30] sm:$0xff]   ;;  %v5379_v9 = vld [vmem:[%s6995_s7 + $0x38] sm:$0xff]   ;;  %v5380_v10 = vld [vmem:[%s6995_s7 + $0x40] sm:$0xff]   ;;  %5310 = vmatpush1.bf16.msra.mxu1 %v5391_v21  ;;  %s6826_s5 = scalar_lea.vmem %s8851_s28, 160 }
  0x1f   : > { %5276 = vmatmul.mubr.msk.bf16.vlgmr.msra.gmra.mrb[0].mxu0 %vm340_vm0, %v5373_v3  ;;  %v5381_v11 = vld [vmem:[%s6995_s7 + $0x48] sm:$0xff]   ;;  %v5382_v12 = vld [vmem:[%s6995_s7 + $0x50] sm:$0xff]   ;;  %v5383_v13 = vld [vmem:[%s6995_s7 + $0x58] sm:$0xff]   ;;  %1344 = vmatprep.subr.bf16.mxu1 %v5396_v24  ;;  %p6827_p12 = scmp.ne.s32.totalorder %s8851_s28, %s6826_s5 }
  0x20   : > { %5279 = vmatprep.mubr.msk.bf16.mxu0 %vm340_vm0, %v5374_v4  ;;  %v5384_v14 = vld [vmem:[%s6995_s7 + $0x60] sm:$0xff]   ;;  %v5385_v15 = vld [vmem:[%s6995_s7 + $0x68] sm:$0xff]   ;;  %v5386_v16 = vld [vmem:[%s6995_s7 + $0x70] sm:$0xff]   ;;  %959 = vmatpush1.bf16.msra.mxu0 %v5388_v19 }
  0x21   : > { %v5387_v17 = vld [vmem:[%s6995_s7 + $0x78] sm:$0xff]   ;;  %960 = vmatprep.subr.bf16.mxu0 %v5393_v20  ;;  %p6828_p13 = pnand %p6827_p12, %p6969_p4  ;;  %s6830_s7 = sshll.u32 %s6908_s6, 4  ;;  %s6831_s7 = int_to_ptr.vmem [resolvable:$false] %s6830_s7 }
  0x22   : > { %s6832_s8 = scalar_lea.vmem %s6831_s7, 320  ;;  %p6833_p1 = scmp.lt.s32.totalorder %s8851_s28, %s6831_s7 }
  0x23   : > { %p6829_p0 = pneg %p6828_p13  ;;  %p6834_p2 = scmp.lt.s32.totalorder %s6832_s8, %s6826_s5 }
  0x24   : > { %961 = vmatpush1.bf16.msra.mxu0 %v5391_v21  ;;  %v5397_v21 = vld [vmem:[%s8901_s2 + $0x8] ss:$40 sps:$4 sm:$0xff]  }
  0x25   : > { %1151 = vmatprep.subr.bf16.mxu0 %v5399_v23  ;;  %p6835_p3 = por %p6834_p2, %p6833_p1 }
  0x27   : > { %5280 = vmatmul.mubr.msk.bf16.gmra.mrb[4].mxu0 %vm340_vm0, %v5375_v5  ;;  %p6836_p5 = pnand %p6835_p3, %p6829_p0 }
  0x28   : > { %5283 = vmatprep.mubr.msk.bf16.mxu0 %vm340_vm0, %v5376_v6 }
  0x2f   : > { %5284 = vmatmul.mubr.msk.bf16.gmra.mrb[8].mxu0 %vm340_vm0, %v5377_v7 }
  0x30   : > { %5287 = vmatprep.mubr.msk.bf16.mxu0 %vm340_vm0, %v5378_v8 }
  0x37   : > { %5288 = vmatmul.mubr.msk.bf16.gmra.mrb[12].mxu0 %vm340_vm0, %v5379_v9 }
  0x38   : > { %5291 = vmatprep.mubr.msk.bf16.mxu0 %vm340_vm0, %v5380_v10 }
  0x3f   : > { %5292 = vmatmul.mubr.msk.bf16.gmra.mrb[16].mxu0 %vm340_vm0, %v5381_v11 }
  0x40   : > { %5295 = vmatprep.mubr.msk.bf16.mxu0 %vm340_vm0, %v5382_v12 }
  0x47   : > { %5296 = vmatmul.mubr.msk.bf16.gmra.mrb[20].mxu0 %vm340_vm0, %v5383_v13 }
  0x48   : > { %5299 = vmatprep.mubr.msk.bf16.mxu0 %vm340_vm0, %v5384_v14 }
  0x4f   : > { %5300 = vmatmul.mubr.msk.bf16.gmra.mrb[24].mxu0 %vm340_vm0, %v5385_v15 }
  0x50   : > { %5303 = vmatprep.mubr.msk.bf16.mxu0 %vm340_vm0, %v5386_v16 }
  0x57   : > { %5304 = vmatmul.mubr.msk.bf16.gmra.mrb[28].mxu0 %vm340_vm0, %v5387_v17 }
  0x58   : > { %990 = vmatprep.mubr.bf16.mxu0 %v8903_v22 }
  0xf2   : > { %v7049_v25 = vpop.f32.mrb[0].mxu0 }
  0xf3   : > { %v4799_v26 = vmul.f32 -1.442695, %v7049_v25  ;;  %v7052_v27 = vpop.f32.mrb[1].mxu0 }
  0xf4   : > { %v4797_v28 = vmul.f32 -1.442695, %v7052_v27  ;;  %v7055_v29 = vpop.f32.mrb[2].mxu0 }
  0xf5   : > { %5418 = vpow2.f32 %v4799_v26  ;;  %v4800_v30 = vmul.f32 -1.442695, %v7055_v29  ;;  %v7058_v31 = vpop.f32.mrb[3].mxu0 }
  0xf6   : > { %5420 = vpow2.f32 %v4797_v28  ;;  %v4798_v32 = vmul.f32 -1.442695, %v7058_v31 }
  0xf7   : > { %5422 = vpow2.f32 %v4800_v30 }
  0xf8   : > { %5424 = vpow2.f32 %v4798_v32 }
  0xfa   : > { %v7061_v33 = vpop.f32.mrb[4].mxu0 }
  0xfb   : > { %v4803_v34 = vmul.f32 -1.442695, %v7061_v33  ;;  %v7064_v35 = vpop.f32.mrb[5].mxu0 }
  0xfc   : > { %v4801_v36 = vmul.f32 -1.442695, %v7064_v35  ;;  %v7067_v37 = vpop.f32.mrb[6].mxu0 }
  0xfd   : > { %5426 = vpow2.f32 %v4803_v34  ;;  %v4804_v38 = vmul.f32 -1.442695, %v7067_v37  ;;  %v7070_v39 = vpop.f32.mrb[7].mxu0 }
  0xfe   : > { %5428 = vpow2.f32 %v4801_v36  ;;  %v4802_v40 = vmul.f32 -1.442695, %v7070_v39 }
  0xff   : > { %v5419_v41 = vpop.eup %5418  ;;  %5430 = vpow2.f32 %v4804_v38 }
 0x100   : > { %v5421_v42 = vpop.eup %5420  ;;  %v648_v43 = vadd.f32 1.0, %v5419_v41  ;;  %5432 = vpow2.f32 %v4802_v40 }
 0x101   : > { %v5423_v44 = vpop.eup %5422  ;;  %v646_v45 = vadd.f32 1.0, %v5421_v42 }
 0x102   : > { %v5425_v46 = vpop.eup %5424  ;;  %5434 = vrcp.f32 %v648_v43  ;;  %v649_v47 = vadd.f32 1.0, %v5423_v44  ;;  %v7073_v48 = vpop.f32.mrb[8].mxu0  ;;  %v5400_v43 = vld [vmem:[%s8901_s2 + $0x58] ss:$40 sps:$4 sm:$0xff]  }
 0x103   : > { %5436 = vrcp.f32 %v646_v45  ;;  %v647_v49 = vadd.f32 1.0, %v5425_v46  ;;  %v4807_v50 = vmul.f32 -1.442695, %v7073_v48  ;;  %v7076_v51 = vpop.f32.mrb[9].mxu0  ;;  %v5408_v46 = vld [vmem:[%s8901_s2 + $0x1c] ss:$40 sps:$4 sm:$0xff]  }
 0x104   : > { %5438 = vrcp.f32 %v649_v47  ;;  %v4805_v52 = vmul.f32 -1.442695, %v7076_v51  ;;  %v7079_v53 = vpop.f32.mrb[10].mxu0 }
 0x105   : > { %5440 = vrcp.f32 %v647_v49  ;;  %v4808_v54 = vmul.f32 -1.442695, %v7079_v53  ;;  %v7082_v55 = vpop.f32.mrb[11].mxu0 }
 0x106   : > { %5442 = vpow2.f32 %v4807_v50  ;;  %v4806_v56 = vmul.f32 -1.442695, %v7082_v55 }
 0x107   : > { %v5427_v57 = vpop.eup %5426  ;;  %5444 = vpow2.f32 %v4805_v52 }
 0x108   : > { %v5429_v58 = vpop.eup %5428  ;;  %v652_v59 = vadd.f32 1.0, %v5427_v57  ;;  %5446 = vpow2.f32 %v4808_v54 }
 0x109   : > { %v5431_v60 = vpop.eup %5430  ;;  %v650_v61 = vadd.f32 1.0, %v5429_v58  ;;  %5448 = vpow2.f32 %v4806_v56 }
 0x10a   : > { %v5433_v62 = vpop.eup %5432  ;;  %5450 = vrcp.f32 %v652_v59  ;;  %v653_v63 = vadd.f32 1.0, %v5431_v60  ;;  %v7085_v0 = vpop.f32.mrb[12].mxu0 }
 0x10b   : > { %5452 = vrcp.f32 %v650_v61  ;;  %v651_v1 = vadd.f32 1.0, %v5433_v62  ;;  %v4811_v2 = vmul.f32 -1.442695, %v7085_v0  ;;  %v7088_v3 = vpop.f32.mrb[13].mxu0 }
 0x10c   : > { %v5435_v4 = vpop.eup %5434  ;;  %5454 = vrcp.f32 %v653_v63  ;;  %v4809_v5 = vmul.f32 -1.442695, %v7088_v3  ;;  %v7091_v6 = vpop.f32.mrb[14].mxu0 }
 0x10d   : > { %v5437_v7 = vpop.eup %5436  ;;  %5456 = vrcp.f32 %v651_v1  ;;  %v4812_v8 = vmul.f32 -1.442695, %v7091_v6  ;;  %v7094_v9 = vpop.f32.mrb[15].mxu0  ;;  %v744_v13 = vmul.f32 %v5435_v4, %v7049_v25 }
 0x10e   : > { %v5439_v10 = vpop.eup %5438  ;;  %5458 = vpow2.f32 %v4811_v2  ;;  %v4810_v11 = vmul.f32 -1.442695, %v7094_v9  ;;  %v742_v16 = vmul.f32 %v5437_v7, %v7052_v27  ;;  %v5402_v27 = vld [vmem:[%s8901_s2 + $0x5c] ss:$40 sps:$4 sm:$0xff]  }
 0x10f   : > { %v5441_v12 = vpop.eup %5440  ;;  %v745_v14 = vmul.f32 %v5439_v10, %v7055_v29  ;;  %5460 = vpow2.f32 %v4809_v5 }
 0x110   : > { %v5443_v15 = vpop.eup %5442  ;;  %v743_v17 = vmul.f32 %v5441_v12, %v7058_v31  ;;  %5462 = vpow2.f32 %v4812_v8 }
 0x111   : > { %v5445_v18 = vpop.eup %5444  ;;  %v7101_v19 = vpack.c.bf16 %v745_v14, %v744_v13  ;;  %v656_v20 = vadd.f32 1.0, %v5443_v15  ;;  %5464 = vpow2.f32 %v4810_v11 }
 0x112   : > { %v5447_v23 = vpop.eup %5446  ;;  %v7106_v24 = vpack.c.bf16 %v743_v17, %v742_v16  ;;  %v654_v25 = vadd.f32 1.0, %v5445_v18  ;;  %v7108_v26 = vpop.f32.mrb[16].mxu0 }
 0x113   : > { %v5449_v28 = vpop.eup %5448  ;;  %5466 = vrcp.f32 %v656_v20  ;;  %v657_v29 = vadd.f32 1.0, %v5447_v23  ;;  %v4815_v30 = vmul.f32 -1.442695, %v7108_v26  ;;  %v7114_v31 = vpop.f32.mrb[17].mxu0 }
 0x114   : > { %v5451_v32 = vpop.eup %5450  ;;  %5468 = vrcp.f32 %v654_v25  ;;  %v655_v34 = vadd.f32 1.0, %v5449_v28  ;;  %v4813_v36 = vmul.f32 -1.442695, %v7114_v31  ;;  %v7117_v38 = vpop.f32.mrb[18].mxu0  ;;  %4849 = vmatmul.mubr.msk.bf16.vlgmr.msra.gmra.mrb[32].mxu0 %vm340_vm0, %v7106_v24  ;;  %v5394_v25 = vld [vmem:[%s8901_s2 + $0x10] ss:$40 sps:$4 sm:$0xff]  }
 0x115   : > { %v5453_v40 = vpop.eup %5452  ;;  %5470 = vrcp.f32 %v657_v29  ;;  %v4816_v41 = vmul.f32 -1.442695, %v7117_v38  ;;  %v7122_v42 = vpop.f32.mrb[19].mxu0  ;;  %1000 = vmatprep.mubr.bf16.mxu0 %v8903_v22  ;;  %1152 = vmatpush1.bf16.msra.mxu0 %v5397_v21  ;;  %v748_v49 = vmul.f32 %v5451_v32, %v7061_v33 }
 0x116   : > { %v5455_v44 = vpop.eup %5454  ;;  %5472 = vrcp.f32 %v655_v34  ;;  %v4814_v45 = vmul.f32 -1.442695, %v7122_v42  ;;  %1153 = vmatprep.subr.bf16.mxu0 %v5402_v27  ;;  %v746_v54 = vmul.f32 %v5453_v40, %v7064_v35 }
 0x117   : > { %v5457_v47 = vpop.eup %5456  ;;  %v749_v50 = vmul.f32 %v5455_v44, %v7067_v37  ;;  %5474 = vpow2.f32 %v4815_v30 }
 0x118   : > { %v5459_v52 = vpop.eup %5458  ;;  %v747_v56 = vmul.f32 %v5457_v47, %v7070_v39  ;;  %5476 = vpow2.f32 %v4813_v36 }
 0x119   : > { %v5461_v57 = vpop.eup %5460  ;;  %v7136_v58 = vpack.c.bf16 %v749_v50, %v748_v49  ;;  %v660_v59 = vadd.f32 1.0, %v5459_v52  ;;  %5478 = vpow2.f32 %v4816_v41  ;;  %1154 = vmatpush1.bf16.msra.mxu0 %v5400_v43  ;;  %v5411_v50 = vld [vmem:[%s8901_s2 + $0x24] ss:$40 sps:$4 sm:$0xff]  }
 0x11a   : > { %v5463_v60 = vpop.eup %5462  ;;  %v7138_v61 = vpack.c.bf16 %v747_v56, %v746_v54  ;;  %v658_v62 = vadd.f32 1.0, %v5461_v57  ;;  %5480 = vpow2.f32 %v4814_v45  ;;  %v7140_v33 = vpop.f32.mrb[20].mxu0  ;;  %1537 = vmatprep.subr.bf16.mxu0 %v5408_v46  ;;  %v5403_v46 = vld [vmem:[%s8901_s2 + $0x60] ss:$40 sps:$4 sm:$0xff]  }
 0x11b   : > { %v5465_v37 = vpop.eup %5464  ;;  %5482 = vrcp.f32 %v660_v59  ;;  %v661_v35 = vadd.f32 1.0, %v5463_v60  ;;  %v4819_v39 = vmul.f32 -1.442695, %v7140_v33  ;;  %v7143_v63 = vpop.f32.mrb[21].mxu0 }
 0x11c   : > { %5484 = vrcp.f32 %v658_v62  ;;  %v659_v1 = vadd.f32 1.0, %v5465_v37  ;;  %v4817_v2 = vmul.f32 -1.442695, %v7143_v63  ;;  %v7146_v4 = vpop.f32.mrb[22].mxu0  ;;  %4850 = vmatmul.mubr.msk.bf16.gmra.mrb[36].mxu0 %vm340_vm0, %v7101_v19 }
 0x11d   : > { %v5467_v5 = vpop.eup %5466  ;;  %5486 = vrcp.f32 %v661_v35  ;;  %v4820_v7 = vmul.f32 -1.442695, %v7146_v4  ;;  %v7151_v8 = vpop.f32.mrb[23].mxu0  ;;  %1010 = vmatprep.mubr.bf16.mxu0 %v8903_v22 }
 0x11e   : > { %v5469_v10 = vpop.eup %5468  ;;  %5488 = vrcp.f32 %v659_v1  ;;  %v4818_v11 = vmul.f32 -1.442695, %v7151_v8  ;;  %v752_v14 = vmul.f32 %v5467_v5, %v7073_v48 }
 0x11f   : > { %v5471_v12 = vpop.eup %5470  ;;  %5490 = vpow2.f32 %v4819_v39  ;;  %v750_v17 = vmul.f32 %v5469_v10, %v7076_v51  ;;  %v5405_v51 = vld [vmem:[%s8901_s2 + $0x64] ss:$40 sps:$4 sm:$0xff]  }
 0x120   : > { %v5473_v13 = vpop.eup %5472  ;;  %v753_v15 = vmul.f32 %v5471_v12, %v7079_v53  ;;  %5492 = vpow2.f32 %v4817_v2 }
 0x121   : > { %v5475_v16 = vpop.eup %5474  ;;  %v751_v18 = vmul.f32 %v5473_v13, %v7082_v55  ;;  %5494 = vpow2.f32 %v4820_v7 }
 0x122   : > { %v5477_v20 = vpop.eup %5476  ;;  %v7159_v21 = vpack.c.bf16 %v753_v15, %v752_v14  ;;  %v664_v23 = vadd.f32 1.0, %v5475_v16  ;;  %5496 = vpow2.f32 %v4818_v11  ;;  %v7164_v27 = vpop.f32.mrb[24].mxu0 }
 0x123   : > { %v5479_v48 = vpop.eup %5478  ;;  %v7166_v53 = vpack.c.bf16 %v751_v18, %v750_v17  ;;  %v662_v28 = vadd.f32 1.0, %v5477_v20  ;;  %v7168_v29 = vpop.f32.mrb[25].mxu0  ;;  %v4823_v32 = vmul.f32 -1.442695, %v7164_v27 }
 0x124   : > { %v5481_v55 = vpop.eup %5480  ;;  %5498 = vrcp.f32 %v664_v23  ;;  %v665_v30 = vadd.f32 1.0, %v5479_v48  ;;  %4851 = vmatmul.mubr.msk.bf16.gmra.mrb[40].mxu0 %vm340_vm0, %v7138_v61  ;;  %v7176_v34 = vpop.f32.mrb[26].mxu0  ;;  %v4821_v41 = vmul.f32 -1.442695, %v7168_v29 }
 0x125   : > { %v5483_v36 = vpop.eup %5482  ;;  %5500 = vrcp.f32 %v662_v28  ;;  %v663_v40 = vadd.f32 1.0, %v5481_v55  ;;  %4853 = vmatmul.mubr.msk.bf16.vlgmr.msra.gmra.mrb[0].mxu1 %vm340_vm0, %v7166_v53  ;;  %v7181_v43 = vpop.f32.mrb[27].mxu0  ;;  %1020 = vmatprep.mubr.bf16.mxu0 %v8903_v22  ;;  %v4824_v45 = vmul.f32 -1.442695, %v7176_v34 }
 0x126   : > { %v5485_v44 = vpop.eup %5484  ;;  %5502 = vrcp.f32 %v665_v30  ;;  %1345 = vmatpush1.bf16.msra.mxu1 %v5394_v25  ;;  %1040 = vmatprep.mubr.bf16.mxu1 %v8903_v22  ;;  %v4822_v49 = vmul.f32 -1.442695, %v7181_v43  ;;  %v756_v54 = vmul.f32 %v5483_v36, %v7085_v0 }
 0x127   : > { %v5487_v47 = vpop.eup %5486  ;;  %5504 = vrcp.f32 %v663_v40  ;;  %1346 = vmatprep.subr.bf16.mxu1 %v5405_v51  ;;  %v754_v59 = vmul.f32 %v5485_v44, %v7088_v3  ;;  %v5406_v51 = vld [vmem:[%s8901_s2 + $0x18] ss:$40 sps:$4 sm:$0xff]  }
 0x128   : > { %v5489_v52 = vpop.eup %5488  ;;  %v757_v56 = vmul.f32 %v5487_v47, %v7091_v6  ;;  %5506 = vpow2.f32 %v4823_v32 }
 0x129   : > { %v5491_v57 = vpop.eup %5490  ;;  %v755_v60 = vmul.f32 %v5489_v52, %v7094_v9  ;;  %5508 = vpow2.f32 %v4821_v41 }
 0x12a   : > { %v5493_v62 = vpop.eup %5492  ;;  %v7197_v37 = vpack.c.bf16 %v757_v56, %v756_v54  ;;  %v668_v35 = vadd.f32 1.0, %v5491_v57  ;;  %5510 = vpow2.f32 %v4824_v45  ;;  %v7199_v39 = vpop.f32.mrb[28].mxu0  ;;  %1347 = vmatpush1.bf16.msra.mxu1 %v5403_v46  ;;  %v5412_v45 = vld [vmem:[%s8901_s2 + $0x68] ss:$40 sps:$4 sm:$0xff]  }
 0x12b   : > { %v5495_v1 = vpop.eup %5494  ;;  %v7201_v2 = vpack.c.bf16 %v755_v60, %v754_v59  ;;  %v666_v0 = vadd.f32 1.0, %v5493_v62  ;;  %5512 = vpow2.f32 %v4822_v49  ;;  %v7203_v6 = vpop.f32.mrb[29].mxu0  ;;  %1730 = vmatprep.subr.bf16.mxu1 %v5411_v50  ;;  %v4827_v5 = vmul.f32 -1.442695, %v7199_v39 }
 0x12c   : > { %v5497_v3 = vpop.eup %5496  ;;  %5514 = vrcp.f32 %v668_v35  ;;  %v669_v9 = vadd.f32 1.0, %v5495_v1  ;;  %4852 = vmatmul.mubr.msk.bf16.gmra.mrb[44].mxu0 %vm340_vm0, %v7136_v58  ;;  %v7208_v7 = vpop.f32.mrb[30].mxu0  ;;  %v4825_v11 = vmul.f32 -1.442695, %v7203_v6 }
 0x12d   : > { %5516 = vrcp.f32 %v666_v0  ;;  %v667_v10 = vadd.f32 1.0, %v5497_v3  ;;  %4854 = vmatmul.mubr.msk.bf16.gmra.mrb[4].mxu1 %vm340_vm0, %v7159_v21  ;;  %1183 = vmatprep.mubr.bf16.mxu0 %v8903_v22  ;;  %v7214_v12 = vpop.f32.mrb[31].mxu0  ;;  %v4828_v14 = vmul.f32 -1.442695, %v7208_v7 }
 0x12e   : > { %v5499_v13 = vpop.eup %5498  ;;  %5518 = vrcp.f32 %v669_v9  ;;  %1050 = vmatprep.mubr.bf16.mxu1 %v8903_v22  ;;  %v4826_v16 = vmul.f32 -1.442695, %v7214_v12 }
 0x12f   : > { %v5501_v15 = vpop.eup %5500  ;;  %5520 = vrcp.f32 %v667_v10  ;;  %v760_v20 = vmul.f32 %v5499_v13, %v7108_v26  ;;  %v5414_v26 = vld [vmem:[%s8901_s2 + $0x6c] ss:$40 sps:$4 sm:$0xff]  }
 0x130   : > { %v5503_v17 = vpop.eup %5502  ;;  %5522 = vpow2.f32 %v4827_v5  ;;  %v758_v48 = vmul.f32 %v5501_v15, %v7114_v31 }
 0x131   : > { %v5505_v18 = vpop.eup %5504  ;;  %v761_v23 = vmul.f32 %v5503_v17, %v7117_v38  ;;  %5524 = vpow2.f32 %v4825_v11 }
 0x132   : > { %v5507_v25 = vpop.eup %5506  ;;  %v759_v28 = vmul.f32 %v5505_v18, %v7122_v42  ;;  %5526 = vpow2.f32 %v4828_v14 }
 0x133   : > { %v5509_v55 = vpop.eup %5508  ;;  %v7226_v30 = vpack.c.bf16 %v761_v23, %v760_v20  ;;  %v672_v32 = vadd.f32 1.0, %v5507_v25  ;;  %5528 = vpow2.f32 %v4826_v16 }
 0x134   : > { %v5511_v38 = vpop.eup %5510  ;;  %v7231_v36 = vpack.c.bf16 %v759_v28, %v758_v48  ;;  %v670_v31 = vadd.f32 1.0, %v5509_v55  ;;  %4865 = vmatmul.mubr.msk.bf16.vlgmr.msra.gmra.mrb[48].mxu0 %vm340_vm0, %v7106_v24 }
 0x135   : > { %9080 = vst [vmem:[#allocation6_spill] sm:$0xff] %v7226_v30  ;;  %v5513_v42 = vpop.eup %5512  ;;  %5530 = vrcp.f32 %v672_v32  ;;  %v673_v40 = vadd.f32 1.0, %v5511_v38  ;;  %4855 = vmatmul.mubr.msk.bf16.gmra.mrb[8].mxu1 %vm340_vm0, %v7201_v2  ;;  %1193 = vmatprep.mubr.bf16.mxu0 %v8903_v22 }
 0x136   : > { %9081 = vst [vmem:[#allocation7_spill] sm:$0xff] %v7231_v36  ;;  %v5515_v41 = vpop.eup %5514  ;;  %5532 = vrcp.f32 %v670_v31  ;;  %v671_v44 = vadd.f32 1.0, %v5513_v42  ;;  %1060 = vmatprep.mubr.bf16.mxu1 %v8903_v22  ;;  %1538 = vmatpush1.bf16.msra.mxu0 %v5406_v51 }
 0x137   : > { %v5517_v46 = vpop.eup %5516  ;;  %5534 = vrcp.f32 %v673_v40  ;;  %1539 = vmatprep.subr.bf16.mxu0 %v5414_v26  ;;  %v764_v50 = vmul.f32 %v5515_v41, %v7140_v33 }
 0x138   : > { %v5519_v47 = vpop.eup %5518  ;;  %5536 = vrcp.f32 %v671_v44  ;;  %v762_v56 = vmul.f32 %v5517_v46, %v7143_v63 }
 0x139   : > { %v5521_v49 = vpop.eup %5520  ;;  %v765_v52 = vmul.f32 %v5519_v47, %v7146_v4 }
 0x13a   : > { %v5523_v54 = vpop.eup %5522  ;;  %v763_v57 = vmul.f32 %v5521_v49, %v7151_v8  ;;  %1540 = vmatpush1.bf16.msra.mxu0 %v5412_v45 }
 0x13b   : > { %v5525_v59 = vpop.eup %5524  ;;  %v7246_v60 = vpack.c.bf16 %v765_v52, %v764_v50  ;;  %v676_v62 = vadd.f32 1.0, %v5523_v54 }
 0x13c   : > { %v5527_v35 = vpop.eup %5526  ;;  %v7248_v1 = vpack.c.bf16 %v763_v57, %v762_v56  ;;  %v674_v0 = vadd.f32 1.0, %v5525_v59  ;;  %4866 = vmatmul.mubr.msk.bf16.gmra.mrb[52].mxu0 %vm340_vm0, %v7101_v19 }
 0x13d   : > { %9082 = vst [vmem:[#allocation8_spill] sm:$0xff] %v7246_v60  ;;  %v5529_v33 = vpop.eup %5528  ;;  %5538 = vrcp.f32 %v676_v62  ;;  %v677_v4 = vadd.f32 1.0, %v5527_v35  ;;  %4856 = vmatmul.mubr.msk.bf16.gmra.mrb[12].mxu1 %vm340_vm0, %v7197_v37  ;;  %1203 = vmatprep.mubr.bf16.mxu0 %v8903_v22 }
 0x13e   : > { %9083 = vst [vmem:[#allocation9_spill] sm:$0xff] %v7248_v1  ;;  %5540 = vrcp.f32 %v674_v0  ;;  %v675_v63 = vadd.f32 1.0, %v5529_v33  ;;  %1070 = vmatprep.mubr.bf16.mxu1 %v8903_v22 }
 0x13f   : > { %v5531_v8 = vpop.eup %5530  ;;  %5542 = vrcp.f32 %v677_v4 }
 0x140   : > { %v5533_v3 = vpop.eup %5532  ;;  %v768_v9 = vmul.f32 %v5531_v8, %v7164_v27  ;;  %5544 = vrcp.f32 %v675_v63 }
 0x141   : > { %v5535_v5 = vpop.eup %5534  ;;  %v766_v10 = vmul.f32 %v5533_v3, %v7168_v29 }
 0x142   : > { %v5537_v11 = vpop.eup %5536  ;;  %v769_v13 = vmul.f32 %v5535_v5, %v7176_v34 }
 0x143   : > { %v767_v14 = vmul.f32 %v5537_v11, %v7181_v43 }
 0x144   : > { %v7260_v15 = vpack.c.bf16 %v769_v13, %v768_v9  ;;  %4867 = vmatmul.mubr.msk.bf16.gmra.mrb[56].mxu0 %vm340_vm0, %v7138_v61 }
 0x145   : > { %v7264_v16 = vpack.c.bf16 %v767_v14, %v766_v10  ;;  %4857 = vmatmul.mubr.msk.bf16.gmra.mrb[16].mxu1 %vm340_vm0, %v7231_v36  ;;  %1213 = vmatprep.mubr.bf16.mxu0 %v8903_v22 }
 0x146   : > { %9084 = vst [vmem:[#allocation10_spill] sm:$0xff] %v7260_v15  ;;  %1080 = vmatprep.mubr.bf16.mxu1 %v8903_v22 }
 0x147   : > { %9085 = vst [vmem:[#allocation11_spill] sm:$0xff] %v7264_v16  ;;  %v5539_v27 = vpop.eup %5538 }
 0x148   : > { %v5541_v29 = vpop.eup %5540  ;;  %v772_v34 = vmul.f32 %v5539_v27, %v7199_v39  ;;  %v5409_v39 = vld [vmem:[%s8901_s2 + $0x20] ss:$40 sps:$4 sm:$0xff]  }
 0x149   : > { %v5543_v17 = vpop.eup %5542  ;;  %v770_v43 = vmul.f32 %v5541_v29, %v7203_v6  ;;  %v5417_v6 = vld [vmem:[%s8901_s2 + $0x74] ss:$40 sps:$4 sm:$0xff]  }
 0x14a   : > { %v5545_v18 = vpop.eup %5544  ;;  %v773_v20 = vmul.f32 %v5543_v17, %v7208_v7  ;;  %v5415_v7 = vld [vmem:[%s8901_s2 + $0x70] ss:$40 sps:$4 sm:$0xff]  }
 0x14b   : > { %v771_v23 = vmul.f32 %v5545_v18, %v7214_v12 }
 0x14c   : > { %v7274_v25 = vpack.c.bf16 %v773_v20, %v772_v34  ;;  %4868 = vmatmul.mubr.msk.bf16.gmra.mrb[60].mxu0 %vm340_vm0, %v7136_v58 }
 0x14d   : > { %v7278_v48 = vpack.c.bf16 %v771_v23, %v770_v43  ;;  %4858 = vmatmul.mubr.msk.bf16.gmra.mrb[20].mxu1 %vm340_vm0, %v7226_v30  ;;  %1223 = vmatprep.mubr.bf16.mxu0 %v8903_v22 }
 0x14e   : > { %1090 = vmatprep.mubr.bf16.mxu1 %v8903_v22 }
 0x14f   : > { %9086 = vst [vmem:[#allocation12_spill] sm:$0xff] %v7278_v48 }
 0x154   : > { %4869 = vmatmul.mubr.msk.bf16.gmra.mrb[64].mxu0 %vm340_vm0, %v7166_v53 }
 0x155   : > { %4859 = vmatmul.mubr.msk.bf16.gmra.mrb[24].mxu1 %vm340_vm0, %v7248_v1  ;;  %1233 = vmatprep.mubr.bf16.mxu0 %v8903_v22 }
 0x156   : > { %1100 = vmatprep.mubr.bf16.mxu1 %v8903_v22 }
 0x15c   : > { %4870 = vmatmul.mubr.msk.bf16.gmra.mrb[68].mxu0 %vm340_vm0, %v7159_v21 }
 0x15d   : > { %4860 = vmatmul.mubr.msk.bf16.gmra.mrb[28].mxu1 %vm340_vm0, %v7246_v60  ;;  %1243 = vmatprep.mubr.bf16.mxu0 %v8903_v22 }
 0x15e   : > { %1110 = vmatprep.mubr.bf16.mxu1 %v8903_v22 }
 0x164   : > { %4871 = vmatmul.mubr.msk.bf16.gmra.mrb[72].mxu0 %vm340_vm0, %v7201_v2 }
 0x165   : > { %4861 = vmatmul.mubr.msk.bf16.gmra.mrb[32].mxu1 %vm340_vm0, %v7264_v16  ;;  %1253 = vmatprep.mubr.bf16.mxu0 %v8903_v22 }
 0x166   : > { %1120 = vmatprep.mubr.bf16.mxu1 %v8903_v22 }
 0x16c   : > { %4872 = vmatmul.mubr.msk.bf16.gmra.mrb[76].mxu0 %vm340_vm0, %v7197_v37 }
 0x16d   : > { %4862 = vmatmul.mubr.msk.bf16.gmra.mrb[36].mxu1 %vm340_vm0, %v7260_v15  ;;  %1263 = vmatprep.mubr.bf16.mxu0 %v8903_v22 }
 0x16e   : > { %1130 = vmatprep.mubr.bf16.mxu1 %v8903_v22 }
 0x174   : > { %4873 = vmatmul.mubr.msk.bf16.gmra.mrb[80].mxu0 %vm340_vm0, %v7231_v36 }
 0x175   : > { %4863 = vmatmul.mubr.msk.bf16.gmra.mrb[40].mxu1 %vm340_vm0, %v7278_v48  ;;  %1273 = vmatprep.mubr.bf16.mxu0 %v8903_v22 }
 0x176   : > { %1140 = vmatprep.mubr.bf16.mxu1 %v8903_v22 }
 0x17c   : > { %4874 = vmatmul.mubr.msk.bf16.gmra.mrb[84].mxu0 %vm340_vm0, %v7226_v30 }
 0x17d   : > { %4864 = vmatmul.mubr.msk.bf16.gmra.mrb[44].mxu1 %vm340_vm0, %v7274_v25  ;;  %1283 = vmatprep.mubr.bf16.mxu0 %v8903_v22 }
 0x17e   : > { %1376 = vmatprep.mubr.bf16.mxu1 %v8903_v22 }
 0x184   : > { %4875 = vmatmul.mubr.msk.bf16.gmra.mrb[88].mxu0 %vm340_vm0, %v7248_v1 }
 0x185   : > { %4881 = vmatmul.mubr.msk.bf16.vlgmr.msra.gmra.mrb[48].mxu1 %vm340_vm0, %v7106_v24  ;;  %1293 = vmatprep.mubr.bf16.mxu0 %v8903_v22 }
 0x186   : > { %1731 = vmatpush1.bf16.msra.mxu1 %v5409_v39  ;;  %1386 = vmatprep.mubr.bf16.mxu1 %v8903_v22 }
 0x187   : > { %1732 = vmatprep.subr.bf16.mxu1 %v5417_v6 }
 0x18a   : > { %1733 = vmatpush1.bf16.msra.mxu1 %v5415_v7 }
 0x18c   : > { %4876 = vmatmul.mubr.msk.bf16.gmra.mrb[92].mxu0 %vm340_vm0, %v7246_v60 }
 0x18d   : > { %4882 = vmatmul.mubr.msk.bf16.gmra.mrb[52].mxu1 %vm340_vm0, %v7101_v19  ;;  %1303 = vmatprep.mubr.bf16.mxu0 %v8903_v22 }
 0x18e   : > { %1396 = vmatprep.mubr.bf16.mxu1 %v8903_v22 }
 0x194   : > { %4877 = vmatmul.mubr.msk.bf16.gmra.mrb[96].mxu0 %vm340_vm0, %v7264_v16 }
 0x195   : > { %4883 = vmatmul.mubr.msk.bf16.gmra.mrb[56].mxu1 %vm340_vm0, %v7138_v61  ;;  %1313 = vmatprep.mubr.bf16.mxu0 %v8903_v22 }
 0x196   : > { %1406 = vmatprep.mubr.bf16.mxu1 %v8903_v22 }
 0x19c   : > { %4878 = vmatmul.mubr.msk.bf16.gmra.mrb[100].mxu0 %vm340_vm0, %v7260_v15 }
 0x19d   : > { %4884 = vmatmul.mubr.msk.bf16.gmra.mrb[60].mxu1 %vm340_vm0, %v7136_v58  ;;  %1323 = vmatprep.mubr.bf16.mxu0 %v8903_v22 }
 0x19e   : > { %1416 = vmatprep.mubr.bf16.mxu1 %v8903_v22 }
 0x1a4   : > { %4879 = vmatmul.mubr.msk.bf16.gmra.mrb[104].mxu0 %vm340_vm0, %v7278_v48 }
 0x1a5   : > { %4885 = vmatmul.mubr.msk.bf16.gmra.mrb[64].mxu1 %vm340_vm0, %v7166_v53  ;;  %1333 = vmatprep.mubr.bf16.mxu0 %v8903_v22 }
 0x1a6   : > { %1426 = vmatprep.mubr.bf16.mxu1 %v8903_v22 }
 0x1ac   : > { %4880 = vmatmul.mubr.msk.bf16.gmra.mrb[108].mxu0 %vm340_vm0, %v7274_v25 }
 0x1ad   : > { %4886 = vmatmul.mubr.msk.bf16.gmra.mrb[68].mxu1 %vm340_vm0, %v7159_v21  ;;  %1569 = vmatprep.mubr.bf16.mxu0 %v8903_v22 }
 0x1ae   : > { %1436 = vmatprep.mubr.bf16.mxu1 %v8903_v22 }
 0x1b4   : > { %4897 = vmatmul.mubr.msk.bf16.vlgmr.msra.gmra.mrb[112].mxu0 %vm340_vm0, %v7106_v24 }
 0x1b5   : > { %4887 = vmatmul.mubr.msk.bf16.gmra.mrb[72].mxu1 %vm340_vm0, %v7201_v2  ;;  %1579 = vmatprep.mubr.bf16.mxu0 %v8903_v22 }
 0x1b6   : > { %1446 = vmatprep.mubr.bf16.mxu1 %v8903_v22 }
 0x1bc   : > { %4898 = vmatmul.mubr.msk.bf16.gmra.mrb[116].mxu0 %vm340_vm0, %v7101_v19 }
 0x1bd   : > { %4888 = vmatmul.mubr.msk.bf16.gmra.mrb[76].mxu1 %vm340_vm0, %v7197_v37  ;;  %1589 = vmatprep.mubr.bf16.mxu0 %v8903_v22 }
 0x1be   : > { %1456 = vmatprep.mubr.bf16.mxu1 %v8903_v22 }
 0x1c4   : > { %4899 = vmatmul.mubr.msk.bf16.gmra.mrb[120].mxu0 %vm340_vm0, %v7138_v61 }
 0x1c5   : > { %4889 = vmatmul.mubr.msk.bf16.gmra.mrb[80].mxu1 %vm340_vm0, %v7231_v36  ;;  %1599 = vmatprep.mubr.bf16.mxu0 %v8903_v22 }
 0x1c6   : > { %1466 = vmatprep.mubr.bf16.mxu1 %v8903_v22 }
 0x1cc   : > { %4900 = vmatmul.mubr.msk.bf16.gmra.mrb[124].mxu0 %vm340_vm0, %v7136_v58 }
 0x1cd   : > { %4890 = vmatmul.mubr.msk.bf16.gmra.mrb[84].mxu1 %vm340_vm0, %v7226_v30  ;;  %1609 = vmatprep.mubr.bf16.mxu0 %v8903_v22 }
 0x1ce   : > { %1476 = vmatprep.mubr.bf16.mxu1 %v8903_v22 }
 0x1d4   : > { %4901 = vmatmul.mubr.msk.bf16.gmra.mrb[128].mxu0 %vm340_vm0, %v7166_v53 }
 0x1d5   : > { %4891 = vmatmul.mubr.msk.bf16.gmra.mrb[88].mxu1 %vm340_vm0, %v7248_v1  ;;  %1619 = vmatprep.mubr.bf16.mxu0 %v8903_v22 }
 0x1d6   : > { %1486 = vmatprep.mubr.bf16.mxu1 %v8903_v22 }
 0x1dc   : > { %4902 = vmatmul.mubr.msk.bf16.gmra.mrb[132].mxu0 %vm340_vm0, %v7159_v21 }
 0x1dd   : > { %4892 = vmatmul.mubr.msk.bf16.gmra.mrb[92].mxu1 %vm340_vm0, %v7246_v60  ;;  %1629 = vmatprep.mubr.bf16.mxu0 %v8903_v22 }
 0x1de   : > { %1496 = vmatprep.mubr.bf16.mxu1 %v8903_v22 }
 0x1e4   : > { %4903 = vmatmul.mubr.msk.bf16.gmra.mrb[136].mxu0 %vm340_vm0, %v7201_v2 }
 0x1e5   : > { %4893 = vmatmul.mubr.msk.bf16.gmra.mrb[96].mxu1 %vm340_vm0, %v7264_v16  ;;  %1639 = vmatprep.mubr.bf16.mxu0 %v8903_v22 }
 0x1e6   : > { %1506 = vmatprep.mubr.bf16.mxu1 %v8903_v22 }
 0x1e7   : > { %v7407_v12 = vpop.f32.mrb[32].mxu0 }
 0x1e8   : > { %v4929_v28 = vmul.f32 -1.442695, %v7407_v12  ;;  %v7410_v51 = vpop.f32.mrb[33].mxu0 }
 0x1e9   : > { %v4930_v55 = vmul.f32 -1.442695, %v7410_v51  ;;  %v7413_v32 = vpop.f32.mrb[34].mxu0 }
 0x1ea   : > { %5546 = vpow2.f32 %v4929_v28  ;;  %v4939_v26 = vmul.f32 -1.442695, %v7413_v32  ;;  %v7416_v38 = vpop.f32.mrb[35].mxu0 }
 0x1eb   : > { %5548 = vpow2.f32 %v4930_v55  ;;  %v4940_v31 = vmul.f32 -1.442695, %v7416_v38 }
 0x1ec   : > { %5550 = vpow2.f32 %v4939_v26  ;;  %4904 = vmatmul.mubr.msk.bf16.gmra.mrb[140].mxu0 %vm340_vm0, %v7197_v37 }
 0x1ed   : > { %5552 = vpow2.f32 %v4940_v31  ;;  %4894 = vmatmul.mubr.msk.bf16.gmra.mrb[100].mxu1 %vm340_vm0, %v7260_v15  ;;  %1649 = vmatprep.mubr.bf16.mxu0 %v8903_v22 }
 0x1ee   : > { %1516 = vmatprep.mubr.bf16.mxu1 %v8903_v22 }
 0x1ef   : > { %v7425_v42 = vpop.f32.mrb[36].mxu0 }
 0x1f0   : > { %v4949_v40 = vmul.f32 -1.442695, %v7425_v42  ;;  %v7428_v41 = vpop.f32.mrb[37].mxu0 }
 0x1f1   : > { %v4950_v44 = vmul.f32 -1.442695, %v7428_v41  ;;  %v7431_v45 = vpop.f32.mrb[38].mxu0 }
 0x1f2   : > { %5554 = vpow2.f32 %v4949_v40  ;;  %v4959_v46 = vmul.f32 -1.442695, %v7431_v45  ;;  %v7434_v47 = vpop.f32.mrb[39].mxu0 }
 0x1f3   : > { %5556 = vpow2.f32 %v4950_v44  ;;  %v4960_v49 = vmul.f32 -1.442695, %v7434_v47 }
 0x1f4   : > { %v5547_v50 = vpop.eup %5546  ;;  %5558 = vpow2.f32 %v4959_v46  ;;  %4905 = vmatmul.mubr.msk.bf16.gmra.mrb[144].mxu0 %vm340_vm0, %v7231_v36 }
 0x1f5   : > { %v5549_v52 = vpop.eup %5548  ;;  %v2883_v54 = vadd.f32 1.0, %v5547_v50  ;;  %5560 = vpow2.f32 %v4960_v49  ;;  %4895 = vmatmul.mubr.msk.bf16.gmra.mrb[104].mxu1 %vm340_vm0, %v7278_v48  ;;  %1659 = vmatprep.mubr.bf16.mxu0 %v8903_v22 }
 0x1f6   : > { %v5551_v56 = vpop.eup %5550  ;;  %v2884_v57 = vadd.f32 1.0, %v5549_v52  ;;  %1526 = vmatprep.mubr.bf16.mxu1 %v8903_v22 }
 0x1f7   : > { %v5553_v59 = vpop.eup %5552  ;;  %5562 = vrcp.f32 %v2883_v54  ;;  %v2893_v62 = vadd.f32 1.0, %v5551_v56  ;;  %v7443_v35 = vpop.f32.mrb[40].mxu0 }
 0x1f8   : > { %5564 = vrcp.f32 %v2884_v57  ;;  %v2894_v0 = vadd.f32 1.0, %v5553_v59  ;;  %v4969_v33 = vmul.f32 -1.442695, %v7443_v35  ;;  %v7446_v4 = vpop.f32.mrb[0].mxu1  ;;  %v7448_v63 = vpop.f32.mrb[41].mxu0 }
 0x1f9   : > { %5566 = vrcp.f32 %v2893_v62  ;;  %v5009_v8 = vmul.f32 -1.442695, %v7446_v4  ;;  %v4970_v3 = vmul.f32 -1.442695, %v7448_v63  ;;  %v7452_v9 = vpop.f32.mrb[1].mxu1  ;;  %v7454_v5 = vpop.f32.mrb[42].mxu0 }
 0x1fa   : > { %5568 = vrcp.f32 %v2894_v0  ;;  %v5010_v10 = vmul.f32 -1.442695, %v7452_v9  ;;  %v7457_v11 = vpop.f32.mrb[2].mxu1  ;;  %v7459_v13 = vpop.f32.mrb[43].mxu0  ;;  %v4979_v23 = vmul.f32 -1.442695, %v7454_v5 }
 0x1fb   : > { %5570 = vpow2.f32 %v4969_v33  ;;  %v7461_v14 = vpop.f32.mrb[3].mxu1  ;;  %v5019_v7 = vmul.f32 -1.442695, %v7457_v11  ;;  %v4980_v31 = vmul.f32 -1.442695, %v7459_v13 }
 0x1fc   : > { %v5555_v27 = vpop.eup %5554  ;;  %5572 = vpow2.f32 %v5009_v8  ;;  %4906 = vmatmul.mubr.msk.bf16.gmra.mrb[148].mxu0 %vm340_vm0, %v7226_v30  ;;  %v5020_v49 = vmul.f32 -1.442695, %v7461_v14 }
 0x1fd   : > { %v5557_v29 = vpop.eup %5556  ;;  %v2903_v34 = vadd.f32 1.0, %v5555_v27  ;;  %5574 = vpow2.f32 %v4970_v3  ;;  %4896 = vmatmul.mubr.msk.bf16.gmra.mrb[108].mxu1 %vm340_vm0, %v7274_v25  ;;  %1669 = vmatprep.mubr.bf16.mxu0 %v8903_v22 }
 0x1fe   : > { %v5559_v17 = vpop.eup %5558  ;;  %v2904_v43 = vadd.f32 1.0, %v5557_v29  ;;  %5576 = vpow2.f32 %v5010_v10  ;;  %1762 = vmatprep.mubr.bf16.mxu1 %v8903_v22 }
 0x1ff   : > { %v5561_v18 = vpop.eup %5560  ;;  %5578 = vrcp.f32 %v2903_v34  ;;  %v2913_v20 = vadd.f32 1.0, %v5559_v17  ;;  %v7470_v39 = vpop.f32.mrb[44].mxu0 }
 0x200   : > { %5580 = vrcp.f32 %v2904_v43  ;;  %v2914_v6 = vadd.f32 1.0, %v5561_v18  ;;  %v7473_v28 = vpop.f32.mrb[4].mxu1  ;;  %v7475_v55 = vpop.f32.mrb[45].mxu0  ;;  %v4989_v56 = vmul.f32 -1.442695, %v7470_v39 }
 0x201   : > { %v5563_v26 = vpop.eup %5562  ;;  %5582 = vrcp.f32 %v2913_v20  ;;  %v7478_v40 = vpop.f32.mrb[5].mxu1  ;;  %v5029_v43 = vmul.f32 -1.442695, %v7473_v28 }
 0x202   : > { %v7480_v44 = vpop.f32.mrb[46].mxu0  ;;  %v5565_v46 = vpop.eup %5564  ;;  %5584 = vrcp.f32 %v2914_v6  ;;  %v3843_v62 = vmul.f32 %v5563_v26, %v7407_v12  ;;  %v4990_v6 = vmul.f32 -1.442695, %v7475_v55 }
 0x203   : > { %v7483_v50 = vpop.f32.mrb[6].mxu1  ;;  %v7485_v52 = vpop.f32.mrb[47].mxu0  ;;  %5586 = vpow2.f32 %v4979_v23  ;;  %v3844_v8 = vmul.f32 %v5565_v46, %v7410_v51  ;;  %v5030_v46 = vmul.f32 -1.442695, %v7478_v40 }
 0x204   : > { %v5567_v54 = vpop.eup %5566  ;;  %v7488_v57 = vpop.f32.mrb[7].mxu1  ;;  %5588 = vpow2.f32 %v5019_v7  ;;  %4907 = vmatmul.mubr.msk.bf16.gmra.mrb[152].mxu0 %vm340_vm0, %v7248_v1 }
 0x205   : > { %v5569_v59 = vpop.eup %5568  ;;  %v3853_v0 = vmul.f32 %v5567_v54, %v7413_v32  ;;  %5590 = vpow2.f32 %v4980_v31  ;;  %4913 = vmatmul.mubr.msk.bf16.vlgmr.msra.gmra.mrb[112].mxu1 %vm340_vm0, %v7106_v24  ;;  %1679 = vmatprep.mubr.bf16.mxu0 %v8903_v22 }
 0x206   : > { %v5571_v33 = vpop.eup %5570  ;;  %v3854_v3 = vmul.f32 %v5569_v59, %v7416_v38  ;;  %5592 = vpow2.f32 %v5020_v49  ;;  %1772 = vmatprep.mubr.bf16.mxu1 %v8903_v22 }
 0x207   : > { %v5573_v10 = vpop.eup %5572  ;;  %v4173_v27 = vadd.f32 %v3853_v0, %v3843_v62  ;;  %v2923_v12 = vadd.f32 1.0, %v5571_v33  ;;  %5594 = vpow2.f32 %v4989_v56  ;;  %v7500_v17 = vpop.f32.mrb[48].mxu0  ;;  %v4999_v62 = vmul.f32 -1.442695, %v7480_v44 }
 0x208   : > { %v5575_v32 = vpop.eup %5574  ;;  %v4204_v29 = vadd.f32 %v3854_v3, %v3844_v8  ;;  %v2963_v34 = vadd.f32 1.0, %v5573_v10  ;;  %v7503_v24 = vpop.f32.mrb[8].mxu1 }
 0x209   : > { %v5577_v51 = vpop.eup %5576  ;;  %5596 = vrcp.f32 %v2923_v12  ;;  %v2924_v38 = vadd.f32 1.0, %v5575_v32  ;;  %v7505_v18 = vpop.f32.mrb[49].mxu0 }
 0x20a   : > { %9087 = vst [vmem:[#allocation13_spill] sm:$0xff] %v7505_v18  ;;  %v5579_v20 = vpop.eup %5578  ;;  %5598 = vrcp.f32 %v2963_v34  ;;  %v2964_v23 = vadd.f32 1.0, %v5577_v51  ;;  %v7508_v7 = vpop.f32.mrb[9].mxu1 }
 0x20b   : > { %v5581_v26 = vpop.eup %5580  ;;  %v3863_v31 = vmul.f32 %v5579_v20, %v7425_v42  ;;  %5600 = vrcp.f32 %v2924_v38  ;;  %v7512_v49 = vpop.f32.mrb[10].mxu1 }
 0x20c   : > { %v7514_v54 = vpop.f32.mrb[50].mxu0  ;;  %v5583_v56 = vpop.eup %5582  ;;  %v3864_v59 = vmul.f32 %v5581_v26, %v7428_v41  ;;  %5602 = vrcp.f32 %v2964_v23  ;;  %4908 = vmatmul.mubr.msk.bf16.gmra.mrb[156].mxu0 %vm340_vm0, %v7246_v60  ;;  %v5039_v26 = vmul.f32 -1.442695, %v7483_v50 }
 0x20d   : > { %v7518_v0 = vpop.f32.mrb[11].mxu1  ;;  %v7520_v33 = vpop.f32.mrb[51].mxu0  ;;  %v4174_v3 = vadd.f32 %v4173_v27, %v3863_v31  ;;  %v3873_v42 = vmul.f32 %v5583_v56, %v7431_v45  ;;  %5604 = vpow2.f32 %v5029_v43  ;;  %4914 = vmatmul.mubr.msk.bf16.gmra.mrb[116].mxu1 %vm340_vm0, %v7101_v19  ;;  %1689 = vmatprep.mubr.bf16.mxu0 %v8903_v22 }
 0x20e   : > { %v5585_v8 = vpop.eup %5584  ;;  %v4205_v12 = vadd.f32 %v4204_v29, %v3864_v59  ;;  %5606 = vpow2.f32 %v4990_v6  ;;  %1782 = vmatprep.mubr.bf16.mxu1 %v8903_v22  ;;  %v5000_v59 = vmul.f32 -1.442695, %v7485_v52 }
 0x20f   : > { %v5587_v10 = vpop.eup %5586  ;;  %v3874_v32 = vmul.f32 %v5585_v8, %v7434_v47  ;;  %v4175_v34 = vadd.f32 %v4174_v3, %v3873_v42  ;;  %5608 = vpow2.f32 %v5030_v46  ;;  %v7530_v43 = vpop.f32.mrb[52].mxu0 }
 0x210   : > { %v5589_v41 = vpop.eup %5588  ;;  %v2933_v51 = vadd.f32 1.0, %v5587_v10  ;;  %5610 = vpow2.f32 %v4999_v62  ;;  %v7532_v20 = vpop.f32.mrb[12].mxu1  ;;  %v5040_v10 = vmul.f32 -1.442695, %v7488_v57 }
 0x211   : > { %v5591_v45 = vpop.eup %5590  ;;  %v4206_v27 = vadd.f32 %v4205_v12, %v3874_v32  ;;  %v2973_v38 = vadd.f32 1.0, %v5589_v41  ;;  %v7534_v19 = vpop.f32.mrb[53].mxu0 }
 0x212   : > { %v5593_v29 = vpop.eup %5592  ;;  %5612 = vrcp.f32 %v2933_v51  ;;  %v2934_v47 = vadd.f32 1.0, %v5591_v45  ;;  %v7537_v31 = vpop.f32.mrb[13].mxu1  ;;  %v5049_v51 = vmul.f32 -1.442695, %v7503_v24 }
 0x213   : > { %v5595_v23 = vpop.eup %5594  ;;  %5614 = vrcp.f32 %v2973_v38  ;;  %v2974_v6 = vadd.f32 1.0, %v5593_v29  ;;  %v7540_v62 = vpop.f32.mrb[14].mxu1 }
 0x214   : > { %v5597_v46 = vpop.eup %5596  ;;  %5616 = vrcp.f32 %v2934_v47  ;;  %v2943_v56 = vadd.f32 1.0, %v5595_v23  ;;  %v7542_v8 = vpop.f32.mrb[54].mxu0  ;;  %4909 = vmatmul.mubr.msk.bf16.gmra.mrb[160].mxu0 %vm340_vm0, %v7264_v16 }
 0x215   : > { %v7544_v3 = vpop.eup %5598  ;;  %v3883_v42 = vmul.f32 %v5597_v46, %v7443_v35  ;;  %5618 = vrcp.f32 %v2974_v6  ;;  %v7548_v12 = vpop.f32.mrb[15].mxu1  ;;  %4915 = vmatmul.mubr.msk.bf16.gmra.mrb[120].mxu1 %vm340_vm0, %v7138_v61  ;;  %1699 = vmatprep.mubr.bf16.mxu0 %v8903_v22 }
 0x216   : > { %v7550_v32 = vpop.f32.mrb[55].mxu0  ;;  %v5601_v41 = vpop.eup %5600  ;;  %5620 = vrcp.f32 %v2943_v56  ;;  %1792 = vmatprep.mubr.bf16.mxu1 %v8903_v22 }
 0x217   : > { %v7555_v45 = vpop.eup %5602  ;;  %v4176_v38 = vadd.f32 %v4175_v34, %v3883_v42  ;;  %v3884_v29 = vmul.f32 %v5601_v41, %v7448_v63  ;;  %5622 = vpow2.f32 %v5039_v26  ;;  %v7562_v46 = vpop.f32.mrb[56].mxu0 }
 0x218   : > { %v5605_v35 = vpop.eup %5604  ;;  %5624 = vpow2.f32 %v5000_v59  ;;  %v7564_v63 = vpop.f32.mrb[16].mxu1  ;;  %v4931_v59 = vmul.f32 -1.442695, %v7500_v17 }
 0x219   : > { %v5607_v47 = vpop.eup %5606  ;;  %v4207_v23 = vadd.f32 %v4206_v27, %v3884_v29  ;;  %v2983_v6 = vadd.f32 1.0, %v5605_v35  ;;  %5626 = vpow2.f32 %v5040_v10  ;;  %v7566_v26 = vpop.f32.mrb[57].mxu0  ;;  %v5050_v10 = vmul.f32 -1.442695, %v7508_v7 }
 0x21a   : > { %v5609_v56 = vpop.eup %5608  ;;  %v2944_v34 = vadd.f32 1.0, %v5607_v47  ;;  %5628 = vpow2.f32 %v5049_v51  ;;  %v7569_v41 = vpop.f32.mrb[17].mxu1 }
 0x21b   : > { %v5611_v61 = vpop.eup %5610  ;;  %5630 = vrcp.f32 %v2983_v6  ;;  %v2984_v42 = vadd.f32 1.0, %v5609_v56  ;;  %v7572_v29 = vpop.f32.mrb[18].mxu1  ;;  %v4932_v6 = vmul.f32 -1.442695, %v7505_v18 }
 0x21c   : > { %v5613_v22 = vpop.eup %5612  ;;  %5632 = vrcp.f32 %v2944_v34  ;;  %v2953_v27 = vadd.f32 1.0, %v5611_v61  ;;  %v7574_v35 = vpop.f32.mrb[58].mxu0  ;;  %v5059_v34 = vmul.f32 -1.442695, %v7512_v49  ;;  %4910 = vmatmul.mubr.msk.bf16.gmra.mrb[164].mxu0 %vm340_vm0, %v7260_v15 }
 0x21d   : > { %v7576_v51 = vpop.eup %5614  ;;  %v3893_v47 = vmul.f32 %v5613_v22, %v7454_v5  ;;  %5634 = vrcp.f32 %v2984_v42  ;;  %v7580_v56 = vpop.f32.mrb[19].mxu1  ;;  %v4941_v22 = vmul.f32 -1.442695, %v7514_v54  ;;  %4916 = vmatmul.mubr.msk.bf16.gmra.mrb[124].mxu1 %vm340_vm0, %v7136_v58  ;;  %v9090_v5 = vmov 0  }
 0x21e   : > { %9088 = vst [vmem:[#allocation14_spill] sm:$0xff] %v7580_v56  ;;  %v7582_v16 = vpop.f32.mrb[59].mxu0  ;;  %v5617_v60 = vpop.eup %5616  ;;  %5636 = vrcp.f32 %v2953_v27  ;;  %1709 = vmatprep.mubr.bf16.mxu0 %v9090_v5  ;;  %1802 = vmatprep.mubr.bf16.mxu1 %v9090_v5 }
 0x21f   : > { %9089 = vst [vmem:[#allocation15_spill] sm:$0xff] %v7582_v16  ;;  %v7587_v61 = vpop.eup %5618  ;;  %v4177_v1 = vadd.f32 %v4176_v38, %v3893_v47  ;;  %v3894_v30 = vmul.f32 %v5617_v60, %v7459_v13  ;;  %5638 = vpow2.f32 %v4931_v59  ;;  %v7596_v38 = vpop.f32.mrb[60].mxu0 }
 0x220   : > { %v5621_v42 = vpop.eup %5620  ;;  %5640 = vpow2.f32 %v5050_v10  ;;  %v7598_v59 = vpop.f32.mrb[20].mxu1 }
 0x221   : > { %v5623_v27 = vpop.eup %5622  ;;  %v4208_v36 = vadd.f32 %v4207_v23, %v3894_v30  ;;  %v3903_v15 = vmul.f32 %v5621_v42, %v7470_v39  ;;  %5642 = vpow2.f32 %v4932_v6  ;;  %v7600_v47 = vpop.f32.mrb[61].mxu0  ;;  %v5060_v23 = vmul.f32 -1.442695, %v7518_v0 }
 0x222   : > { %v5625_v60 = vpop.eup %5624  ;;  %v2993_v13 = vadd.f32 1.0, %v5623_v27  ;;  %5644 = vpow2.f32 %v5059_v34  ;;  %9091 = vst [vmem:[#allocation16_spill] sm:$0xff] %v7600_v47  ;;  %v7602_v10 = vpop.f32.mrb[21].mxu1  ;;  %v4942_v27 = vmul.f32 -1.442695, %v7520_v33 }
 0x223   : > { %v5627_v58 = vpop.eup %5626  ;;  %v4178_v16 = vadd.f32 %v4177_v1, %v3903_v15  ;;  %v2954_v56 = vadd.f32 1.0, %v5625_v60  ;;  %5646 = vpow2.f32 %v4941_v22  ;;  %v7604_v18 = vpop.f32.mrb[62].mxu0  ;;  %v5069_v15 = vmul.f32 -1.442695, %v7532_v20 }
 0x224   : > { %9092 = vst [vmem:[#allocation17_spill] sm:$0xff] %v7604_v18  ;;  %v5629_v30 = vpop.eup %5628  ;;  %5648 = vrcp.f32 %v2993_v13  ;;  %v2994_v39 = vadd.f32 1.0, %v5627_v58  ;;  %v7607_v6 = vpop.f32.mrb[22].mxu1  ;;  %4911 = vmatmul.mubr.msk.bf16.gmra.mrb[168].mxu0 %vm340_vm0, %v7278_v48 }
 0x225   : > { %9093 = vst [vmem:[#allocation18_spill] sm:$0xff] %v7607_v6  ;;  %v5631_v34 = vpop.eup %5630  ;;  %5650 = vrcp.f32 %v2954_v56  ;;  %v3003_v42 = vadd.f32 1.0, %v5629_v30  ;;  %v7610_v47 = vpop.f32.mrb[23].mxu1  ;;  %v4951_v56 = vmul.f32 -1.442695, %v7530_v43  ;;  %4917 = vmatmul.mubr.msk.bf16.gmra.mrb[128].mxu1 %vm340_vm0, %v7166_v53  ;;  %1719 = vmatprep.mubr.bf16.mxu0 %v9090_v5 }
 0x226   : > { %9094 = vst [vmem:[#allocation19_spill] sm:$0xff] %v7610_v47  ;;  %v5633_v1 = vpop.eup %5632  ;;  %5652 = vrcp.f32 %v2994_v39  ;;  %v7613_v22 = vpop.f32.mrb[63].mxu0  ;;  %1812 = vmatprep.mubr.bf16.mxu1 %v9090_v5 }
 0x227   : > { %9095 = vst [vmem:[#allocation20_spill] sm:$0xff] %v7613_v22  ;;  %v7617_v60 = vpop.eup %5634  ;;  %v3904_v13 = vmul.f32 %v5633_v1, %v7475_v55  ;;  %5654 = vrcp.f32 %v3003_v42  ;;  %v7626_v22 = vpop.f32.mrb[64].mxu0 }
 0x228   : > { %v5637_v58 = vpop.eup %5636  ;;  %5656 = vpow2.f32 %v5060_v23  ;;  %9096 = vst [vmem:[#allocation21_spill] sm:$0xff] %v7626_v22  ;;  %v7628_v1 = vpop.f32.mrb[24].mxu1  ;;  %v3923_v23 = vmul.f32 %v7544_v3, %v7446_v4 }
 0x229   : > { %v5639_v30 = vpop.eup %5638  ;;  %v4209_v39 = vadd.f32 %v4208_v36, %v3904_v13  ;;  %v3913_v48 = vmul.f32 %v5637_v58, %v7480_v44  ;;  %5658 = vpow2.f32 %v4942_v27  ;;  %v7630_v47 = vpop.f32.mrb[65].mxu0 }
 0x22a   : > { %v5641_v55 = vpop.eup %5640  ;;  %v2885_v42 = vadd.f32 1.0, %v5639_v30  ;;  %5660 = vpow2.f32 %v5069_v15  ;;  %9097 = vst [vmem:[#allocation22_spill] sm:$0xff] %v7630_v47  ;;  %v7634_v36 = vpop.f32.mrb[25].mxu1  ;;  %v5070_v15 = vmul.f32 -1.442695, %v7537_v31  ;;  %v3933_v47 = vmul.f32 %v7576_v51, %v7457_v11 }
 0x22b   : > { %v5643_v53 = vpop.eup %5642  ;;  %v4179_v18 = vadd.f32 %v4178_v16, %v3913_v48  ;;  %v3004_v6 = vadd.f32 1.0, %v5641_v55  ;;  %5662 = vpow2.f32 %v4951_v56  ;;  %v7636_v44 = vpop.f32.mrb[66].mxu0  ;;  %v4952_v55 = vmul.f32 -1.442695, %v7534_v19 }
 0x22c   : > { %9098 = vst [vmem:[#allocation23_spill] sm:$0xff] %v7636_v44  ;;  %v5645_v27 = vpop.eup %5644  ;;  %5664 = vrcp.f32 %v2885_v42  ;;  %v2886_v13 = vadd.f32 1.0, %v5643_v53  ;;  %v7639_v58 = vpop.f32.mrb[26].mxu1  ;;  %4912 = vmatmul.mubr.msk.bf16.gmra.mrb[172].mxu0 %vm340_vm0, %v7274_v25  ;;  %v3943_v53 = vmul.f32 %v5631_v34, %v7473_v28  ;;  %v5079_v11 = vmul.f32 -1.442695, %v7540_v62 }
 0x22d   : > { %v5647_v30 = vpop.eup %5646  ;;  %v4180_v22 = vadd.f32 %v4179_v18, %v3923_v23  ;;  %5666 = vrcp.f32 %v3004_v6  ;;  %v3013_v16 = vadd.f32 1.0, %v5645_v27  ;;  %v7643_v48 = vpop.f32.mrb[27].mxu1  ;;  %4918 = vmatmul.mubr.msk.bf16.gmra.mrb[132].mxu1 %vm340_vm0, %v7159_v21  ;;  %v4961_v6 = vmul.f32 -1.442695, %v7542_v8 }
 0x22e   : > { %v7645_v4 = vpop.f32.mrb[67].mxu0  ;;  %v5649_v3 = vpop.eup %5648  ;;  %5668 = vrcp.f32 %v2886_v13  ;;  %v2895_v56 = vadd.f32 1.0, %v5647_v30  ;;  %1822 = vmatprep.mubr.bf16.mxu1 %v9090_v5  ;;  %v3924_v34 = vmul.f32 %v7555_v45, %v7452_v9  ;;  %v3934_v9 = vmul.f32 %v7587_v61, %v7461_v14 }
 0x22f   : > { %v5651_v42 = vpop.eup %5650  ;;  %v4181_v44 = vadd.f32 %v4180_v22, %v3933_v47  ;;  %5670 = vrcp.f32 %v3013_v16  ;;  %v3953_v27 = vmul.f32 %v5649_v3, %v7483_v50  ;;  %v7658_v28 = vpop.f32.mrb[68].mxu0 }
 0x230   : > { %v5653_v18 = vpop.eup %5652  ;;  %v3914_v51 = vmul.f32 %v5651_v42, %v7485_v52  ;;  %5672 = vrcp.f32 %v2895_v56  ;;  %v5080_v52 = vmul.f32 -1.442695, %v7548_v12  ;;  %v7663_v22 = vpop.f32.mrb[28].mxu1 }
 0x231   : > { %v5655_v23 = vpop.eup %5654  ;;  %v4182_v13 = vadd.f32 %v4181_v44, %v3943_v53  ;;  %5674 = vpow2.f32 %v5070_v15  ;;  %v7665_v30 = vpop.f32.mrb[69].mxu0 }
 0x232   : > { %v5657_v47 = vpop.eup %5656  ;;  %v4210_v21 = vadd.f32 %v4209_v39, %v3914_v51  ;;  %5676 = vpow2.f32 %v4952_v55  ;;  %v3963_v50 = vmul.f32 %v5655_v23, %v7503_v24  ;;  %v7668_v15 = vpop.f32.mrb[29].mxu1 }
 0x233   : > { %v5659_v16 = vpop.eup %5658  ;;  %v4183_v56 = vadd.f32 %v4182_v13, %v3953_v27  ;;  %v3014_v44 = vadd.f32 1.0, %v5657_v47  ;;  %5678 = vpow2.f32 %v5079_v11  ;;  %v7670_v3 = vpop.f32.mrb[70].mxu0  ;;  %v4962_v11 = vmul.f32 -1.442695, %v7550_v32 }
 0x234   : > { %v5661_v42 = vpop.eup %5660  ;;  %v4211_v45 = vadd.f32 %v4210_v21, %v3924_v34  ;;  %v2896_v39 = vadd.f32 1.0, %v5659_v16  ;;  %5680 = vpow2.f32 %v4961_v6  ;;  %v7674_v55 = vpop.f32.mrb[30].mxu1  ;;  %v3944_v47 = vmul.f32 %v7617_v60, %v7478_v40 }
 0x235   : > { %v7676_v53 = vpop.f32.mrb[71].mxu0  ;;  %v5663_v51 = vpop.eup %5662  ;;  %v4184_v27 = vadd.f32 %v4183_v56, %v3963_v50  ;;  %5682 = vrcp.f32 %v3014_v44  ;;  %v3023_v24 = vadd.f32 1.0, %v5661_v42  ;;  %v5089_v34 = vmul.f32 -1.442695, %v7564_v63  ;;  %4919 = vmatmul.mubr.msk.bf16.gmra.mrb[136].mxu1 %vm340_vm0, %v7201_v2 }
 0x236   : > { %v7679_v23 = vpop.f32.mrb[31].mxu1  ;;  %v5665_v13 = vpop.eup %5664  ;;  %v4212_v14 = vadd.f32 %v4211_v45, %v3934_v9  ;;  %5684 = vrcp.f32 %v2896_v39  ;;  %v2905_v61 = vadd.f32 1.0, %v5663_v51  ;;  %v3954_v16 = vmul.f32 %v5653_v18, %v7488_v57  ;;  %1832 = vmatprep.mubr.bf16.mxu1 %v9090_v5 }
 0x237   : > { %v5667_v6 = vpop.eup %5666  ;;  %5686 = vrcp.f32 %v3023_v24  ;;  %v4971_v50 = vmul.f32 -1.442695, %v7562_v46  ;;  %v5090_v60 = vmul.f32 -1.442695, %v7569_v41  ;;  %v7690_v44 = vpop.f32.mrb[72].mxu0  ;;  %v3845_v51 = vmul.f32 %v5665_v13, %v7500_v17 }
 0x238   : > { %v5669_v21 = vpop.eup %5668  ;;  %v4213_v56 = vadd.f32 %v4212_v14, %v3944_v47  ;;  %5688 = vrcp.f32 %v2905_v61  ;;  %v3964_v45 = vmul.f32 %v5667_v6, %v7508_v7  ;;  %v7694_v57 = vpop.f32.mrb[32].mxu1 }
 0x239   : > { %v5671_v40 = vpop.eup %5670  ;;  %5690 = vpow2.f32 %v5080_v52  ;;  %v7696_v18 = vpop.f32.mrb[73].mxu0 }
 0x23a   : > { %v5673_v42 = vpop.eup %5672  ;;  %v4214_v9 = vadd.f32 %v4213_v56, %v3954_v16  ;;  %v3973_v2 = vmul.f32 %v5671_v40, %v7512_v49  ;;  %5692 = vpow2.f32 %v4962_v11  ;;  %v7700_v24 = vpop.f32.mrb[33].mxu1 }
 0x23b   : > { %v5675_v39 = vpop.eup %5674  ;;  %v3855_v52 = vmul.f32 %v5673_v42, %v7514_v54  ;;  %5694 = vpow2.f32 %v5089_v34  ;;  %v7702_v47 = vpop.f32.mrb[74].mxu0  ;;  %v4972_v34 = vmul.f32 -1.442695, %v7566_v26 }
 0x23c   : > { %v5677_v14 = vpop.eup %5676  ;;  %v4215_v61 = vadd.f32 %v4214_v9, %v3964_v45  ;;  %v4185_v7 = vadd.f32 %v4184_v27, %v3973_v2  ;;  %v3024_v6 = vadd.f32 1.0, %v5675_v39  ;;  %5696 = vpow2.f32 %v4971_v50  ;;  %v7704_v49 = vpop.f32.mrb[34].mxu1  ;;  %v9100_v39 = vld [vmem:[#allocation13_spill] sm:$0xff] }
 0x23d   : > { %v7706_v11 = vpop.f32.mrb[75].mxu0  ;;  %v5679_v16 = vpop.eup %5678  ;;  %v4235_v56 = vadd.f32 %v3855_v52, %v3845_v51  ;;  %v2906_v40 = vadd.f32 1.0, %v5677_v14  ;;  %5698 = vpow2.f32 %v5090_v60  ;;  %v5099_v50 = vmul.f32 -1.442695, %v7572_v29  ;;  %4920 = vmatmul.mubr.msk.bf16.gmra.mrb[140].mxu1 %vm340_vm0, %v7197_v37  ;;  %v9101_v14 = vld [vmem:[#allocation14_spill] sm:$0xff] }
 0x23e   : > { %9099 = vst [vmem:[#allocation24_spill] sm:$0xff] %v7706_v11  ;;  %v7708_v17 = vpop.f32.mrb[35].mxu1  ;;  %v5681_v54 = vpop.eup %5680  ;;  %5700 = vrcp.f32 %v3024_v6  ;;  %v3033_v13 = vadd.f32 1.0, %v5679_v16  ;;  %v4981_v60 = vmul.f32 -1.442695, %v7574_v35  ;;  %1842 = vmatprep.mubr.bf16.mxu1 %v9090_v5  ;;  %v3846_v51 = vmul.f32 %v5669_v21, %v9100_v39 }
 0x23f   : > { %v5683_v42 = vpop.eup %5682  ;;  %5702 = vrcp.f32 %v2906_v40  ;;  %v2915_v27 = vadd.f32 1.0, %v5681_v54  ;;  %v5100_v6 = vmul.f32 -1.442695, %v9101_v14  ;;  %v7720_v16 = vpop.f32.mrb[76].mxu0 }
 0x240   : > { %v5685_v9 = vpop.eup %5684  ;;  %v3974_v45 = vmul.f32 %v5683_v42, %v7518_v0  ;;  %5704 = vrcp.f32 %v3033_v13  ;;  %9102 = vst [vmem:[#allocation13_spill] sm:$0xff] %v7720_v16  ;;  %v7723_v0 = vpop.f32.mrb[36].mxu1 }
 0x241   : > { %v5687_v2 = vpop.eup %5686  ;;  %v3856_v52 = vmul.f32 %v5685_v9, %v7520_v33  ;;  %5706 = vrcp.f32 %v2915_v27  ;;  %v7725_v13 = vpop.f32.mrb[77].mxu0 }
 0x242   : > { %v5689_v40 = vpop.eup %5688  ;;  %v4216_v37 = vadd.f32 %v4215_v61, %v3974_v45  ;;  %v3983_v54 = vmul.f32 %v5687_v2, %v7532_v20  ;;  %5708 = vpow2.f32 %v4972_v34  ;;  %v7728_v33 = vpop.f32.mrb[37].mxu1 }
 0x243   : > { %v5691_v42 = vpop.eup %5690  ;;  %v4266_v11 = vadd.f32 %v3856_v52, %v3846_v51  ;;  %v3865_v21 = vmul.f32 %v5689_v40, %v7530_v43  ;;  %5710 = vpow2.f32 %v5099_v50  ;;  %v7730_v27 = vpop.f32.mrb[78].mxu0 }
 0x244   : > { %9103 = vst [vmem:[#allocation14_spill] sm:$0xff] %v7730_v27  ;;  %v5693_v9 = vpop.eup %5692  ;;  %v4186_v39 = vadd.f32 %v4185_v7, %v3983_v54  ;;  %v3034_v16 = vadd.f32 1.0, %v5691_v42  ;;  %5712 = vpow2.f32 %v4981_v60  ;;  %v7732_v61 = vpop.f32.mrb[38].mxu1  ;;  %v9107_v27 = vld [vmem:[#allocation15_spill] sm:$0xff] }
 0x245   : > { %9104 = vst [vmem:[#allocation25_spill] sm:$0xff] %v7732_v61  ;;  %v7734_v20 = vpop.f32.mrb[79].mxu0  ;;  %v5695_v34 = vpop.eup %5694  ;;  %v4236_v45 = vadd.f32 %v4235_v56, %v3865_v21  ;;  %v2916_v2 = vadd.f32 1.0, %v5693_v9  ;;  %5714 = vpow2.f32 %v5100_v6  ;;  %v4982_v7 = vmul.f32 -1.442695, %v9107_v27  ;;  %v9108_v54 = vld [vmem:[#allocation7_spill] sm:$0xff] }
 0x246   : > { %9105 = vst [vmem:[#allocation26_spill] sm:$0xff] %v7734_v20  ;;  %v7736_v51 = vpop.f32.mrb[39].mxu1  ;;  %v5697_v43 = vpop.eup %5696  ;;  %5716 = vrcp.f32 %v3034_v16  ;;  %v3043_v50 = vadd.f32 1.0, %v5695_v34  ;;  %4921 = vmatmul.mubr.msk.bf16.gmra.mrb[144].mxu1 %vm340_vm0, %v9108_v54  ;;  %v5109_v56 = vmul.f32 -1.442695, %v7598_v59 }
 0x247   : > { %9106 = vst [vmem:[#allocation27_spill] sm:$0xff] %v7736_v51  ;;  %v5699_v52 = vpop.eup %5698  ;;  %5718 = vrcp.f32 %v2916_v2  ;;  %v2925_v40 = vadd.f32 1.0, %v5697_v43  ;;  %1852 = vmatprep.mubr.bf16.mxu1 %v9090_v5  ;;  %v4991_v16 = vmul.f32 -1.442695, %v7596_v38  ;;  %v7745_v9 = vpop.f32.mrb[80].mxu0 }
 0x248   : > { %v5701_v60 = vpop.eup %5700  ;;  %5720 = vrcp.f32 %v3043_v50  ;;  %v3044_v42 = vadd.f32 1.0, %v5699_v52  ;;  %9109 = vst [vmem:[#allocation15_spill] sm:$0xff] %v7745_v9  ;;  %v5110_v43 = vmul.f32 -1.442695, %v7602_v10  ;;  %v7749_v50 = vpop.f32.mrb[40].mxu1 }
 0x249   : > { %v5703_v6 = vpop.eup %5702  ;;  %v3984_v21 = vmul.f32 %v5701_v60, %v7537_v31  ;;  %5722 = vrcp.f32 %v2925_v40  ;;  %9110 = vst [vmem:[#allocation7_spill] sm:$0xff] %v7749_v50  ;;  %v7751_v52 = vpop.f32.mrb[81].mxu0 }
 0x24a   : > { %v5705_v34 = vpop.eup %5704  ;;  %v3866_v2 = vmul.f32 %v5703_v6, %v7534_v19  ;;  %5724 = vrcp.f32 %v3044_v42  ;;  %9111 = vst [vmem:[#allocation28_spill] sm:$0xff] %v7751_v52  ;;  %v7754_v31 = vpop.f32.mrb[41].mxu1 }
 0x24b   : > { %v5707_v54 = vpop.eup %5706  ;;  %v4217_v20 = vadd.f32 %v4216_v37, %v3984_v21  ;;  %v3993_v51 = vmul.f32 %v5705_v34, %v7540_v62  ;;  %5726 = vpow2.f32 %v4982_v7  ;;  %9112 = vst [vmem:[#allocation29_spill] sm:$0xff] %v7754_v31  ;;  %v7756_v40 = vpop.f32.mrb[82].mxu0 }
 0x24c   : > { %9113 = vst [vmem:[#allocation30_spill] sm:$0xff] %v7756_v40  ;;  %v5709_v60 = vpop.eup %5708  ;;  %v4267_v9 = vadd.f32 %v4266_v11, %v3866_v2  ;;  %v3875_v19 = vmul.f32 %v5707_v54, %v7542_v8  ;;  %5728 = vpow2.f32 %v5109_v56  ;;  %v7759_v42 = vpop.f32.mrb[42].mxu1  ;;  %v9117_v2 = vld [vmem:[#allocation16_spill] sm:$0xff]  ;;  %v9118_v56 = vld [vmem:[#allocation6_spill] sm:$0xff] }
 0x24d   : > { %9114 = vst [vmem:[#allocation31_spill] sm:$0xff] %v7759_v42  ;;  %v7761_v6 = vpop.f32.mrb[83].mxu0  ;;  %v5711_v50 = vpop.eup %5710  ;;  %v4187_v52 = vadd.f32 %v4186_v39, %v3993_v51  ;;  %v2926_v61 = vadd.f32 1.0, %v5709_v60  ;;  %5730 = vpow2.f32 %v4991_v16  ;;  %v4992_v8 = vmul.f32 -1.442695, %v9117_v2  ;;  %v9119_v39 = vld [vmem:[#allocation18_spill] sm:$0xff] }
 0x24e   : > { %9115 = vst [vmem:[#allocation32_spill] sm:$0xff] %v7761_v6  ;;  %v7763_v37 = vpop.f32.mrb[43].mxu1  ;;  %v5713_v62 = vpop.eup %5712  ;;  %v4237_v7 = vadd.f32 %v4236_v45, %v3875_v19  ;;  %v3053_v21 = vadd.f32 1.0, %v5711_v50  ;;  %5732 = vpow2.f32 %v5110_v43  ;;  %4922 = vmatmul.mubr.msk.bf16.gmra.mrb[148].mxu1 %vm340_vm0, %v9118_v56  ;;  %v5119_v51 = vmul.f32 -1.442695, %v9119_v39  ;;  %v9120_v43 = vld [vmem:[#allocation17_spill] sm:$0xff] }
 0x24f   : > { %9116 = vst [vmem:[#allocation33_spill] sm:$0xff] %v7763_v37  ;;  %v5715_v34 = vpop.eup %5714  ;;  %5734 = vrcp.f32 %v2926_v61  ;;  %v2935_v11 = vadd.f32 1.0, %v5713_v62  ;;  %1862 = vmatprep.mubr.bf16.mxu1 %v9090_v5  ;;  %v5001_v50 = vmul.f32 -1.442695, %v9120_v43  ;;  %v7772_v61 = vpop.f32.mrb[84].mxu0  ;;  %v9122_v62 = vld [vmem:[#allocation19_spill] sm:$0xff] }
 0x250   : > { %v5717_v54 = vpop.eup %5716  ;;  %5736 = vrcp.f32 %v3053_v21  ;;  %v3054_v6 = vadd.f32 1.0, %v5715_v34  ;;  %9121 = vst [vmem:[#allocation16_spill] sm:$0xff] %v7772_v61  ;;  %v5120_v56 = vmul.f32 -1.442695, %v9122_v62  ;;  %v7776_v21 = vpop.f32.mrb[44].mxu1 }
 0x251   : > { %v5719_v16 = vpop.eup %5718  ;;  %v3994_v45 = vmul.f32 %v5717_v54, %v7548_v12  ;;  %5738 = vrcp.f32 %v2935_v11  ;;  %9123 = vst [vmem:[#allocation6_spill] sm:$0xff] %v7776_v21  ;;  %v7778_v34 = vpop.f32.mrb[85].mxu0  ;;  %v9125_v12 = vld [vmem:[#allocation20_spill] sm:$0xff] }
 0x252   : > { %v5721_v60 = vpop.eup %5720  ;;  %v3876_v19 = vmul.f32 %v5719_v16, %v7550_v32  ;;  %5740 = vrcp.f32 %v3054_v6  ;;  %9124 = vst [vmem:[#allocation18_spill] sm:$0xff] %v7778_v34  ;;  %v5002_v11 = vmul.f32 -1.442695, %v9125_v12  ;;  %v7782_v54 = vpop.f32.mrb[45].mxu1 }
 0x253   : > { %v5723_v37 = vpop.eup %5722  ;;  %v4218_v40 = vadd.f32 %v4217_v20, %v3994_v45  ;;  %v4003_v42 = vmul.f32 %v5721_v60, %v7564_v63  ;;  %5742 = vpow2.f32 %v4992_v8  ;;  %9126 = vst [vmem:[#allocation17_spill] sm:$0xff] %v7782_v54  ;;  %v7784_v61 = vpop.f32.mrb[86].mxu0 }
 0x254   : > { %9127 = vst [vmem:[#allocation19_spill] sm:$0xff] %v7784_v61  ;;  %v5725_v31 = vpop.eup %5724  ;;  %v4268_v32 = vadd.f32 %v4267_v9, %v3876_v19  ;;  %v3885_v6 = vmul.f32 %v5723_v37, %v7562_v46  ;;  %5744 = vpow2.f32 %v5119_v51  ;;  %v7787_v16 = vpop.f32.mrb[46].mxu1  ;;  %v9129_v46 = vld [vmem:[#allocation9_spill] sm:$0xff] }
 0x255   : > { %v7789_v21 = vpop.f32.mrb[87].mxu0  ;;  %v5727_v34 = vpop.eup %5726  ;;  %v4188_v20 = vadd.f32 %v4187_v52, %v4003_v42  ;;  %v4004_v63 = vmul.f32 %v5725_v31, %v7569_v41  ;;  %5746 = vpow2.f32 %v5001_v50  ;;  %v5129_v52 = vmul.f32 -1.442695, %v7628_v1  ;;  %v9130_v42 = vld [vmem:[#allocation21_spill] sm:$0xff] }
 0x256   : > { %9128 = vst [vmem:[#allocation20_spill] sm:$0xff] %v7789_v21  ;;  %v7792_v8 = vpop.f32.mrb[47].mxu1  ;;  %v5729_v45 = vpop.eup %5728  ;;  %v4238_v60 = vadd.f32 %v4237_v7, %v3885_v6  ;;  %v2936_v54 = vadd.f32 1.0, %v5727_v34  ;;  %5748 = vpow2.f32 %v5120_v56  ;;  %4923 = vmatmul.mubr.msk.bf16.gmra.mrb[152].mxu1 %vm340_vm0, %v9129_v46  ;;  %v5011_v7 = vmul.f32 -1.442695, %v9130_v42 }
 0x257   : > { %v5731_v61 = vpop.eup %5730  ;;  %v4219_v9 = vadd.f32 %v4218_v40, %v4004_v63  ;;  %v3063_v19 = vadd.f32 1.0, %v5729_v45  ;;  %5750 = vpow2.f32 %v5002_v11  ;;  %1872 = vmatprep.mubr.bf16.mxu1 %v9090_v5  ;;  %v7799_v50 = vpop.f32.mrb[88].mxu0  ;;  %v5130_v34 = vmul.f32 -1.442695, %v7634_v36  ;;  %v9134_v63 = vld [vmem:[#allocation22_spill] sm:$0xff] }
 0x258   : > { %v5733_v37 = vpop.eup %5732  ;;  %5752 = vrcp.f32 %v2936_v54  ;;  %v2945_v51 = vadd.f32 1.0, %v5731_v61  ;;  %9131 = vst [vmem:[#allocation9_spill] sm:$0xff] %v7799_v50  ;;  %v7803_v11 = vpop.f32.mrb[48].mxu1  ;;  %v5012_v45 = vmul.f32 -1.442695, %v9134_v63 }
 0x259   : > { %v5735_v41 = vpop.eup %5734  ;;  %5754 = vrcp.f32 %v3063_v19  ;;  %v3064_v31 = vadd.f32 1.0, %v5733_v37  ;;  %9132 = vst [vmem:[#allocation21_spill] sm:$0xff] %v7803_v11  ;;  %v7805_v61 = vpop.f32.mrb[89].mxu0 }
 0x25a   : > { %v5737_v40 = vpop.eup %5736  ;;  %v3886_v56 = vmul.f32 %v5735_v41, %v7566_v26  ;;  %5756 = vrcp.f32 %v2945_v51  ;;  %9133 = vst [vmem:[#allocation34_spill] sm:$0xff] %v7805_v61  ;;  %v7809_v19 = vpop.f32.mrb[49].mxu1 }
 0x25b   : > { %v5739_v54 = vpop.eup %5738  ;;  %v4013_v6 = vmul.f32 %v5737_v40, %v7572_v29  ;;  %5758 = vrcp.f32 %v3064_v31  ;;  %9135 = vst [vmem:[#allocation22_spill] sm:$0xff] %v7809_v19  ;;  %v7811_v46 = vpop.f32.mrb[90].mxu0 }
 0x25c   : > { %9136 = vst [vmem:[#allocation35_spill] sm:$0xff] %v7811_v46  ;;  %v5741_v37 = vpop.eup %5740  ;;  %v4269_v50 = vadd.f32 %v4268_v32, %v3886_v56  ;;  %v3895_v26 = vmul.f32 %v5739_v54, %v7574_v35  ;;  %5760 = vpow2.f32 %v5129_v52  ;;  %v7814_v51 = vpop.f32.mrb[50].mxu1  ;;  %v9137_v35 = vld [vmem:[#allocation8_spill] sm:$0xff] }
 0x25d   : > { %v7816_v41 = vpop.f32.mrb[91].mxu0  ;;  %v5743_v61 = vpop.eup %5742  ;;  %v4189_v11 = vadd.f32 %v4188_v20, %v4013_v6  ;;  %v4014_v29 = vmul.f32 %v5741_v37, %v9101_v14  ;;  %5762 = vpow2.f32 %v5011_v7  ;;  %v5139_v7 = vmul.f32 -1.442695, %v7639_v58 }
 0x25e   : > { %v7819_v31 = vpop.f32.mrb[51].mxu1  ;;  %v5745_v40 = vpop.eup %5744  ;;  %v4239_v19 = vadd.f32 %v4238_v60, %v3895_v26  ;;  %v2946_v21 = vadd.f32 1.0, %v5743_v61  ;;  %5764 = vpow2.f32 %v5130_v34  ;;  %4924 = vmatmul.mubr.msk.bf16.gmra.mrb[156].mxu1 %vm340_vm0, %v9137_v35  ;;  %v9139_v61 = vld [vmem:[#allocation23_spill] sm:$0xff]  ;;  %v5140_v26 = vmul.f32 -1.442695, %v7643_v48 }
 0x25f   : > { %v5747_v46 = vpop.eup %5746  ;;  %v4220_v32 = vadd.f32 %v4219_v9, %v4014_v29  ;;  %v3073_v56 = vadd.f32 1.0, %v5745_v40  ;;  %5766 = vpow2.f32 %v5012_v45  ;;  %1882 = vmatprep.mubr.bf16.mxu1 %v9090_v5  ;;  %v7825_v60 = vpop.f32.mrb[92].mxu0  ;;  %v5021_v6 = vmul.f32 -1.442695, %v9139_v61 }
 0x260   : > { %v5749_v52 = vpop.eup %5748  ;;  %5768 = vrcp.f32 %v2946_v21  ;;  %v2955_v54 = vadd.f32 1.0, %v5747_v46  ;;  %9138 = vst [vmem:[#allocation8_spill] sm:$0xff] %v7825_v60  ;;  %v7828_v45 = vpop.f32.mrb[52].mxu1  ;;  %v9146_v60 = vld [vmem:[#allocation11_spill] sm:$0xff] }
 0x261   : > { %v5751_v14 = vpop.eup %5750  ;;  %5770 = vrcp.f32 %v3073_v56  ;;  %v3074_v20 = vadd.f32 1.0, %v5749_v52  ;;  %9140 = vst [vmem:[#allocation23_spill] sm:$0xff] %v7828_v45  ;;  %v7830_v37 = vpop.f32.mrb[93].mxu0  ;;  %v5022_v52 = vmul.f32 -1.442695, %v7645_v4 }
 0x262   : > { %v5753_v34 = vpop.eup %5752  ;;  %5772 = vrcp.f32 %v2955_v54  ;;  %v2956_v9 = vadd.f32 1.0, %v5751_v14  ;;  %9141 = vst [vmem:[#allocation36_spill] sm:$0xff] %v7830_v37  ;;  %v7834_v29 = vpop.f32.mrb[53].mxu1 }
 0x263   : > { %v5755_v21 = vpop.eup %5754  ;;  %v3896_v46 = vmul.f32 %v5753_v34, %v9107_v27  ;;  %5774 = vrcp.f32 %v3074_v20  ;;  %9142 = vst [vmem:[#allocation37_spill] sm:$0xff] %v7834_v29  ;;  %v7836_v40 = vpop.f32.mrb[94].mxu0 }
 0x264   : > { %9143 = vst [vmem:[#allocation38_spill] sm:$0xff] %v7836_v40  ;;  %v5757_v56 = vpop.eup %5756  ;;  %v4023_v35 = vmul.f32 %v5755_v21, %v7598_v59  ;;  %5776 = vrcp.f32 %v2956_v9  ;;  %v7840_v54 = vpop.f32.mrb[54].mxu1 }
 0x265   : > { %9144 = vst [vmem:[#allocation39_spill] sm:$0xff] %v7840_v54  ;;  %v7842_v14 = vpop.f32.mrb[95].mxu0  ;;  %v5759_v37 = vpop.eup %5758  ;;  %v4270_v45 = vadd.f32 %v4269_v50, %v3896_v46  ;;  %v3905_v27 = vmul.f32 %v5757_v56, %v7596_v38  ;;  %5778 = vpow2.f32 %v5139_v7 }
 0x266   : > { %9145 = vst [vmem:[#allocation40_spill] sm:$0xff] %v7842_v14  ;;  %v7845_v20 = vpop.f32.mrb[55].mxu1  ;;  %v5761_v34 = vpop.eup %5760  ;;  %v4190_v29 = vadd.f32 %v4189_v11, %v4023_v35  ;;  %v4024_v40 = vmul.f32 %v5759_v37, %v7602_v10  ;;  %5780 = vpow2.f32 %v5021_v6  ;;  %4925 = vmatmul.mubr.msk.bf16.gmra.mrb[160].mxu1 %vm340_vm0, %v9146_v60  ;;  %v5149_v11 = vmul.f32 -1.442695, %v7663_v22 }
 0x267   : > { %v5763_v59 = vpop.eup %5762  ;;  %v4240_v9 = vadd.f32 %v4239_v19, %v3905_v27  ;;  %v3083_v21 = vadd.f32 1.0, %v5761_v34  ;;  %5782 = vpow2.f32 %v5140_v26  ;;  %1892 = vmatprep.mubr.bf16.mxu1 %v9090_v5  ;;  %v7852_v10 = vpop.f32.mrb[96].mxu0  ;;  %v5031_v37 = vmul.f32 -1.442695, %v7658_v28 }
 0x268   : > { %v5765_v14 = vpop.eup %5764  ;;  %v4221_v54 = vadd.f32 %v4220_v32, %v4024_v40  ;;  %v2965_v50 = vadd.f32 1.0, %v5763_v59  ;;  %5784 = vpow2.f32 %v5022_v52  ;;  %v7855_v46 = vpop.f32.mrb[56].mxu1  ;;  %v5150_v40 = vmul.f32 -1.442695, %v7668_v15 }
 0x269   : > { %v5767_v38 = vpop.eup %5766  ;;  %5786 = vrcp.f32 %v3083_v21  ;;  %v3084_v7 = vadd.f32 1.0, %v5765_v14  ;;  %v7857_v60 = vpop.f32.mrb[97].mxu0  ;;  %v5032_v27 = vmul.f32 -1.442695, %v7665_v30 }
 0x26a   : > { %v5769_v6 = vpop.eup %5768  ;;  %5788 = vrcp.f32 %v2965_v50  ;;  %v2966_v19 = vadd.f32 1.0, %v5767_v38  ;;  %v7861_v56 = vpop.f32.mrb[57].mxu1  ;;  %v5159_v38 = vmul.f32 -1.442695, %v7674_v55 }
 0x26b   : > { %v5771_v32 = vpop.eup %5770  ;;  %v3906_v26 = vmul.f32 %v5769_v6, %v9117_v2  ;;  %5790 = vrcp.f32 %v3084_v7  ;;  %v7863_v35 = vpop.f32.mrb[98].mxu0 }
 0x26c   : > { %9147 = vst [vmem:[#allocation11_spill] sm:$0xff] %v7863_v35  ;;  %v5773_v52 = vpop.eup %5772  ;;  %v4033_v14 = vmul.f32 %v5771_v32, %v9119_v39  ;;  %5792 = vrcp.f32 %v2966_v19  ;;  %v7867_v34 = vpop.f32.mrb[58].mxu1 }
 0x26d   : > { %9148 = vst [vmem:[#allocation41_spill] sm:$0xff] %v7867_v34  ;;  %v7869_v59 = vpop.f32.mrb[99].mxu0  ;;  %v5775_v21 = vpop.eup %5774  ;;  %v4271_v50 = vadd.f32 %v4270_v45, %v3906_v26  ;;  %v3915_v2 = vmul.f32 %v5773_v52, %v9120_v43  ;;  %5794 = vpow2.f32 %v5149_v11 }
 0x26e   : > { %9149 = vst [vmem:[#allocation42_spill] sm:$0xff] %v7869_v59  ;;  %v7873_v7 = vpop.f32.mrb[59].mxu1  ;;  %v5777_v6 = vpop.eup %5776  ;;  %v4191_v35 = vadd.f32 %v4190_v29, %v4033_v14  ;;  %v4034_v39 = vmul.f32 %v5775_v21, %v9122_v62  ;;  %5796 = vpow2.f32 %v5031_v37  ;;  %v9150_v59 = vld [vmem:[#allocation10_spill] sm:$0xff] }
 0x26f   : > { %v5779_v19 = vpop.eup %5778  ;;  %v4241_v32 = vadd.f32 %v4240_v9, %v3915_v2  ;;  %v3916_v34 = vmul.f32 %v5777_v6, %v9125_v12  ;;  %5798 = vpow2.f32 %v5150_v40  ;;  %4926 = vmatmul.mubr.msk.bf16.gmra.mrb[164].mxu1 %vm340_vm0, %v9150_v59  ;;  %v7880_v62 = vpop.f32.mrb[100].mxu0  ;;  %v5041_v12 = vmul.f32 -1.442695, %v7670_v3 }
 0x270   : > { %v5781_v45 = vpop.eup %5780  ;;  %v4222_v43 = vadd.f32 %v4221_v54, %v4034_v39  ;;  %v3093_v11 = vadd.f32 1.0, %v5779_v19  ;;  %5800 = vpow2.f32 %v5032_v27  ;;  %1902 = vmatprep.mubr.bf16.mxu1 %v9090_v5  ;;  %v7883_v40 = vpop.f32.mrb[60].mxu1  ;;  %v5160_v59 = vmul.f32 -1.442695, %v7679_v23 }
 0x271   : > { %v5783_v26 = vpop.eup %5782  ;;  %v4272_v52 = vadd.f32 %v4271_v50, %v3916_v34  ;;  %v2975_v29 = vadd.f32 1.0, %v5781_v45  ;;  %5802 = vpow2.f32 %v5159_v38  ;;  %v7885_v14 = vpop.f32.mrb[101].mxu0  ;;  %v5042_v2 = vmul.f32 -1.442695, %v7676_v53 }
 0x272   : > { %v5785_v37 = vpop.eup %5784  ;;  %5804 = vrcp.f32 %v3093_v11  ;;  %v3094_v9 = vadd.f32 1.0, %v5783_v26  ;;  %v7888_v21 = vpop.f32.mrb[61].mxu1  ;;  %v5169_v19 = vmul.f32 -1.442695, %v7694_v57 }
 0x273   : > { %v5787_v54 = vpop.eup %5786  ;;  %5806 = vrcp.f32 %v2975_v29  ;;  %v2976_v27 = vadd.f32 1.0, %v5785_v37  ;;  %v7892_v38 = vpop.f32.mrb[102].mxu0 }
 0x274   : > { %v5789_v34 = vpop.eup %5788  ;;  %v4043_v50 = vmul.f32 %v5787_v54, %v7628_v1  ;;  %5808 = vrcp.f32 %v3094_v9  ;;  %9151 = vst [vmem:[#allocation10_spill] sm:$0xff] %v7892_v38  ;;  %v7896_v45 = vpop.f32.mrb[62].mxu1 }
 0x275   : > { %v5791_v6 = vpop.eup %5790  ;;  %v3925_v39 = vmul.f32 %v5789_v34, %v9130_v42  ;;  %5810 = vrcp.f32 %v2976_v27  ;;  %9152 = vst [vmem:[#allocation43_spill] sm:$0xff] %v7896_v45  ;;  %v7900_v54 = vpop.f32.mrb[103].mxu0  ;;  %v9153_v42 = vld [vmem:[#allocation12_spill] sm:$0xff] }
 0x276   : > { %v5793_v11 = vpop.eup %5792  ;;  %v4192_v26 = vadd.f32 %v4191_v35, %v4043_v50  ;;  %v4044_v29 = vmul.f32 %v5791_v6, %v7634_v36  ;;  %5812 = vpow2.f32 %v5041_v12  ;;  %v7902_v38 = vpop.f32.mrb[63].mxu1  ;;  %v5051_v6 = vmul.f32 -1.442695, %v7690_v44 }
 0x277   : > { %v5795_v37 = vpop.eup %5794  ;;  %v4242_v1 = vadd.f32 %v4241_v32, %v3925_v39  ;;  %v3926_v9 = vmul.f32 %v5793_v11, %v9134_v63  ;;  %5814 = vpow2.f32 %v5160_v59  ;;  %4927 = vmatmul.mubr.msk.bf16.gmra.mrb[168].mxu1 %vm340_vm0, %v9153_v42 }
 0x278   : > { %v5797_v27 = vpop.eup %5796  ;;  %v4223_v34 = vadd.f32 %v4222_v43, %v4044_v29  ;;  %v3103_v45 = vadd.f32 1.0, %v5795_v37  ;;  %5816 = vpow2.f32 %v5042_v2  ;;  %1912 = vmatprep.mubr.bf16.mxu1 %v9090_v5  ;;  %v5170_v43 = vmul.f32 -1.442695, %v7700_v24 }
 0x279   : > { %v5799_v36 = vpop.eup %5798  ;;  %v4273_v35 = vadd.f32 %v4272_v52, %v3926_v9  ;;  %v2985_v12 = vadd.f32 1.0, %v5797_v27  ;;  %5818 = vpow2.f32 %v5169_v19  ;;  %v5052_v52 = vmul.f32 -1.442695, %v7696_v18  ;;  %v7911_v19 = vpop.f32.mrb[104].mxu0 }
 0x27a   : > { %v5801_v32 = vpop.eup %5800  ;;  %5820 = vrcp.f32 %v3103_v45  ;;  %v3104_v63 = vadd.f32 1.0, %v5799_v36  ;;  %v7913_v45 = vpop.f32.mrb[64].mxu1  ;;  %v5179_v9 = vmul.f32 -1.442695, %v7704_v49 }
 0x27b   : > { %v5803_v59 = vpop.eup %5802  ;;  %5822 = vrcp.f32 %v2985_v12  ;;  %v2986_v50 = vadd.f32 1.0, %v5801_v32  ;;  %v7917_v42 = vpop.f32.mrb[105].mxu0 }
 0x27c   : > { %v5805_v39 = vpop.eup %5804  ;;  %5824 = vrcp.f32 %v3104_v63  ;;  %v3113_v11 = vadd.f32 1.0, %v5803_v59  ;;  %v7919_v27 = vpop.f32.mrb[65].mxu1 }
 0x27d   : > { %v5807_v2 = vpop.eup %5806  ;;  %v4053_v5 = vmul.f32 %v5805_v39, %v7639_v58  ;;  %5826 = vrcp.f32 %v2986_v50  ;;  %v7927_v50 = vpop.f32.mrb[66].mxu1 }
 0x27e   : > { %v5809_v29 = vpop.eup %5808  ;;  %v3935_v37 = vmul.f32 %v5807_v2, %v9139_v61  ;;  %5828 = vrcp.f32 %v3113_v11  ;;  %v7925_v61 = vpop.f32.mrb[106].mxu0  ;;  %9154 = vst [vmem:[#allocation12_spill] sm:$0xff] %v7927_v50 }
 0x27f   : > { %v5811_v36 = vpop.eup %5810  ;;  %v4193_v12 = vadd.f32 %v4192_v26, %v4053_v5  ;;  %v4054_v58 = vmul.f32 %v5809_v29, %v7643_v48  ;;  %5830 = vpow2.f32 %v5051_v6  ;;  %4928 = vmatmul.mubr.msk.bf16.gmra.mrb[172].mxu1 %vm340_vm0, %v7274_v25  ;;  %v7929_v6 = vpop.f32.mrb[107].mxu0 }
 0x280   : > { %v5813_v32 = vpop.eup %5812  ;;  %v4243_v63 = vadd.f32 %v4242_v1, %v3935_v37  ;;  %v3936_v59 = vmul.f32 %v5811_v36, %v7645_v4  ;;  %5832 = vpow2.f32 %v5170_v43  ;;  %9155 = vst [vmem:[#allocation44_spill] sm:$0xff] %v7929_v6  ;;  %v5061_v4 = vmul.f32 -1.442695, %v7702_v47 }
 0x281   : > { %v5815_v39 = vpop.eup %5814  ;;  %v4224_v11 = vadd.f32 %v4223_v34, %v4054_v58  ;;  %v2995_v2 = vadd.f32 1.0, %v5813_v32  ;;  %5834 = vpow2.f32 %v5052_v52  ;;  %v5180_v37 = vmul.f32 -1.442695, %v7708_v17  ;;  %v9156_v52 = vld [vmem:[#allocation24_spill] sm:$0xff] }
 0x282   : > { %v5817_v26 = vpop.eup %5816  ;;  %v4274_v5 = vadd.f32 %v4273_v35, %v3936_v59  ;;  %v3114_v48 = vadd.f32 1.0, %v5815_v39  ;;  %5836 = vpow2.f32 %v5179_v9  ;;  %v5062_v35 = vmul.f32 -1.442695, %v9156_v52  ;;  %v7937_v59 = vpop.f32.mrb[67].mxu1 }
 0x283   : > { %v5819_v25 = vpop.eup %5818  ;;  %5838 = vrcp.f32 %v2995_v2  ;;  %v2996_v1 = vadd.f32 1.0, %v5817_v26  ;;  %v5189_v32 = vmul.f32 -1.442695, %v7723_v0  ;;  %9157 = vst [vmem:[#allocation24_spill] sm:$0xff] %v7937_v59 }
 0x284   : > { %v5821_v43 = vpop.eup %5820  ;;  %5840 = vrcp.f32 %v3114_v48  ;;  %v3123_v29 = vadd.f32 1.0, %v5819_v25  ;;  %v9158_v48 = vld [vmem:[#allocation13_spill] sm:$0xff] }
 0x285   : > { %v5823_v36 = vpop.eup %5822  ;;  %v4063_v34 = vmul.f32 %v5821_v43, %v7663_v22  ;;  %5842 = vrcp.f32 %v2996_v1  ;;  %v5071_v25 = vmul.f32 -1.442695, %v9158_v48 }
 0x286   : > { %v5825_v58 = vpop.eup %5824  ;;  %v3945_v9 = vmul.f32 %v5823_v36, %v7658_v28  ;;  %5844 = vrcp.f32 %v3123_v29 }
 0x287   : > { %v5827_v39 = vpop.eup %5826  ;;  %v4194_v2 = vadd.f32 %v4193_v12, %v4063_v34  ;;  %v4064_v26 = vmul.f32 %v5825_v58, %v7668_v15  ;;  %5846 = vpow2.f32 %v5061_v4 }
 0x288   : > { %v5829_v6 = vpop.eup %5828  ;;  %v4244_v22 = vadd.f32 %v4243_v63, %v3945_v9  ;;  %v3946_v1 = vmul.f32 %v5827_v39, %v7665_v30  ;;  %5848 = vpow2.f32 %v5180_v37  ;;  %v5190_v63 = vmul.f32 -1.442695, %v7728_v33  ;;  %v9159_v9 = vld [vmem:[#allocation25_spill] sm:$0xff] }
 0x289   : > { %v5831_v43 = vpop.eup %5830  ;;  %v4225_v50 = vadd.f32 %v4224_v11, %v4064_v26  ;;  %v4073_v28 = vmul.f32 %v5829_v6, %v7674_v55  ;;  %5850 = vpow2.f32 %v5062_v35  ;;  %v5072_v11 = vmul.f32 -1.442695, %v7725_v13  ;;  %v7945_v55 = vpop.f32.mrb[108].mxu0 }
 0x28a   : > { %v5833_v29 = vpop.eup %5832  ;;  %v4275_v36 = vadd.f32 %v4274_v5, %v3946_v1  ;;  %v3005_v59 = vadd.f32 1.0, %v5831_v43  ;;  %5852 = vpow2.f32 %v5189_v32  ;;  %v7947_v6 = vpop.f32.mrb[68].mxu1  ;;  %v5199_v32 = vmul.f32 -1.442695, %v9159_v9 }
 0x28b   : > { %v5835_v12 = vpop.eup %5834  ;;  %v4195_v34 = vadd.f32 %v4194_v2, %v4073_v28  ;;  %v3124_v15 = vadd.f32 1.0, %v5833_v29  ;;  %5854 = vpow2.f32 %v5071_v25  ;;  %v9160_v2 = vld [vmem:[#allocation14_spill] sm:$0xff]  ;;  %v7954_v28 = vpop.f32.mrb[109].mxu0 }
 0x28c   : > { %v5837_v4 = vpop.eup %5836  ;;  %5856 = vrcp.f32 %v3005_v59  ;;  %v3006_v58 = vadd.f32 1.0, %v5835_v12  ;;  %v5081_v26 = vmul.f32 -1.442695, %v9160_v2  ;;  %9161 = vst [vmem:[#allocation13_spill] sm:$0xff] %v7954_v28  ;;  %v7956_v29 = vpop.f32.mrb[69].mxu1 }
 0x28d   : > { %v5839_v30 = vpop.eup %5838  ;;  %5858 = vrcp.f32 %v3124_v15  ;;  %v3133_v37 = vadd.f32 1.0, %v5837_v4  ;;  %9162 = vst [vmem:[#allocation25_spill] sm:$0xff] %v7956_v29 }
 0x28e   : > { %v5841_v5 = vpop.eup %5840  ;;  %v3955_v35 = vmul.f32 %v5839_v30, %v7670_v3  ;;  %5860 = vrcp.f32 %v3006_v58  ;;  %v7959_v30 = vpop.f32.mrb[110].mxu0 }
 0x28f   : > { %v5843_v39 = vpop.eup %5842  ;;  %v4074_v59 = vmul.f32 %v5841_v5, %v7679_v23  ;;  %5862 = vrcp.f32 %v3133_v37  ;;  %9163 = vst [vmem:[#allocation14_spill] sm:$0xff] %v7959_v30  ;;  %v7961_v37 = vpop.f32.mrb[70].mxu1 }
 0x290   : > { %v5845_v25 = vpop.eup %5844  ;;  %v4245_v1 = vadd.f32 %v4244_v22, %v3955_v35  ;;  %v3956_v43 = vmul.f32 %v5843_v39, %v7676_v53  ;;  %5864 = vpow2.f32 %v5190_v63  ;;  %9164 = vst [vmem:[#allocation45_spill] sm:$0xff] %v7961_v37 }
 0x291   : > { %v5847_v12 = vpop.eup %5846  ;;  %v4226_v3 = vadd.f32 %v4225_v50, %v4074_v59  ;;  %v4083_v15 = vmul.f32 %v5845_v25, %v7694_v57  ;;  %5866 = vpow2.f32 %v5072_v11  ;;  %v9165_v57 = vld [vmem:[#allocation27_spill] sm:$0xff]  ;;  %v7964_v59 = vpop.f32.mrb[111].mxu0  ;;  %v9167_v25 = vld [vmem:[#allocation26_spill] sm:$0xff] }
 0x292   : > { %v5849_v4 = vpop.eup %5848  ;;  %v4276_v58 = vadd.f32 %v4275_v36, %v3956_v43  ;;  %v3015_v23 = vadd.f32 1.0, %v5847_v12  ;;  %5868 = vpow2.f32 %v5199_v32  ;;  %v5200_v11 = vmul.f32 -1.442695, %v9165_v57  ;;  %9166 = vst [vmem:[#allocation27_spill] sm:$0xff] %v7964_v59  ;;  %v7967_v12 = vpop.f32.mrb[71].mxu1 }
 0x293   : > { %v5851_v22 = vpop.eup %5850  ;;  %v4196_v53 = vadd.f32 %v4195_v34, %v4083_v15  ;;  %v3134_v63 = vadd.f32 1.0, %v5849_v4  ;;  %5870 = vpow2.f32 %v5081_v26  ;;  %v5082_v43 = vmul.f32 -1.442695, %v9167_v25  ;;  %9168 = vst [vmem:[#allocation26_spill] sm:$0xff] %v7967_v12  ;;  %v9169_v15 = vld [vmem:[#allocation7_spill] sm:$0xff] }
 0x294   : > { %v5853_v5 = vpop.eup %5852  ;;  %5872 = vrcp.f32 %v3015_v23  ;;  %v3016_v35 = vadd.f32 1.0, %v5851_v22  ;;  %v5209_v4 = vmul.f32 -1.442695, %v9169_v15 }
 0x295   : > { %v5855_v39 = vpop.eup %5854  ;;  %5874 = vrcp.f32 %v3134_v63  ;;  %v3143_v50 = vadd.f32 1.0, %v5853_v5  ;;  %v9170_v63 = vld [vmem:[#allocation15_spill] sm:$0xff] }
 0x296   : > { %v5857_v36 = vpop.eup %5856  ;;  %5876 = vrcp.f32 %v3016_v35  ;;  %v3025_v32 = vadd.f32 1.0, %v5855_v39  ;;  %v5091_v5 = vmul.f32 -1.442695, %v9170_v63 }
 0x297   : > { %v5859_v34 = vpop.eup %5858  ;;  %v3965_v26 = vmul.f32 %v5857_v36, %v7690_v44  ;;  %5878 = vrcp.f32 %v3143_v50 }
 0x298   : > { %v5861_v23 = vpop.eup %5860  ;;  %v4084_v22 = vmul.f32 %v5859_v34, %v7700_v24  ;;  %5880 = vrcp.f32 %v3025_v32 }
 0x299   : > { %v5863_v59 = vpop.eup %5862  ;;  %v4246_v37 = vadd.f32 %v4245_v1, %v3965_v26  ;;  %v3966_v35 = vmul.f32 %v5861_v23, %v7696_v18  ;;  %5882 = vpow2.f32 %v5200_v11  ;;  %v9171_v1 = vld [vmem:[#allocation29_spill] sm:$0xff]  ;;  %v7976_v18 = vpop.f32.mrb[72].mxu1 }
 0x29a   : > { %v5865_v39 = vpop.eup %5864  ;;  %v4227_v30 = vadd.f32 %v4226_v3, %v4084_v22  ;;  %v4093_v12 = vmul.f32 %v5863_v59, %v7704_v49  ;;  %5884 = vpow2.f32 %v5082_v43  ;;  %v5210_v26 = vmul.f32 -1.442695, %v9171_v1  ;;  %9172 = vst [vmem:[#allocation7_spill] sm:$0xff] %v7976_v18  ;;  %v7978_v11 = vpop.f32.mrb[112].mxu0  ;;  %v9174_v59 = vld [vmem:[#allocation28_spill] sm:$0xff] }
 0x29b   : > { %v5867_v44 = vpop.eup %5866  ;;  %v4277_v50 = vadd.f32 %v4276_v58, %v3966_v35  ;;  %v3144_v36 = vadd.f32 1.0, %v5865_v39  ;;  %5886 = vpow2.f32 %v5209_v4  ;;  %9173 = vst [vmem:[#allocation15_spill] sm:$0xff] %v7978_v11  ;;  %v5092_v58 = vmul.f32 -1.442695, %v9174_v59  ;;  %v7981_v43 = vpop.f32.mrb[73].mxu1  ;;  %v9178_v35 = vld [vmem:[#allocation30_spill] sm:$0xff] }
 0x29c   : > { %v5869_v29 = vpop.eup %5868  ;;  %v4197_v28 = vadd.f32 %v4196_v53, %v4093_v12  ;;  %v3026_v24 = vadd.f32 1.0, %v5867_v44  ;;  %5888 = vpow2.f32 %v5091_v5  ;;  %9175 = vst [vmem:[#allocation29_spill] sm:$0xff] %v7981_v43  ;;  %v9176_v12 = vld [vmem:[#allocation31_spill] sm:$0xff]  ;;  %v5101_v39 = vmul.f32 -1.442695, %v9178_v35  ;;  %v7991_v11 = vpop.f32.mrb[74].mxu1 }
 0x29d   : > { %v5871_v32 = vpop.eup %5870  ;;  %5890 = vrcp.f32 %v3144_v36  ;;  %v3153_v34 = vadd.f32 1.0, %v5869_v29  ;;  %v5219_v23 = vmul.f32 -1.442695, %v9176_v12  ;;  %v7985_v29 = vpop.f32.mrb[113].mxu0  ;;  %9180 = vst [vmem:[#allocation31_spill] sm:$0xff] %v7991_v11 }
 0x29e   : > { %v5873_v3 = vpop.eup %5872  ;;  %5892 = vrcp.f32 %v3026_v24  ;;  %v3035_v49 = vadd.f32 1.0, %v5871_v32  ;;  %9177 = vst [vmem:[#allocation28_spill] sm:$0xff] %v7985_v29  ;;  %v9179_v32 = vld [vmem:[#allocation33_spill] sm:$0xff]  ;;  %v7994_v29 = vpop.f32.mrb[114].mxu0 }
 0x29f   : > { %v5875_v4 = vpop.eup %5874  ;;  %v3975_v53 = vmul.f32 %v5873_v3, %v7702_v47  ;;  %5894 = vrcp.f32 %v3153_v34  ;;  %v5220_v43 = vmul.f32 -1.442695, %v9179_v32  ;;  %9181 = vst [vmem:[#allocation30_spill] sm:$0xff] %v7994_v29  ;;  %v7997_v11 = vpop.f32.mrb[75].mxu1 }
 0x2a0   : > { %v5877_v22 = vpop.eup %5876  ;;  %v4094_v5 = vmul.f32 %v5875_v4, %v7708_v17  ;;  %5896 = vrcp.f32 %v3035_v49  ;;  %9182 = vst [vmem:[#allocation33_spill] sm:$0xff] %v7997_v11 }
 0x2a1   : > { %v5879_v44 = vpop.eup %5878  ;;  %v4247_v36 = vadd.f32 %v4246_v37, %v3975_v53  ;;  %v3976_v24 = vmul.f32 %v5877_v22, %v9156_v52  ;;  %5898 = vpow2.f32 %v5210_v26 }
 0x2a2   : > { %v5881_v47 = vpop.eup %5880  ;;  %v4228_v34 = vadd.f32 %v4227_v30, %v4094_v5  ;;  %v4103_v3 = vmul.f32 %v5879_v44, %v7723_v0  ;;  %5900 = vpow2.f32 %v5092_v58  ;;  %v9183_v58 = vld [vmem:[#allocation32_spill] sm:$0xff] }
 0x2a3   : > { %v5883_v17 = vpop.eup %5882  ;;  %v4278_v49 = vadd.f32 %v4277_v50, %v3976_v24  ;;  %v3985_v4 = vmul.f32 %v5881_v47, %v9158_v48  ;;  %5902 = vpow2.f32 %v5219_v23  ;;  %v5102_v5 = vmul.f32 -1.442695, %v9183_v58  ;;  %v9184_v48 = vld [vmem:[#allocation6_spill] sm:$0xff] }
 0x2a4   : > { %v5885_v37 = vpop.eup %5884  ;;  %v4198_v53 = vadd.f32 %v4197_v28, %v4103_v3  ;;  %v3154_v52 = vadd.f32 1.0, %v5883_v17  ;;  %5904 = vpow2.f32 %v5101_v39  ;;  %v5229_v23 = vmul.f32 -1.442695, %v9184_v48  ;;  %v9185_v39 = vld [vmem:[#allocation16_spill] sm:$0xff]  ;;  %v9186_v3 = vld [vmem:[#allocation17_spill] sm:$0xff] }
 0x2a5   : > { %v5887_v26 = vpop.eup %5886  ;;  %v4248_v22 = vadd.f32 %v4247_v36, %v3985_v4  ;;  %v3036_v18 = vadd.f32 1.0, %v5885_v37  ;;  %5906 = vpow2.f32 %v5220_v43  ;;  %v5111_v36 = vmul.f32 -1.442695, %v9185_v39  ;;  %v8005_v4 = vpop.f32.mrb[115].mxu0 }
 0x2a6   : > { %v5889_v30 = vpop.eup %5888  ;;  %5908 = vrcp.f32 %v3154_v52  ;;  %v3163_v0 = vadd.f32 1.0, %v5887_v26  ;;  %v5230_v17 = vmul.f32 -1.442695, %v9186_v3  ;;  %9187 = vst [vmem:[#allocation32_spill] sm:$0xff] %v8005_v4 }
 0x2a7   : > { %v5891_v44 = vpop.eup %5890  ;;  %5910 = vrcp.f32 %v3036_v18  ;;  %v3045_v50 = vadd.f32 1.0, %v5889_v30 }
 0x2a8   : > { %v5893_v24 = vpop.eup %5892  ;;  %v4104_v28 = vmul.f32 %v5891_v44, %v7728_v33  ;;  %5912 = vrcp.f32 %v3163_v0 }
 0x2a9   : > { %v5895_v47 = vpop.eup %5894  ;;  %v3986_v43 = vmul.f32 %v5893_v24, %v7725_v13  ;;  %5914 = vrcp.f32 %v3045_v50 }
 0x2aa   : > { %v5897_v37 = vpop.eup %5896  ;;  %v4229_v52 = vadd.f32 %v4228_v34, %v4104_v28  ;;  %v4113_v18 = vmul.f32 %v5895_v47, %v9159_v9  ;;  %5916 = vpow2.f32 %v5102_v5  ;;  %v9188_v5 = vld [vmem:[#allocation18_spill] sm:$0xff] }
 0x2ab   : > { %v5899_v26 = vpop.eup %5898  ;;  %v4279_v30 = vadd.f32 %v4278_v49, %v3986_v43  ;;  %v3995_v33 = vmul.f32 %v5897_v37, %v9160_v2  ;;  %5918 = vpow2.f32 %v5229_v23  ;;  %v5112_v28 = vmul.f32 -1.442695, %v9188_v5  ;;  %v8010_v49 = vpop.f32.mrb[76].mxu1  ;;  %v9190_v43 = vld [vmem:[#allocation19_spill] sm:$0xff] }
 0x2ac   : > { %v5901_v0 = vpop.eup %5900  ;;  %v4199_v44 = vadd.f32 %v4198_v53, %v4113_v18  ;;  %v3164_v11 = vadd.f32 1.0, %v5899_v26  ;;  %5920 = vpow2.f32 %v5111_v36  ;;  %v8012_v2 = vpop.f32.mrb[116].mxu0  ;;  %v5239_v36 = vmul.f32 -1.442695, %v7787_v16 }
 0x2ad   : > { %v5903_v13 = vpop.eup %5902  ;;  %v4249_v50 = vadd.f32 %v4248_v22, %v3995_v33  ;;  %v3046_v24 = vadd.f32 1.0, %v5901_v0  ;;  %5922 = vpow2.f32 %v5230_v17  ;;  %v8015_v22 = vpop.f32.mrb[77].mxu1  ;;  %v5121_v17 = vmul.f32 -1.442695, %v9190_v43 }
 0x2ae   : > { %v5905_v29 = vpop.eup %5904  ;;  %5924 = vrcp.f32 %v3164_v11  ;;  %v3173_v4 = vadd.f32 1.0, %v5903_v13  ;;  %9189 = vst [vmem:[#allocation6_spill] sm:$0xff] %v8015_v22  ;;  %v8021_v37 = vpop.f32.mrb[78].mxu1 }
 0x2af   : > { %v5907_v34 = vpop.eup %5906  ;;  %5926 = vrcp.f32 %v3046_v24  ;;  %v3055_v9 = vadd.f32 1.0, %v5905_v29  ;;  %v8019_v29 = vpop.f32.mrb[117].mxu0  ;;  %9192 = vst [vmem:[#allocation17_spill] sm:$0xff] %v8021_v37 }
 0x2b0   : > { %v5909_v23 = vpop.eup %5908  ;;  %5928 = vrcp.f32 %v3173_v4  ;;  %v3174_v53 = vadd.f32 1.0, %v5907_v34  ;;  %9191 = vst [vmem:[#allocation16_spill] sm:$0xff] %v8019_v29  ;;  %v5240_v4 = vmul.f32 -1.442695, %v7792_v8  ;;  %v8026_v24 = vpop.f32.mrb[118].mxu0 }
 0x2b1   : > { %v5911_v47 = vpop.eup %5910  ;;  %v4114_v11 = vmul.f32 %v5909_v23, %v9165_v57  ;;  %5930 = vrcp.f32 %v3055_v9  ;;  %9193 = vst [vmem:[#allocation18_spill] sm:$0xff] %v8026_v24 }
 0x2b2   : > { %v5913_v18 = vpop.eup %5912  ;;  %v3996_v26 = vmul.f32 %v5911_v47, %v9167_v25  ;;  %5932 = vrcp.f32 %v3174_v53  ;;  %v8029_v25 = vpop.f32.mrb[79].mxu1 }
 0x2b3   : > { %v5915_v33 = vpop.eup %5914  ;;  %v4230_v0 = vadd.f32 %v4229_v52, %v4114_v11  ;;  %v4123_v13 = vmul.f32 %v5913_v18, %v9169_v15  ;;  %5934 = vpow2.f32 %v5112_v28  ;;  %9194 = vst [vmem:[#allocation19_spill] sm:$0xff] %v8029_v25  ;;  %v8031_v53 = vpop.f32.mrb[119].mxu0  ;;  %v9196_v18 = vld [vmem:[#allocation20_spill] sm:$0xff] }
 0x2b4   : > { %v5917_v57 = vpop.eup %5916  ;;  %v4280_v34 = vadd.f32 %v4279_v30, %v3996_v26  ;;  %v4005_v9 = vmul.f32 %v5915_v33, %v9170_v63  ;;  %5936 = vpow2.f32 %v5239_v36  ;;  %9195 = vst [vmem:[#allocation46_spill] sm:$0xff] %v8031_v53  ;;  %v5122_v30 = vmul.f32 -1.442695, %v9196_v18  ;;  %v9197_v36 = vld [vmem:[#allocation9_spill] sm:$0xff] }
 0x2b5   : > { %v5919_v23 = vpop.eup %5918  ;;  %v4200_v37 = vadd.f32 %v4199_v44, %v4123_v13  ;;  %v3056_v29 = vadd.f32 1.0, %v5917_v57  ;;  %5938 = vpow2.f32 %v5121_v17  ;;  %v5131_v44 = vmul.f32 -1.442695, %v9197_v36  ;;  %v9198_v13 = vld [vmem:[#allocation21_spill] sm:$0xff] }
 0x2b6   : > { %v5921_v47 = vpop.eup %5920  ;;  %v4250_v52 = vadd.f32 %v4249_v50, %v4005_v9  ;;  %v3183_v11 = vadd.f32 1.0, %v5919_v23  ;;  %5940 = vpow2.f32 %v5240_v4  ;;  %v4933_v57 = vmul.f32 -1.442695, %v9198_v13  ;;  %v9199_v4 = vld [vmem:[#allocation34_spill] sm:$0xff] }
 0x2b7   : > { %v5923_v15 = vpop.eup %5922  ;;  %5942 = vrcp.f32 %v3056_v29  ;;  %v3065_v28 = vadd.f32 1.0, %v5921_v47  ;;  %v5132_v29 = vmul.f32 -1.442695, %v9199_v4 }
 0x2b8   : > { %v5925_v26 = vpop.eup %5924  ;;  %5944 = vrcp.f32 %v3183_v11  ;;  %v3184_v63 = vadd.f32 1.0, %v5923_v15  ;;  %v9200_v11 = vld [vmem:[#allocation22_spill] sm:$0xff] }
 0x2b9   : > { %v5927_v33 = vpop.eup %5926  ;;  %v4124_v17 = vmul.f32 %v5925_v26, %v9171_v1  ;;  %5946 = vrcp.f32 %v3065_v28  ;;  %v4934_v15 = vmul.f32 -1.442695, %v9200_v11 }
 0x2ba   : > { %v5929_v53 = vpop.eup %5928  ;;  %v4006_v50 = vmul.f32 %v5927_v33, %v9174_v59  ;;  %5948 = vrcp.f32 %v3184_v63 }
 0x2bb   : > { %v5931_v9 = vpop.eup %5930  ;;  %v4231_v23 = vadd.f32 %v4230_v0, %v4124_v17  ;;  %v4133_v47 = vmul.f32 %v5929_v53, %v9176_v12  ;;  %5950 = vpow2.f32 %v5122_v30  ;;  %v8043_v53 = vpop.f32.mrb[80].mxu1 }
 0x2bc   : > { %v5933_v25 = vpop.eup %5932  ;;  %v4281_v24 = vadd.f32 %v4280_v34, %v4006_v50  ;;  %v4015_v1 = vmul.f32 %v5931_v9, %v9178_v35  ;;  %5952 = vpow2.f32 %v5131_v44  ;;  %v8045_v30 = vpop.f32.mrb[120].mxu0  ;;  %v9201_v44 = vld [vmem:[#allocation35_spill] sm:$0xff]  ;;  %v5142_v9 = vmul.f32 -1.442695, %v7816_v41 }
 0x2bd   : > { %v5935_v28 = vpop.eup %5934  ;;  %v4201_v26 = vadd.f32 %v4200_v37, %v4133_v47  ;;  %v4134_v22 = vmul.f32 %v5933_v25, %v9179_v32  ;;  %5954 = vpow2.f32 %v4933_v57  ;;  %v5141_v37 = vmul.f32 -1.442695, %v9201_v44  ;;  %v8048_v50 = vpop.f32.mrb[81].mxu1 }
 0x2be   : > { %v5937_v59 = vpop.eup %5936  ;;  %v4251_v63 = vadd.f32 %v4250_v52, %v4015_v1  ;;  %v3066_v33 = vadd.f32 1.0, %v5935_v28  ;;  %5956 = vpow2.f32 %v5132_v29  ;;  %v4943_v52 = vmul.f32 -1.442695, %v7814_v51  ;;  %v8051_v57 = vpop.f32.mrb[121].mxu0 }
 0x2bf   : > { %v5939_v0 = vpop.eup %5938  ;;  %v4232_v17 = vadd.f32 %v4231_v23, %v4134_v22  ;;  %v3193_v12 = vadd.f32 1.0, %v5937_v59  ;;  %5958 = vpow2.f32 %v4934_v15  ;;  %9202 = vst [vmem:[#allocation20_spill] sm:$0xff] %v8051_v57  ;;  %v4944_v15 = vmul.f32 -1.442695, %v7819_v31 }
 0x2c0   : > { %v5941_v34 = vpop.eup %5940  ;;  %5960 = vrcp.f32 %v3066_v33  ;;  %v3075_v35 = vadd.f32 1.0, %v5939_v0  ;;  %v8058_v33 = vpop.f32.mrb[82].mxu1 }
 0x2c1   : > { %v5943_v32 = vpop.eup %5942  ;;  %5962 = vrcp.f32 %v3193_v12  ;;  %v3194_v25 = vadd.f32 1.0, %v5941_v34  ;;  %9203 = vst [vmem:[#allocation9_spill] sm:$0xff] %v8058_v33  ;;  %v8060_v0 = vpop.f32.mrb[122].mxu0 }
 0x2c2   : > { %v5945_v22 = vpop.eup %5944  ;;  %v4016_v29 = vmul.f32 %v5943_v32, %v9183_v58  ;;  %5964 = vrcp.f32 %v3075_v35  ;;  %9204 = vst [vmem:[#allocation21_spill] sm:$0xff] %v8060_v0 }
 0x2c3   : > { %v5947_v23 = vpop.eup %5946  ;;  %v4143_v47 = vmul.f32 %v5945_v22, %v9184_v48  ;;  %5966 = vrcp.f32 %v3194_v25  ;;  %v8063_v25 = vpop.f32.mrb[83].mxu1 }
 0x2c4   : > { %v5949_v1 = vpop.eup %5948  ;;  %v4282_v28 = vadd.f32 %v4281_v24, %v4016_v29  ;;  %v4025_v59 = vmul.f32 %v5947_v23, %v9185_v39  ;;  %5968 = vpow2.f32 %v5141_v37  ;;  %9205 = vst [vmem:[#allocation34_spill] sm:$0xff] %v8063_v25  ;;  %v8065_v22 = vpop.f32.mrb[123].mxu0 }
 0x2c5   : > { %v5951_v12 = vpop.eup %5950  ;;  %v4202_v58 = vadd.f32 %v4201_v26, %v4143_v47  ;;  %v4144_v34 = vmul.f32 %v5949_v1, %v9186_v3  ;;  %5970 = vpow2.f32 %v4943_v52  ;;  %9206 = vst [vmem:[#allocation22_spill] sm:$0xff] %v8065_v22  ;;  %v9207_v3 = vld [vmem:[#allocation8_spill] sm:$0xff] }
 0x2c6   : > { %v5953_v35 = vpop.eup %5952  ;;  %v4252_v32 = vadd.f32 %v4251_v63, %v4025_v59  ;;  %v3076_v48 = vadd.f32 1.0, %v5951_v12  ;;  %5972 = vpow2.f32 %v5142_v9  ;;  %v5151_v52 = vmul.f32 -1.442695, %v9207_v3  ;;  %v9208_v9 = vld [vmem:[#allocation23_spill] sm:$0xff] }
 0x2c7   : > { %v5955_v24 = vpop.eup %5954  ;;  %v4233_v39 = vadd.f32 %v4232_v17, %v4144_v34  ;;  %v3085_v37 = vadd.f32 1.0, %v5953_v35  ;;  %5974 = vpow2.f32 %v4944_v15  ;;  %v4953_v1 = vmul.f32 -1.442695, %v9208_v9  ;;  %v9209_v17 = vld [vmem:[#allocation36_spill] sm:$0xff] }
 0x2c8   : > { %v5957_v29 = vpop.eup %5956  ;;  %5976 = vrcp.f32 %v3076_v48  ;;  %v2887_v23 = vadd.f32 1.0, %v5955_v24  ;;  %v5152_v34 = vmul.f32 -1.442695, %v9209_v17  ;;  %v9210_v48 = vld [vmem:[#allocation37_spill] sm:$0xff] }
 0x2c9   : > { %v5959_v0 = vpop.eup %5958  ;;  %5978 = vrcp.f32 %v3085_v37  ;;  %v3086_v26 = vadd.f32 1.0, %v5957_v29  ;;  %v4954_v24 = vmul.f32 -1.442695, %v9210_v48 }
 0x2ca   : > { %v5961_v47 = vpop.eup %5960  ;;  %5980 = vrcp.f32 %v2887_v23  ;;  %v2888_v63 = vadd.f32 1.0, %v5959_v0  ;;  %v8074_v0 = vpop.f32.mrb[84].mxu1 }
 0x2cb   : > { %v5963_v59 = vpop.eup %5962  ;;  %v4026_v12 = vmul.f32 %v5961_v47, %v9188_v5  ;;  %5982 = vrcp.f32 %v3086_v26  ;;  %9211 = vst [vmem:[#allocation35_spill] sm:$0xff] %v8074_v0  ;;  %v8076_v23 = vpop.f32.mrb[124].mxu0 }
 0x2cc   : > { %v5965_v15 = vpop.eup %5964  ;;  %v4153_v35 = vmul.f32 %v5963_v59, %v7787_v16  ;;  %5984 = vrcp.f32 %v2888_v63  ;;  %9212 = vst [vmem:[#allocation8_spill] sm:$0xff] %v8076_v23  ;;  %v8079_v47 = vpop.f32.mrb[85].mxu1 }
 0x2cd   : > { %v5967_v37 = vpop.eup %5966  ;;  %v4283_v29 = vadd.f32 %v4282_v28, %v4026_v12  ;;  %v4035_v22 = vmul.f32 %v5965_v15, %v9190_v43  ;;  %5986 = vpow2.f32 %v5151_v52  ;;  %9213 = vst [vmem:[#allocation23_spill] sm:$0xff] %v8079_v47  ;;  %v8081_v16 = vpop.f32.mrb[125].mxu0 }
 0x2ce   : > { %v5969_v25 = vpop.eup %5968  ;;  %v4203_v5 = vadd.f32 %v4202_v58, %v4153_v35  ;;  %v4154_v26 = vmul.f32 %v5967_v37, %v7792_v8  ;;  %5988 = vpow2.f32 %v4953_v1  ;;  %9214 = vst [vmem:[#allocation36_spill] sm:$0xff] %v8081_v16  ;;  %v8083_v15 = vpop.f32.mrb[86].mxu1  ;;  %v9216_v8 = vld [vmem:[#allocation38_spill] sm:$0xff] }
 0x2cf   : > { %v5971_v63 = vpop.eup %5970  ;;  %v4253_v59 = vadd.f32 %v4252_v32, %v4035_v22  ;;  %v3095_v33 = vadd.f32 1.0, %v5969_v25  ;;  %5990 = vpow2.f32 %v5152_v34  ;;  %9215 = vst [vmem:[#allocation37_spill] sm:$0xff] %v8083_v15  ;;  %v5161_v1 = vmul.f32 -1.442695, %v9216_v8  ;;  %v9217_v22 = vld [vmem:[#allocation39_spill] sm:$0xff]  ;;  %v8093_v57 = vpop.f32.mrb[87].mxu1 }
 0x2d0   : > { %v5973_v28 = vpop.eup %5972  ;;  %v4516_v43 = vrot.slane %v4203_v5, 4  ;;  %v4234_v52 = vadd.f32 %v4233_v39, %v4154_v26  ;;  %v2897_v12 = vadd.f32 1.0, %v5971_v63  ;;  %5992 = vpow2.f32 %v4954_v24 }
 0x2d1   : > { %v5975_v23 = vpop.eup %5974  ;;  %5994 = vrcp.f32 %v3095_v33  ;;  %v3096_v58 = vadd.f32 1.0, %v5973_v28  ;;  %v4963_v39 = vmul.f32 -1.442695, %v9217_v22  ;;  %v8089_v33 = vpop.f32.mrb[126].mxu0 }
 0x2d2   : > { %v5977_v35 = vpop.eup %5976  ;;  %v4517_v37 = vadd.f32 %v4516_v43, %v4203_v5  ;;  %v4522_v47 = vrot.slane %v4234_v52, 4  ;;  %5996 = vrcp.f32 %v2897_v12  ;;  %v2898_v16 = vadd.f32 1.0, %v5975_v23  ;;  %9218 = vst [vmem:[#allocation38_spill] sm:$0xff] %v8089_v33  ;;  %v9219_v5 = vld [vmem:[#allocation40_spill] sm:$0xff]  ;;  %v8095_v33 = vpop.f32.mrb[127].mxu0 }
 0x2d3   : > { %v5979_v32 = vpop.eup %5978  ;;  %v4036_v25 = vmul.f32 %v5977_v35, %v9196_v18  ;;  %5998 = vrcp.f32 %v3096_v58  ;;  %v5162_v43 = vmul.f32 -1.442695, %v9219_v5  ;;  %9220 = vst [vmem:[#allocation39_spill] sm:$0xff] %v8095_v33 }
 0x2d4   : > { %v5981_v34 = vpop.eup %5980  ;;  %v4518_v24 = vrot.slane %v4517_v37, 2  ;;  %v4523_v26 = vadd.f32 %v4522_v47, %v4234_v52  ;;  %v4045_v63 = vmul.f32 %v5979_v32, %v9197_v36  ;;  %6000 = vrcp.f32 %v2898_v16 }
 0x2d5   : > { %v5983_v28 = vpop.eup %5982  ;;  %v4284_v15 = vadd.f32 %v4283_v29, %v4036_v25  ;;  %6002 = vpow2.f32 %v5161_v1 }
 0x2d6   : > { %v5985_v23 = vpop.eup %5984  ;;  %v4519_v12 = vadd.f32 %v4518_v24, %v4517_v37  ;;  %v4524_v0 = vrot.slane %v4523_v26, 2  ;;  %v4254_v18 = vadd.f32 %v4253_v59, %v4045_v63  ;;  %v4046_v58 = vmul.f32 %v5983_v28, %v9199_v4 }
 0x2d7   : > { %v5987_v35 = vpop.eup %5986  ;;  %6004 = vpow2.f32 %v4963_v39  ;;  %v4964_v37 = vmul.f32 -1.442695, %v7845_v20  ;;  %v5171_v59 = vmul.f32 -1.442695, %v7852_v10 }
 0x2d8   : > { %v5989_v47 = vpop.eup %5988  ;;  %v4520_v36 = vrot.slane %v4519_v12, 1  ;;  %v4525_v16 = vadd.f32 %v4524_v0, %v4523_v26  ;;  %v4285_v52 = vadd.f32 %v4284_v15, %v4046_v58  ;;  %v3105_v32 = vadd.f32 1.0, %v5987_v35 }
 0x2d9   : > { %v5991_v29 = vpop.eup %5990  ;;  %v2907_v1 = vadd.f32 1.0, %v5989_v47  ;;  %6006 = vpow2.f32 %v5162_v43  ;;  %v4973_v0 = vmul.f32 -1.442695, %v7855_v46  ;;  %v5172_v15 = vmul.f32 -1.442695, %v7857_v60 }
 0x2da   : > { %v5993_v25 = vpop.eup %5992  ;;  %v4521_v4 = vadd.f32 %v4520_v36, %v4519_v12  ;;  %v4526_v24 = vrot.slane %v4525_v16, 1  ;;  %6008 = vrcp.f32 %v3105_v32  ;;  %v3106_v39 = vadd.f32 1.0, %v5991_v29 }
 0x2db   : > { %v5995_v63 = vpop.eup %5994  ;;  %6010 = vrcp.f32 %v2907_v1  ;;  %v2908_v28 = vadd.f32 1.0, %v5993_v25  ;;  %v3847_v12 = vmul.f32 %v5981_v34, %v9198_v13  ;;  %v4974_v32 = vmul.f32 -1.442695, %v7861_v56 }
 0x2dc   : > { %v5997_v26 = vpop.eup %5996  ;;  %v8101_v58 = vmul.f32 0.00390625, %v4521_v4  ;;  %v4527_v43 = vadd.f32 %v4526_v24, %v4525_v16  ;;  %v4055_v35 = vmul.f32 %v5995_v63, %v9201_v44  ;;  %6012 = vrcp.f32 %v3106_v39  ;;  %v8110_v4 = vpop.f32.mrb[88].mxu1 }
 0x2dd   : > { %v5999_v47 = vpop.eup %5998  ;;  %v3857_v36 = vmul.f32 %v5997_v26, %v7814_v51  ;;  %6014 = vrcp.f32 %v2908_v28  ;;  %v8112_v16 = vpop.f32.mrb[128].mxu0  ;;  %v3848_v24 = vmul.f32 %v5985_v23, %v9200_v11  ;;  %v9221_v26 = vld [vmem:[#allocation11_spill] sm:$0xff] }
 0x2de   : > { %v6001_v29 = vpop.eup %6000  ;;  %v8107_v1 = vmul.f32 0.00390625, %v4527_v43  ;;  %v4255_v25 = vadd.f32 %v4254_v18, %v4055_v35  ;;  %v4056_v33 = vmul.f32 %v5999_v47, %v7816_v41  ;;  %6016 = vpow2.f32 %v4964_v37  ;;  %v8116_v34 = vpop.f32.mrb[89].mxu1  ;;  %v9224_v35 = vld [vmem:[#allocation41_spill] sm:$0xff] }
 0x2df   : > { %v6003_v44 = vpop.eup %6002  ;;  %v4297_v13 = vadd.f32 %v3857_v36, %v3847_v12  ;;  %v3858_v51 = vmul.f32 %v6001_v29, %v7819_v31  ;;  %6018 = vpow2.f32 %v5171_v59  ;;  %v8118_v39 = vpop.f32.mrb[129].mxu0  ;;  %v5181_v43 = vmul.f32 -1.442695, %v9221_v26 }
 0x2e0   : > { %v4286_v41 = vadd.f32 %v4285_v52, %v4056_v33  ;;  %v3115_v37 = vadd.f32 1.0, %v6003_v44  ;;  %6020 = vpow2.f32 %v4973_v0  ;;  %v8123_v11 = vpop.f32.mrb[90].mxu1  ;;  %v8125_v23 = vpop.f32.mrb[130].mxu0  ;;  %v4983_v47 = vmul.f32 -1.442695, %v9224_v35  ;;  %v9225_v52 = vld [vmem:[#allocation42_spill] sm:$0xff] }
 0x2e1   : > { %v6005_v63 = vpop.eup %6004  ;;  %v4328_v28 = vadd.f32 %v3858_v51, %v3848_v24  ;;  %6022 = vpow2.f32 %v5172_v15  ;;  %9222 = vst [vmem:[#allocation40_spill] sm:$0xff] %v8123_v11  ;;  %9223 = vst [vmem:[#allocation11_spill] sm:$0xff] %v8125_v23  ;;  %v5182_v0 = vmul.f32 -1.442695, %v9225_v52  ;;  %v4984_v29 = vmul.f32 -1.442695, %v7873_v7 }
 0x2e2   : > { %6024 = vrcp.f32 %v3115_v37  ;;  %v2917_v31 = vadd.f32 1.0, %v6005_v63  ;;  %v8131_v44 = vpop.f32.mrb[91].mxu1 }
 0x2e3   : > { %v6007_v59 = vpop.eup %6006  ;;  %6026 = vpow2.f32 %v4974_v32  ;;  %9226 = vst [vmem:[#allocation41_spill] sm:$0xff] %v8131_v44  ;;  %v5191_v32 = vmul.f32 -1.442695, %v7880_v62 }
 0x2e4   : > { %v6009_v12 = vpop.eup %6008  ;;  %6028 = vrcp.f32 %v2917_v31  ;;  %v3116_v33 = vadd.f32 1.0, %v6007_v59  ;;  %v8136_v59 = vpop.f32.mrb[131].mxu0 }
 0x2e5   : > { %v6011_v36 = vpop.eup %6010  ;;  %v4065_v15 = vmul.f32 %v6009_v12, %v9207_v3  ;;  %6030 = vpow2.f32 %v5181_v43 }
 0x2e6   : > { %v6013_v24 = vpop.eup %6012  ;;  %v3867_v51 = vmul.f32 %v6011_v36, %v9208_v9  ;;  %6032 = vrcp.f32 %v3116_v33 }
 0x2e7   : > { %v6015_v37 = vpop.eup %6014  ;;  %v4256_v63 = vadd.f32 %v4255_v25, %v4065_v15  ;;  %v4066_v31 = vmul.f32 %v6013_v24, %v9209_v17  ;;  %6034 = vpow2.f32 %v4983_v47  ;;  %v4993_v17 = vmul.f32 -1.442695, %v7883_v40 }
 0x2e8   : > { %v6017_v18 = vpop.eup %6016  ;;  %v4298_v3 = vadd.f32 %v4297_v13, %v3867_v51  ;;  %v3868_v43 = vmul.f32 %v6015_v37, %v9210_v48  ;;  %6036 = vpow2.f32 %v5182_v0  ;;  %v8144_v0 = vpop.f32.mrb[132].mxu0 }
 0x2e9   : > { %v6019_v12 = vpop.eup %6018  ;;  %v4287_v44 = vadd.f32 %v4286_v41, %v4066_v31  ;;  %v2918_v23 = vadd.f32 1.0, %v6017_v18  ;;  %6038 = vpow2.f32 %v4984_v29  ;;  %v5192_v41 = vmul.f32 -1.442695, %v7885_v14  ;;  %v8142_v18 = vpop.f32.mrb[92].mxu1 }
 0x2ea   : > { %v6021_v9 = vpop.eup %6020  ;;  %v4329_v33 = vadd.f32 %v4328_v28, %v3868_v43  ;;  %v3125_v36 = vadd.f32 1.0, %v6019_v12  ;;  %6040 = vpow2.f32 %v5191_v32  ;;  %v8148_v32 = vpop.f32.mrb[93].mxu1 }
 0x2eb   : > { %v6023_v11 = vpop.eup %6022  ;;  %6042 = vrcp.f32 %v2918_v23  ;;  %v2927_v25 = vadd.f32 1.0, %v6021_v9  ;;  %v8150_v31 = vpop.f32.mrb[133].mxu0 }
 0x2ec   : > { %v6025_v47 = vpop.eup %6024  ;;  %6044 = vrcp.f32 %v3125_v36  ;;  %v3126_v15 = vadd.f32 1.0, %v6023_v11  ;;  %v4994_v11 = vmul.f32 -1.442695, %v7888_v21 }
 0x2ed   : > { %v6027_v13 = vpop.eup %6026  ;;  %v4075_v48 = vmul.f32 %v6025_v47, %v9216_v8  ;;  %6046 = vrcp.f32 %v2927_v25  ;;  %v8153_v47 = vpop.f32.mrb[94].mxu1 }
 0x2ee   : > { %v6029_v28 = vpop.eup %6028  ;;  %6048 = vrcp.f32 %v3126_v15  ;;  %v2928_v29 = vadd.f32 1.0, %v6027_v13  ;;  %v8155_v15 = vpop.f32.mrb[134].mxu0 }
 0x2ef   : > { %v6031_v23 = vpop.eup %6030  ;;  %v4257_v24 = vadd.f32 %v4256_v63, %v4075_v48  ;;  %v3877_v51 = vmul.f32 %v6029_v28, %v9217_v22  ;;  %6050 = vpow2.f32 %v4993_v17  ;;  %9227 = vst [vmem:[#allocation42_spill] sm:$0xff] %v8155_v15  ;;  %v9228_v28 = vld [vmem:[#allocation10_spill] sm:$0xff] }
 0x2f0   : > { %v6033_v8 = vpop.eup %6032  ;;  %6052 = vrcp.f32 %v2928_v29  ;;  %v3135_v37 = vadd.f32 1.0, %v6031_v23  ;;  %v5201_v29 = vmul.f32 -1.442695, %v9228_v28 }
 0x2f1   : > { %v6035_v43 = vpop.eup %6034  ;;  %v4299_v12 = vadd.f32 %v4298_v3, %v3877_v51  ;;  %v4076_v9 = vmul.f32 %v6033_v8, %v9219_v5  ;;  %6054 = vpow2.f32 %v5192_v41  ;;  %v9229_v41 = vld [vmem:[#allocation43_spill] sm:$0xff] }
 0x2f2   : > { %v6037_v36 = vpop.eup %6036  ;;  %6056 = vrcp.f32 %v3135_v37  ;;  %v2937_v63 = vadd.f32 1.0, %v6035_v43  ;;  %v5003_v23 = vmul.f32 -1.442695, %v9229_v41  ;;  %v5004_v43 = vmul.f32 -1.442695, %v7902_v38 }
 0x2f3   : > { %v6039_v25 = vpop.eup %6038  ;;  %v4288_v22 = vadd.f32 %v4287_v44, %v4076_v9  ;;  %v3136_v17 = vadd.f32 1.0, %v6037_v36  ;;  %6058 = vpow2.f32 %v4994_v11  ;;  %v5202_v44 = vmul.f32 -1.442695, %v7900_v54 }
 0x2f4   : > { %v6041_v13 = vpop.eup %6040  ;;  %6060 = vrcp.f32 %v2937_v63  ;;  %v2938_v48 = vadd.f32 1.0, %v6039_v25  ;;  %v8164_v25 = vpop.f32.mrb[95].mxu1 }
 0x2f5   : > { %v6043_v3 = vpop.eup %6042  ;;  %6062 = vrcp.f32 %v3136_v17  ;;  %v3145_v5 = vadd.f32 1.0, %v6041_v13  ;;  %v8166_v17 = vpop.f32.mrb[135].mxu0 }
 0x2f6   : > { %v6045_v51 = vpop.eup %6044  ;;  %v3878_v8 = vmul.f32 %v6043_v3, %v7845_v20  ;;  %6064 = vrcp.f32 %v2938_v48  ;;  %v5211_v3 = vmul.f32 -1.442695, %v7911_v19 }
 0x2f7   : > { %v6047_v11 = vpop.eup %6046  ;;  %v4085_v37 = vmul.f32 %v6045_v51, %v7852_v10  ;;  %6066 = vrcp.f32 %v3145_v5 }
 0x2f8   : > { %v6049_v9 = vpop.eup %6048  ;;  %v4330_v36 = vadd.f32 %v4329_v33, %v3878_v8  ;;  %v3887_v63 = vmul.f32 %v6047_v11, %v7855_v46  ;;  %6068 = vpow2.f32 %v5201_v29  ;;  %v5013_v29 = vmul.f32 -1.442695, %v7913_v45 }
 0x2f9   : > { %v6051_v13 = vpop.eup %6050  ;;  %v4258_v20 = vadd.f32 %v4257_v24, %v4085_v37  ;;  %v4086_v48 = vmul.f32 %v6049_v9, %v7857_v60  ;;  %6070 = vpow2.f32 %v5003_v23  ;;  %v5212_v23 = vmul.f32 -1.442695, %v7917_v42  ;;  %v8175_v9 = vpop.f32.mrb[96].mxu1 }
 0x2fa   : > { %v6053_v10 = vpop.eup %6052  ;;  %v4300_v5 = vadd.f32 %v4299_v12, %v3887_v63  ;;  %v2947_v51 = vadd.f32 1.0, %v6051_v13  ;;  %6072 = vpow2.f32 %v5202_v44 }
 0x2fb   : > { %v6055_v15 = vpop.eup %6054  ;;  %v4289_v33 = vadd.f32 %v4288_v22, %v4086_v48  ;;  %v3888_v46 = vmul.f32 %v6053_v10, %v7861_v56  ;;  %6074 = vpow2.f32 %v5004_v43  ;;  %v5014_v22 = vmul.f32 -1.442695, %v7919_v27  ;;  %v8177_v56 = vpop.f32.mrb[136].mxu0  ;;  %v9232_v10 = vld [vmem:[#allocation12_spill] sm:$0xff] }
 0x2fc   : > { %v6057_v8 = vpop.eup %6056  ;;  %6076 = vrcp.f32 %v2947_v51  ;;  %v3146_v11 = vadd.f32 1.0, %v6055_v15  ;;  %v8183_v13 = vpop.f32.mrb[137].mxu0  ;;  %v5023_v51 = vmul.f32 -1.442695, %v9232_v10 }
 0x2fd   : > { %v6059_v24 = vpop.eup %6058  ;;  %v4331_v37 = vadd.f32 %v4330_v36, %v3888_v46  ;;  %v4095_v60 = vmul.f32 %v6057_v8, %v9221_v26  ;;  %6078 = vpow2.f32 %v5211_v3  ;;  %v5221_v36 = vmul.f32 -1.442695, %v7925_v61  ;;  %v8181_v26 = vpop.f32.mrb[97].mxu1  ;;  %9231 = vst [vmem:[#allocation43_spill] sm:$0xff] %v8183_v13 }
 0x2fe   : > { %v6061_v12 = vpop.eup %6060  ;;  %6080 = vrcp.f32 %v3146_v11  ;;  %v2948_v44 = vadd.f32 1.0, %v6059_v24  ;;  %9230 = vst [vmem:[#allocation10_spill] sm:$0xff] %v8181_v26  ;;  %v8189_v24 = vpop.f32.mrb[98].mxu1 }
 0x2ff   : > { %v6063_v43 = vpop.eup %6062  ;;  %v4259_v63 = vadd.f32 %v4258_v20, %v4095_v60  ;;  %v3897_v15 = vmul.f32 %v6061_v12, %v9224_v35  ;;  %6082 = vpow2.f32 %v5013_v29  ;;  %v8191_v60 = vpop.f32.mrb[138].mxu0 }
 0x300   : > { %v6065_v48 = vpop.eup %6064  ;;  %v4096_v3 = vmul.f32 %v6063_v43, %v9225_v52  ;;  %6084 = vrcp.f32 %v2948_v44 }
 0x301   : > { %v6067_v46 = vpop.eup %6066  ;;  %v4301_v8 = vadd.f32 %v4300_v5, %v3897_v15  ;;  %v3898_v11 = vmul.f32 %v6065_v48, %v7873_v7  ;;  %6086 = vpow2.f32 %v5212_v23  ;;  %v8193_v5 = vpop.f32.mrb[99].mxu1  ;;  %v9234_v23 = vld [vmem:[#allocation44_spill] sm:$0xff] }
 0x302   : > { %v6069_v20 = vpop.eup %6068  ;;  %v4290_v35 = vadd.f32 %v4289_v33, %v4096_v3  ;;  %v4105_v29 = vmul.f32 %v6067_v46, %v7880_v62  ;;  %6088 = vpow2.f32 %v5014_v22  ;;  %9233 = vst [vmem:[#allocation12_spill] sm:$0xff] %v8193_v5  ;;  %v5222_v62 = vmul.f32 -1.442695, %v9234_v23 }
 0x303   : > { %v6071_v12 = vpop.eup %6070  ;;  %v4332_v13 = vadd.f32 %v4331_v37, %v3898_v11  ;;  %v3155_v52 = vadd.f32 1.0, %v6069_v20  ;;  %6090 = vpow2.f32 %v5221_v36  ;;  %v9235_v37 = vld [vmem:[#allocation24_spill] sm:$0xff] }
 0x304   : > { %v6073_v44 = vpop.eup %6072  ;;  %v4260_v43 = vadd.f32 %v4259_v63, %v4105_v29  ;;  %v2957_v26 = vadd.f32 1.0, %v6071_v12  ;;  %6092 = vpow2.f32 %v5023_v51  ;;  %v5024_v36 = vmul.f32 -1.442695, %v9235_v37  ;;  %v8198_v51 = vpop.f32.mrb[139].mxu0 }
 0x305   : > { %v6075_v7 = vpop.eup %6074  ;;  %6094 = vrcp.f32 %v3155_v52  ;;  %v3156_v33 = vadd.f32 1.0, %v6073_v44  ;;  %9236 = vst [vmem:[#allocation44_spill] sm:$0xff] %v8198_v51  ;;  %v5231_v12 = vmul.f32 -1.442695, %v7945_v55 }
 0x306   : > { %v6077_v22 = vpop.eup %6076  ;;  %6096 = vrcp.f32 %v2957_v26  ;;  %v2958_v15 = vadd.f32 1.0, %v6075_v7 }
 0x307   : > { %v6079_v48 = vpop.eup %6078  ;;  %v3907_v3 = vmul.f32 %v6077_v22, %v7883_v40  ;;  %6098 = vrcp.f32 %v3156_v33 }
 0x308   : > { %v6081_v46 = vpop.eup %6080  ;;  %6100 = vrcp.f32 %v2958_v15  ;;  %v3165_v63 = vadd.f32 1.0, %v6079_v48 }
 0x309   : > { %v6083_v11 = vpop.eup %6082  ;;  %v4302_v20 = vadd.f32 %v4301_v8, %v3907_v3  ;;  %v4106_v29 = vmul.f32 %v6081_v46, %v7885_v14  ;;  %6102 = vpow2.f32 %v5222_v62  ;;  %v5033_v62 = vmul.f32 -1.442695, %v7947_v6 }
 0x30a   : > { %v6085_v26 = vpop.eup %6084  ;;  %6104 = vrcp.f32 %v3165_v63  ;;  %v2967_v52 = vadd.f32 1.0, %v6083_v11  ;;  %v9237_v63 = vld [vmem:[#allocation13_spill] sm:$0xff]  ;;  %v8205_v11 = vpop.f32.mrb[100].mxu1 }
 0x30b   : > { %v6087_v44 = vpop.eup %6086  ;;  %v4291_v40 = vadd.f32 %v4290_v35, %v4106_v29  ;;  %v3908_v7 = vmul.f32 %v6085_v26, %v7888_v21  ;;  %6106 = vpow2.f32 %v5024_v36  ;;  %v5232_v35 = vmul.f32 -1.442695, %v9237_v63  ;;  %9238 = vst [vmem:[#allocation24_spill] sm:$0xff] %v8205_v11  ;;  %v8207_v21 = vpop.f32.mrb[140].mxu0 }
 0x30c   : > { %v6089_v33 = vpop.eup %6088  ;;  %6108 = vrcp.f32 %v2967_v52  ;;  %v3166_v22 = vadd.f32 1.0, %v6087_v44  ;;  %9239 = vst [vmem:[#allocation13_spill] sm:$0xff] %v8207_v21  ;;  %v8211_v26 = vpop.f32.mrb[101].mxu1 }
 0x30d   : > { %v6091_v15 = vpop.eup %6090  ;;  %v4333_v48 = vadd.f32 %v4332_v13, %v3908_v7  ;;  %v2968_v51 = vadd.f32 1.0, %v6089_v33  ;;  %6110 = vpow2.f32 %v5231_v12  ;;  %v9240_v13 = vld [vmem:[#allocation25_spill] sm:$0xff]  ;;  %v8215_v33 = vpop.f32.mrb[141].mxu0 }
 0x30e   : > { %v6093_v8 = vpop.eup %6092  ;;  %6112 = vrcp.f32 %v3166_v22  ;;  %v3175_v14 = vadd.f32 1.0, %v6091_v15  ;;  %v5034_v12 = vmul.f32 -1.442695, %v9240_v13  ;;  %9241 = vst [vmem:[#allocation25_spill] sm:$0xff] %v8211_v26  ;;  %v8220_v11 = vpop.f32.mrb[102].mxu1 }
 0x30f   : > { %v6095_v3 = vpop.eup %6094  ;;  %6114 = vrcp.f32 %v2968_v51  ;;  %v2977_v46 = vadd.f32 1.0, %v6093_v8  ;;  %v9242_v51 = vld [vmem:[#allocation14_spill] sm:$0xff] }
 0x310   : > { %v6097_v36 = vpop.eup %6096  ;;  %v4115_v29 = vmul.f32 %v6095_v3, %v9228_v28  ;;  %6116 = vrcp.f32 %v3175_v14  ;;  %v5241_v7 = vmul.f32 -1.442695, %v9242_v51  ;;  %9243 = vst [vmem:[#allocation14_spill] sm:$0xff] %v8215_v33  ;;  %v9244_v3 = vld [vmem:[#allocation45_spill] sm:$0xff] }
 0x311   : > { %v6099_v52 = vpop.eup %6098  ;;  %v3917_v44 = vmul.f32 %v6097_v36, %v9229_v41  ;;  %6118 = vrcp.f32 %v2977_v46  ;;  %v5043_v26 = vmul.f32 -1.442695, %v9244_v3  ;;  %9245 = vst [vmem:[#allocation45_spill] sm:$0xff] %v8220_v11  ;;  %v8222_v41 = vpop.f32.mrb[142].mxu0 }
 0x312   : > { %v6101_v22 = vpop.eup %6100  ;;  %v4261_v15 = vadd.f32 %v4260_v43, %v4115_v29  ;;  %v4116_v8 = vmul.f32 %v6099_v52, %v7900_v54  ;;  %6120 = vpow2.f32 %v5033_v62  ;;  %9246 = vst [vmem:[#allocation47_spill] sm:$0xff] %v8222_v41  ;;  %v9247_v62 = vld [vmem:[#allocation27_spill] sm:$0xff]  ;;  %v8226_v29 = vpop.f32.mrb[103].mxu1 }
 0x313   : > { %v6103_v21 = vpop.eup %6102  ;;  %v4303_v28 = vadd.f32 %v4302_v20, %v3917_v44  ;;  %v3918_v14 = vmul.f32 %v6101_v22, %v7902_v38  ;;  %6122 = vpow2.f32 %v5232_v35  ;;  %v5242_v20 = vmul.f32 -1.442695, %v9247_v62  ;;  %9248 = vst [vmem:[#allocation27_spill] sm:$0xff] %v8226_v29  ;;  %v8228_v52 = vpop.f32.mrb[143].mxu0 }
 0x314   : > { %v6105_v46 = vpop.eup %6104  ;;  %v4292_v36 = vadd.f32 %v4291_v40, %v4116_v8  ;;  %v3176_v5 = vadd.f32 1.0, %v6103_v21  ;;  %6124 = vpow2.f32 %v5034_v12  ;;  %9249 = vst [vmem:[#allocation48_spill] sm:$0xff] %v8228_v52  ;;  %v9250_v21 = vld [vmem:[#allocation26_spill] sm:$0xff] }
 0x315   : > { %v6107_v33 = vpop.eup %6106  ;;  %v4334_v43 = vadd.f32 %v4333_v48, %v3918_v14  ;;  %v4125_v54 = vmul.f32 %v6105_v46, %v7911_v19  ;;  %6126 = vpow2.f32 %v5241_v7  ;;  %v5044_v12 = vmul.f32 -1.442695, %v9250_v21  ;;  %v9251_v7 = vld [vmem:[#allocation7_spill] sm:$0xff] }
 0x316   : > { %v6109_v38 = vpop.eup %6108  ;;  %6128 = vrcp.f32 %v3176_v5  ;;  %v2978_v35 = vadd.f32 1.0, %v6107_v33  ;;  %v5053_v8 = vmul.f32 -1.442695, %v9251_v7  ;;  %v9252_v5 = vld [vmem:[#allocation15_spill] sm:$0xff] }
 0x317   : > { %v6111_v44 = vpop.eup %6110  ;;  %v4262_v22 = vadd.f32 %v4261_v15, %v4125_v54  ;;  %v3927_v40 = vmul.f32 %v6109_v38, %v7913_v45  ;;  %6130 = vpow2.f32 %v5043_v26  ;;  %v4935_v33 = vmul.f32 -1.442695, %v9252_v5  ;;  %v9253_v45 = vld [vmem:[#allocation29_spill] sm:$0xff] }
 0x318   : > { %v6113_v48 = vpop.eup %6112  ;;  %6132 = vrcp.f32 %v2978_v35  ;;  %v3185_v19 = vadd.f32 1.0, %v6111_v44  ;;  %v5054_v26 = vmul.f32 -1.442695, %v9253_v45 }
 0x319   : > { %v6115_v14 = vpop.eup %6114  ;;  %v4304_v46 = vadd.f32 %v4303_v28, %v3927_v40  ;;  %v4126_v29 = vmul.f32 %v6113_v48, %v7917_v42  ;;  %6134 = vpow2.f32 %v5242_v20  ;;  %v8239_v48 = vpop.f32.mrb[104].mxu1 }
 0x31a   : > { %v6117_v52 = vpop.eup %6116  ;;  %v3928_v15 = vmul.f32 %v6115_v14, %v7919_v27  ;;  %6136 = vrcp.f32 %v3185_v19  ;;  %9254 = vst [vmem:[#allocation26_spill] sm:$0xff] %v8239_v48  ;;  %v8241_v27 = vpop.f32.mrb[144].mxu0 }
 0x31b   : > { %v6119_v54 = vpop.eup %6118  ;;  %v4293_v38 = vadd.f32 %v4292_v36, %v4126_v29  ;;  %v4135_v35 = vmul.f32 %v6117_v52, %v7925_v61  ;;  %6138 = vpow2.f32 %v5044_v12  ;;  %9255 = vst [vmem:[#allocation7_spill] sm:$0xff] %v8241_v27  ;;  %v8243_v36 = vpop.f32.mrb[105].mxu1  ;;  %v9258_v29 = vld [vmem:[#allocation28_spill] sm:$0xff] }
 0x31c   : > { %v6121_v44 = vpop.eup %6120  ;;  %v4335_v41 = vadd.f32 %v4334_v43, %v3928_v15  ;;  %v3937_v28 = vmul.f32 %v6119_v54, %v9232_v10  ;;  %6140 = vpow2.f32 %v5053_v8  ;;  %9256 = vst [vmem:[#allocation15_spill] sm:$0xff] %v8243_v36  ;;  %v8245_v61 = vpop.f32.mrb[145].mxu0  ;;  %v4936_v52 = vmul.f32 -1.442695, %v9258_v29  ;;  %v9259_v15 = vld [vmem:[#allocation31_spill] sm:$0xff] }
 0x31d   : > { %v6123_v42 = vpop.eup %6122  ;;  %v4263_v20 = vadd.f32 %v4262_v22, %v4135_v35  ;;  %v2987_v40 = vadd.f32 1.0, %v6121_v44  ;;  %6142 = vpow2.f32 %v4935_v33  ;;  %9257 = vst [vmem:[#allocation29_spill] sm:$0xff] %v8245_v61  ;;  %v8254_v61 = vpop.f32.mrb[146].mxu0 }
 0x31e   : > { %v6125_v19 = vpop.eup %6124  ;;  %v4305_v14 = vadd.f32 %v4304_v46, %v3937_v28  ;;  %v3186_v11 = vadd.f32 1.0, %v6123_v42  ;;  %6144 = vpow2.f32 %v5054_v26  ;;  %v5063_v46 = vmul.f32 -1.442695, %v9259_v15  ;;  %v9260_v42 = vld [vmem:[#allocation30_spill] sm:$0xff]  ;;  %9262 = vst [vmem:[#allocation31_spill] sm:$0xff] %v8254_v61 }
 0x31f   : > { %v6127_v43 = vpop.eup %6126  ;;  %6146 = vrcp.f32 %v2987_v40  ;;  %v2988_v10 = vadd.f32 1.0, %v6125_v19  ;;  %v4945_v40 = vmul.f32 -1.442695, %v9260_v42  ;;  %v8252_v19 = vpop.f32.mrb[106].mxu1 }
 0x320   : > { %v6129_v22 = vpop.eup %6128  ;;  %6148 = vrcp.f32 %v3186_v11  ;;  %v3195_v12 = vadd.f32 1.0, %v6127_v43  ;;  %9261 = vst [vmem:[#allocation28_spill] sm:$0xff] %v8252_v19 }
 0x321   : > { %v6131_v8 = vpop.eup %6130  ;;  %v4136_v33 = vmul.f32 %v6129_v22, %v9234_v23  ;;  %6150 = vrcp.f32 %v2988_v10 }
 0x322   : > { %v6133_v54 = vpop.eup %6132  ;;  %6152 = vrcp.f32 %v3195_v12  ;;  %v2997_v26 = vadd.f32 1.0, %v6131_v8 }
 0x323   : > { %v6135_v35 = vpop.eup %6134  ;;  %v4294_v44 = vadd.f32 %v4293_v38, %v4136_v33  ;;  %v3938_v28 = vmul.f32 %v6133_v54, %v9235_v37  ;;  %6154 = vpow2.f32 %v4936_v52  ;;  %v8257_v33 = vpop.f32.mrb[107].mxu1 }
 0x324   : > { %v6137_v11 = vpop.eup %6136  ;;  %6156 = vrcp.f32 %v2997_v26  ;;  %v3196_v43 = vadd.f32 1.0, %v6135_v35  ;;  %9263 = vst [vmem:[#allocation30_spill] sm:$0xff] %v8257_v33  ;;  %v8259_v54 = vpop.f32.mrb[147].mxu0  ;;  %v9265_v35 = vld [vmem:[#allocation33_spill] sm:$0xff] }
 0x325   : > { %v6139_v23 = vpop.eup %6138  ;;  %v4336_v10 = vadd.f32 %v4335_v41, %v3938_v28  ;;  %v4145_v22 = vmul.f32 %v6137_v11, %v7945_v55  ;;  %6158 = vpow2.f32 %v5063_v46  ;;  %9264 = vst [vmem:[#allocation49_spill] sm:$0xff] %v8259_v54  ;;  %v5064_v61 = vmul.f32 -1.442695, %v9265_v35  ;;  %v9266_v55 = vld [vmem:[#allocation32_spill] sm:$0xff] }
 0x326   : > { %v6141_v12 = vpop.eup %6140  ;;  %6160 = vrcp.f32 %v3196_v43  ;;  %v2998_v38 = vadd.f32 1.0, %v6139_v23  ;;  %v4946_v46 = vmul.f32 -1.442695, %v9266_v55  ;;  %v4955_v23 = vmul.f32 -1.442695, %v8012_v2 }
 0x327   : > { %v6143_v8 = vpop.eup %6142  ;;  %v4264_v37 = vadd.f32 %v4263_v20, %v4145_v22  ;;  %v3007_v52 = vadd.f32 1.0, %v6141_v12  ;;  %6162 = vpow2.f32 %v4945_v40  ;;  %v5073_v20 = vmul.f32 -1.442695, %v8010_v49 }
 0x328   : > { %v6145_v26 = vpop.eup %6144  ;;  %6164 = vrcp.f32 %v2998_v38  ;;  %v2889_v54 = vadd.f32 1.0, %v6143_v8 }
 0x329   : > { %v6147_v19 = vpop.eup %6146  ;;  %6166 = vrcp.f32 %v3007_v52  ;;  %v3008_v41 = vadd.f32 1.0, %v6145_v26 }
 0x32a   : > { %v6149_v28 = vpop.eup %6148  ;;  %v3947_v11 = vmul.f32 %v6147_v19, %v7947_v6  ;;  %v9267_v6 = vld [vmem:[#allocation6_spill] sm:$0xff] }
 0x32b   : > { %v6151_v43 = vpop.eup %6150  ;;  %v4146_v40 = vmul.f32 %v6149_v28, %v9237_v63  ;;  %6168 = vrcp.f32 %v3008_v41  ;;  %v5074_v19 = vmul.f32 -1.442695, %v9267_v6 }
 0x32c   : > { %v6153_v22 = vpop.eup %6152  ;;  %v4306_v12 = vadd.f32 %v4305_v14, %v3947_v11  ;;  %v3948_v38 = vmul.f32 %v6151_v43, %v9240_v13  ;;  %6170 = vpow2.f32 %v5064_v61  ;;  %v9268_v14 = vld [vmem:[#allocation16_spill] sm:$0xff] }
 0x32d   : > { %v6155_v52 = vpop.eup %6154  ;;  %v4295_v26 = vadd.f32 %v4294_v44, %v4146_v40  ;;  %v4155_v33 = vmul.f32 %v6153_v22, %v9242_v51  ;;  %6172 = vpow2.f32 %v4946_v46  ;;  %v4956_v11 = vmul.f32 -1.442695, %v9268_v14  ;;  %v8272_v44 = vpop.f32.mrb[108].mxu1 }
 0x32e   : > { %v6157_v36 = vpop.eup %6156  ;;  %v4337_v27 = vadd.f32 %v4336_v10, %v3948_v38  ;;  %6174 = vpow2.f32 %v5073_v20  ;;  %v2890_v61 = vadd.f32 1.0, %v6155_v52  ;;  %9269 = vst [vmem:[#allocation33_spill] sm:$0xff] %v8272_v44  ;;  %v8274_v51 = vpop.f32.mrb[148].mxu0 }
 0x32f   : > { %v6159_v63 = vpop.eup %6158  ;;  %v4265_v41 = vadd.f32 %v4264_v37, %v4155_v33  ;;  %v3957_v28 = vmul.f32 %v6157_v36, %v9244_v3  ;;  %6176 = vpow2.f32 %v4955_v23  ;;  %9270 = vst [vmem:[#allocation32_spill] sm:$0xff] %v8274_v51  ;;  %v8277_v37 = vpop.f32.mrb[109].mxu1  ;;  %v9274_v23 = vld [vmem:[#allocation18_spill] sm:$0xff] }
 0x330   : > { %v6161_v13 = vpop.eup %6160  ;;  %6178 = vrcp.f32 %v2889_v54  ;;  %v3017_v8 = vadd.f32 1.0, %v6159_v63  ;;  %9271 = vst [vmem:[#allocation6_spill] sm:$0xff] %v8277_v37  ;;  %v8279_v3 = vpop.f32.mrb[149].mxu0  ;;  %v9273_v54 = vld [vmem:[#allocation17_spill] sm:$0xff]  ;;  %v4965_v22 = vmul.f32 -1.442695, %v9274_v23 }
 0x331   : > { %v6163_v46 = vpop.eup %6162  ;;  %v4528_v43 = vrot.slane %v4265_v41, 4  ;;  %v4307_v40 = vadd.f32 %v4306_v12, %v3957_v28  ;;  %v4156_v10 = vmul.f32 %v6161_v13, %v9247_v62  ;;  %6180 = vpow2.f32 %v5074_v19  ;;  %9272 = vst [vmem:[#allocation16_spill] sm:$0xff] %v8279_v3  ;;  %v8283_v38 = vpop.f32.mrb[110].mxu1  ;;  %v9277_v28 = vld [vmem:[#allocation19_spill] sm:$0xff] }
 0x332   : > { %v6165_v36 = vpop.eup %6164  ;;  %6182 = vrcp.f32 %v3017_v8  ;;  %v2899_v33 = vadd.f32 1.0, %v6163_v46  ;;  %v5083_v20 = vmul.f32 -1.442695, %v9273_v54  ;;  %9275 = vst [vmem:[#allocation17_spill] sm:$0xff] %v8283_v38  ;;  %v8286_v62 = vpop.f32.mrb[150].mxu0 }
 0x333   : > { %v6167_v52 = vpop.eup %6166  ;;  %v4529_v63 = vadd.f32 %v4528_v43, %v4265_v41  ;;  %v4296_v51 = vadd.f32 %v4295_v26, %v4156_v10  ;;  %v3958_v12 = vmul.f32 %v6165_v36, %v9250_v21  ;;  %6184 = vpow2.f32 %v4956_v11  ;;  %9276 = vst [vmem:[#allocation18_spill] sm:$0xff] %v8286_v62  ;;  %v8291_v26 = vpop.f32.mrb[111].mxu1 }
 0x334   : > { %v3967_v19 = vmul.f32 %v6167_v52, %v9251_v7  ;;  %6186 = vrcp.f32 %v2899_v33  ;;  %v5084_v13 = vmul.f32 -1.442695, %v9277_v28  ;;  %9278 = vst [vmem:[#allocation19_spill] sm:$0xff] %v8291_v26  ;;  %v8293_v21 = vpop.f32.mrb[151].mxu0 }
 0x335   : > { %v6169_v8 = vpop.eup %6168  ;;  %v4530_v46 = vrot.slane %v4529_v63, 2  ;;  %v4534_v3 = vrot.slane %v4296_v51, 4  ;;  %v4338_v37 = vadd.f32 %v4337_v27, %v3958_v12  ;;  %6188 = vrcp.f32 %v2890_v61  ;;  %9279 = vst [vmem:[#allocation50_spill] sm:$0xff] %v8293_v21  ;;  %v9280_v27 = vld [vmem:[#allocation46_spill] sm:$0xff]  ;;  %v9284_v21 = vld [vmem:[#allocation20_spill] sm:$0xff] }
 0x336   : > { %v6171_v44 = vpop.eup %6170  ;;  %v4308_v38 = vadd.f32 %v4307_v40, %v3967_v19  ;;  %v3968_v41 = vmul.f32 %v6169_v8, %v9253_v45  ;;  %6190 = vpow2.f32 %v5083_v20  ;;  %v4966_v61 = vmul.f32 -1.442695, %v9280_v27 }
 0x337   : > { %v6173_v11 = vpop.eup %6172  ;;  %v4531_v43 = vadd.f32 %v4530_v46, %v4529_v63  ;;  %v4535_v7 = vadd.f32 %v4534_v3, %v4296_v51  ;;  %v3018_v10 = vadd.f32 1.0, %v6171_v44  ;;  %6192 = vpow2.f32 %v4965_v22 }
 0x338   : > { %v6175_v36 = vpop.eup %6174  ;;  %v8295_v33 = vadd.f32 %v4338_v37, %v3968_v41  ;;  %v2900_v52 = vadd.f32 1.0, %v6173_v11  ;;  %6194 = vpow2.f32 %v5084_v13  ;;  %v5093_v63 = vmul.f32 -1.442695, %v8043_v53  ;;  %v8301_v41 = vpop.f32.mrb[152].mxu0 }
 0x339   : > { %v6177_v40 = vpop.eup %6176  ;;  %v4532_v12 = vrot.slane %v4531_v43, 1  ;;  %v4536_v45 = vrot.slane %v4535_v7, 2  ;;  %6196 = vrcp.f32 %v3018_v10  ;;  %v3027_v20 = vadd.f32 1.0, %v6175_v36  ;;  %9281 = vst [vmem:[#allocation46_spill] sm:$0xff] %v8301_v41  ;;  %v8303_v11 = vpop.f32.mrb[112].mxu1 }
 0x33a   : > { %v6179_v19 = vpop.eup %6178  ;;  %6198 = vrcp.f32 %v2900_v52  ;;  %v2909_v8 = vadd.f32 1.0, %v6177_v40  ;;  %v4975_v37 = vmul.f32 -1.442695, %v8045_v30  ;;  %v5094_v46 = vmul.f32 -1.442695, %v8048_v50  ;;  %9282 = vst [vmem:[#allocation51_spill] sm:$0xff] %v8303_v11 }
 0x33b   : > { %v6181_v51 = vpop.eup %6180  ;;  %v4533_v44 = vadd.f32 %v4532_v12, %v4531_v43  ;;  %v4537_v3 = vadd.f32 %v4536_v45, %v4535_v7  ;;  %6200 = vrcp.f32 %v3027_v20  ;;  %v3849_v7 = vmul.f32 %v6179_v19, %v9252_v5  ;;  %v8310_v41 = vpop.f32.mrb[153].mxu0 }
 0x33c   : > { %v6183_v22 = vpop.eup %6182  ;;  %6202 = vrcp.f32 %v2909_v8  ;;  %v3028_v13 = vadd.f32 1.0, %v6181_v51  ;;  %9283 = vst [vmem:[#allocation52_spill] sm:$0xff] %v8310_v41  ;;  %v9290_v41 = vld [vmem:[#allocation22_spill] sm:$0xff] }
 0x33d   : > { %v6185_v10 = vpop.eup %6184  ;;  %v4538_v36 = vrot.slane %v4537_v3, 1  ;;  %v3977_v52 = vmul.f32 %v6183_v22, %v9259_v15  ;;  %6204 = vpow2.f32 %v4966_v61  ;;  %v8306_v43 = vmul.f32 0.00390625, %v4533_v44  ;;  %v8313_v61 = vpop.f32.mrb[113].mxu1 }
 0x33e   : > { %v6187_v40 = vpop.eup %6186  ;;  %6206 = vrcp.f32 %v3028_v13  ;;  %v2910_v12 = vadd.f32 1.0, %v6185_v10  ;;  %v4976_v15 = vmul.f32 -1.442695, %v9284_v21  ;;  %9285 = vst [vmem:[#allocation20_spill] sm:$0xff] %v8313_v61  ;;  %v6907_v10 = vmov 1966171168  }
 0x33f   : > { %v6189_v45 = vpop.eup %6188  ;;  %v4539_v20 = vadd.f32 %v4538_v36, %v4537_v3  ;;  %v4309_v8 = vadd.f32 %v4308_v38, %v3977_v52  ;;  %v3859_v51 = vmul.f32 %v6187_v40, %v9260_v42  ;;  %6208 = vpow2.f32 %v5093_v63  ;;  %v9286_v38 = vld [vmem:[#allocation9_spill] sm:$0xff]  ;;  %v8318_v63 = vpop.f32.mrb[154].mxu0 }
 0x340   : > { %v6191_v11 = vpop.eup %6190  ;;  %6210 = vrcp.f32 %v2910_v12  ;;  %v5103_v42 = vmul.f32 -1.442695, %v9286_v38  ;;  %9287 = vst [vmem:[#allocation9_spill] sm:$0xff] %v8318_v63  ;;  %v4601_v36 = vunpack.c.l.s4 %v6907_v10  ;;  %v3850_v63 = vmul.f32 %v6189_v45, %v9258_v29  ;;  %v8328_v40 = vpop.f32.mrb[114].mxu1 }
 0x341   : > { %v6193_v44 = vpop.eup %6192  ;;  %v8315_v22 = vmul.f32 0.00390625, %v4539_v20  ;;  %v4359_v5 = vadd.f32 %v3859_v51, %v3849_v7  ;;  %v3037_v19 = vadd.f32 1.0, %v6191_v11  ;;  %6212 = vpow2.f32 %v4975_v37  ;;  %v9288_v37 = vld [vmem:[#allocation21_spill] sm:$0xff]  ;;  %v8333_v29 = vpop.f32.mrb[155].mxu0 }
 0x342   : > { %v6195_v13 = vpop.eup %6194  ;;  %v2919_v3 = vadd.f32 1.0, %v6193_v44  ;;  %6214 = vpow2.f32 %v5094_v46  ;;  %v4985_v7 = vmul.f32 -1.442695, %v9288_v37  ;;  %v9289_v46 = vld [vmem:[#allocation34_spill] sm:$0xff]  ;;  %v4986_v26 = vmul.f32 -1.442695, %v9290_v41 }
 0x343   : > { %v6197_v52 = vpop.eup %6196  ;;  %6216 = vrcp.f32 %v3037_v19  ;;  %v3038_v12 = vadd.f32 1.0, %v6195_v13  ;;  %v5104_v51 = vmul.f32 -1.442695, %v9289_v46  ;;  %9291 = vst [vmem:[#allocation21_spill] sm:$0xff] %v8328_v40  ;;  %v9292_v45 = vlaneseq }
 0x344   : > { %v6199_v61 = vpop.eup %6198  ;;  %v3978_v11 = vmul.f32 %v6197_v52, %v9265_v35  ;;  %6218 = vrcp.f32 %v2919_v3  ;;  %v4602_v3 = vunpack.c.0.s8 %v4601_v36 }
 0x345   : > { %v6201_v44 = vpop.eup %6200  ;;  %v3860_v10 = vmul.f32 %v6199_v61, %v9266_v55  ;;  %6220 = vrcp.f32 %v3038_v12  ;;  %v8335_v55 = vpop.f32.mrb[115].mxu1  ;;  %v4604_v61 = vshrl.u32 %v9292_v45, 7 }
 0x346   : > { %v6203_v19 = vpop.eup %6202  ;;  %v4340_v13 = vadd.f32 %v8295_v33, %v3978_v11  ;;  %v3987_v35 = vmul.f32 %v6201_v44, %v8010_v49  ;;  %6222 = vpow2.f32 %v4976_v15  ;;  %v9293_v15 = vld [vmem:[#allocation35_spill] sm:$0xff] }
 0x347   : > { %v6205_v52 = vpop.eup %6204  ;;  %v4390_v20 = vadd.f32 %v3860_v10, %v3850_v63  ;;  %v3869_v62 = vmul.f32 %v6203_v19, %v8012_v2  ;;  %6224 = vpow2.f32 %v5103_v42  ;;  %v5113_v63 = vmul.f32 -1.442695, %v9293_v15 }
 0x348   : > { %v6207_v12 = vpop.eup %6206  ;;  %v4310_v40 = vadd.f32 %v4309_v8, %v3987_v35  ;;  %v2920_v48 = vadd.f32 1.0, %v6205_v52  ;;  %6226 = vpow2.f32 %v4985_v7  ;;  %v8341_v19 = vsub.s32 %v4602_v3, %v4604_v61  ;;  %v9295_v35 = vld [vmem:[#allocation8_spill] sm:$0xff]  ;;  %v9296_v52 = vld [vmem:[#allocation23_spill] sm:$0xff] }
 0x349   : > { %v6209_v33 = vpop.eup %6208  ;;  %v4360_v11 = vadd.f32 %v4359_v5, %v3869_v62  ;;  %v3988_v49 = vmul.f32 %v6207_v12, %v9267_v6  ;;  %6228 = vpow2.f32 %v5104_v51  ;;  %v4995_v62 = vmul.f32 -1.442695, %v9295_v35 }
 0x34a   : > { %v6211_v36 = vpop.eup %6210  ;;  %6230 = vrcp.f32 %v2920_v48  ;;  %v3047_v2 = vadd.f32 1.0, %v6209_v33  ;;  %9294 = vst [vmem:[#allocation34_spill] sm:$0xff] %v8341_v19  ;;  %v5114_v12 = vmul.f32 -1.442695, %v9296_v52  ;;  %v8345_v48 = vpop.f32.mrb[156].mxu0 }
 0x34b   : > { %v6213_v42 = vpop.eup %6212  ;;  %v4341_v44 = vadd.f32 %v4340_v13, %v3988_v49  ;;  %v3870_v10 = vmul.f32 %v6211_v36, %v9268_v14  ;;  %6232 = vpow2.f32 %v4986_v26  ;;  %v8347_v33 = vpop.f32.mrb[116].mxu1  ;;  %v9297_v26 = vld [vmem:[#allocation36_spill] sm:$0xff] }
 0x34c   : > { %v6215_v8 = vpop.eup %6214  ;;  %6234 = vrcp.f32 %v3047_v2  ;;  %v2929_v7 = vadd.f32 1.0, %v6213_v42  ;;  %v4996_v3 = vmul.f32 -1.442695, %v9297_v26  ;;  %v8351_v61 = vpop.f32.mrb[157].mxu0 }
 0x34d   : > { %v6217_v5 = vpop.eup %6216  ;;  %v4391_v6 = vadd.f32 %v4390_v20, %v3870_v10  ;;  %v3048_v51 = vadd.f32 1.0, %v6215_v8  ;;  %6236 = vpow2.f32 %v5113_v63  ;;  %v8354_v20 = vpop.f32.mrb[117].mxu1  ;;  %v9298_v63 = vcombine.low %v8101_v58, %v8107_v1 }
 0x34e   : > { %v6219_v13 = vpop.eup %6218  ;;  %v3997_v14 = vmul.f32 %v6217_v5, %v9273_v54  ;;  %6238 = vrcp.f32 %v2929_v7  ;;  %v9300_v54 = vcombine.low %v8306_v43, %v8315_v22  ;;  %v8371_v58 = vpop.f32.mrb[118].mxu1 }
 0x34f   : > { %v6221_v49 = vpop.eup %6220  ;;  %v3879_v36 = vmul.f32 %v6219_v13, %v9274_v23  ;;  %6240 = vrcp.f32 %v3048_v51  ;;  %v8360_v2 = vrot.slane %v9298_v63, %v8341_v19  ;;  %v8369_v13 = vpop.f32.mrb[158].mxu0 }
 0x350   : > { %v8366_v42 = vrot.slane %v9300_v54, %v8341_v19  ;;  %v6223_v10 = vpop.eup %6222  ;;  %v4311_v8 = vadd.f32 %v4310_v40, %v3997_v14  ;;  %v3998_v7 = vmul.f32 %v6221_v49, %v9277_v28  ;;  %6242 = vpow2.f32 %v4995_v62  ;;  %v9302_v28 = vld [vmem:[#allocation37_spill] sm:$0xff] }
 0x351   : > { %9299 = vst [vmem:[#allocation22_spill] sm:$0xff] %v8360_v2  ;;  %v6225_v23 = vpop.eup %6224  ;;  %v4361_v5 = vadd.f32 %v4360_v11, %v3879_v36  ;;  %v2930_v51 = vadd.f32 1.0, %v6223_v10  ;;  %6244 = vpow2.f32 %v5114_v12  ;;  %v5123_v62 = vmul.f32 -1.442695, %v9302_v28  ;;  %v9303_v36 = vld [vmem:[#allocation38_spill] sm:$0xff] }
 0x352   : > { %9301 = vst [vmem:[#allocation35_spill] sm:$0xff] %v8366_v42  ;;  %v6227_v63 = vpop.eup %6226  ;;  %v4342_v43 = vadd.f32 %v4341_v44, %v3998_v7  ;;  %v3057_v22 = vadd.f32 1.0, %v6225_v23  ;;  %6246 = vpow2.f32 %v4996_v3  ;;  %v5005_v10 = vmul.f32 -1.442695, %v9303_v36 }
 0x353   : > { %v6229_v54 = vpop.eup %6228  ;;  %6248 = vrcp.f32 %v2930_v51  ;;  %v2939_v40 = vadd.f32 1.0, %v6227_v63  ;;  %v5124_v23 = vmul.f32 -1.442695, %v8093_v57 }
 0x354   : > { %v6231_v14 = vpop.eup %6230  ;;  %6250 = vrcp.f32 %v3057_v22  ;;  %v3058_v11 = vadd.f32 1.0, %v6229_v54  ;;  %v9304_v22 = vld [vmem:[#allocation39_spill] sm:$0xff] }
 0x355   : > { %v6233_v12 = vpop.eup %6232  ;;  %v3880_v49 = vmul.f32 %v6231_v14, %v9280_v27  ;;  %6252 = vrcp.f32 %v2939_v40  ;;  %v5006_v54 = vmul.f32 -1.442695, %v9304_v22  ;;  %v8382_v14 = vpop.f32.mrb[159].mxu0 }
 0x356   : > { %v6235_v45 = vpop.eup %6234  ;;  %6254 = vrcp.f32 %v3058_v11  ;;  %v2940_v1 = vadd.f32 1.0, %v6233_v12  ;;  %v8385_v12 = vpop.f32.mrb[119].mxu1 }
 0x357   : > { %v6237_v44 = vpop.eup %6236  ;;  %v4392_v7 = vadd.f32 %v4391_v6, %v3880_v49  ;;  %v4007_v3 = vmul.f32 %v6235_v45, %v8043_v53  ;;  %6256 = vpow2.f32 %v5123_v62 }
 0x358   : > { %v6239_v51 = vpop.eup %6238  ;;  %6258 = vrcp.f32 %v2940_v1  ;;  %v3067_v63 = vadd.f32 1.0, %v6237_v44 }
 0x359   : > { %v6241_v42 = vpop.eup %6240  ;;  %v4312_v27 = vadd.f32 %v4311_v8, %v4007_v3  ;;  %v3889_v40 = vmul.f32 %v6239_v51, %v8045_v30  ;;  %6260 = vpow2.f32 %v5005_v10  ;;  %v5133_v8 = vmul.f32 -1.442695, %v8110_v4 }
 0x35a   : > { %v6243_v11 = vpop.eup %6242  ;;  %v4008_v6 = vmul.f32 %v6241_v42, %v8048_v50  ;;  %6262 = vrcp.f32 %v3067_v63  ;;  %v5015_v3 = vmul.f32 -1.442695, %v8112_v16  ;;  %v5134_v42 = vmul.f32 -1.442695, %v8116_v34 }
 0x35b   : > { %v6245_v53 = vpop.eup %6244  ;;  %v4362_v45 = vadd.f32 %v4361_v5, %v3889_v40  ;;  %v2949_v62 = vadd.f32 1.0, %v6243_v11  ;;  %6264 = vpow2.f32 %v5124_v23 }
 0x35c   : > { %v6247_v1 = vpop.eup %6246  ;;  %v4343_v49 = vadd.f32 %v4342_v43, %v4008_v6  ;;  %v3068_v44 = vadd.f32 1.0, %v6245_v53  ;;  %6266 = vpow2.f32 %v5006_v54  ;;  %v5016_v43 = vmul.f32 -1.442695, %v8118_v39 }
 0x35d   : > { %v6249_v30 = vpop.eup %6248  ;;  %6268 = vrcp.f32 %v2949_v62  ;;  %v2950_v10 = vadd.f32 1.0, %v6247_v1 }
 0x35e   : > { %v6251_v51 = vpop.eup %6250  ;;  %v3890_v50 = vmul.f32 %v6249_v30, %v9284_v21  ;;  %6270 = vrcp.f32 %v3068_v44  ;;  %v9305_v21 = vld [vmem:[#allocation40_spill] sm:$0xff] }
 0x35f   : > { %v6253_v5 = vpop.eup %6252  ;;  %v4017_v23 = vmul.f32 %v6251_v51, %v9286_v38  ;;  %6272 = vrcp.f32 %v2950_v10  ;;  %v5143_v62 = vmul.f32 -1.442695, %v9305_v21 }
 0x360   : > { %v6255_v63 = vpop.eup %6254  ;;  %v4393_v54 = vadd.f32 %v4392_v7, %v3890_v50  ;;  %v3899_v40 = vmul.f32 %v6253_v5, %v9288_v37  ;;  %6274 = vpow2.f32 %v5133_v8  ;;  %v9306_v7 = vld [vmem:[#allocation11_spill] sm:$0xff] }
 0x361   : > { %v6257_v11 = vpop.eup %6256  ;;  %v4313_v6 = vadd.f32 %v4312_v27, %v4017_v23  ;;  %v4018_v53 = vmul.f32 %v6255_v63, %v9289_v46  ;;  %6276 = vpow2.f32 %v5015_v3  ;;  %v5025_v50 = vmul.f32 -1.442695, %v9306_v7  ;;  %v8398_v27 = vpop.f32.mrb[160].mxu0 }
 0x362   : > { %v6259_v1 = vpop.eup %6258  ;;  %v4363_v44 = vadd.f32 %v4362_v45, %v3899_v40  ;;  %v3077_v30 = vadd.f32 1.0, %v6257_v11  ;;  %6278 = vpow2.f32 %v5134_v42  ;;  %v8400_v46 = vpop.f32.mrb[120].mxu1 }
 0x363   : > { %v6261_v38 = vpop.eup %6260  ;;  %v4344_v10 = vadd.f32 %v4343_v49, %v4018_v53  ;;  %v3900_v51 = vmul.f32 %v6259_v1, %v9290_v41  ;;  %6280 = vpow2.f32 %v5016_v43  ;;  %v8403_v42 = vpop.f32.mrb[161].mxu0  ;;  %v9307_v43 = vld [vmem:[#allocation41_spill] sm:$0xff] }
 0x364   : > { %v6263_v37 = vpop.eup %6262  ;;  %6282 = vrcp.f32 %v3077_v30  ;;  %v2959_v8 = vadd.f32 1.0, %v6261_v38  ;;  %v8405_v49 = vpop.f32.mrb[121].mxu1  ;;  %v5144_v63 = vmul.f32 -1.442695, %v9307_v43 }
 0x365   : > { %v6265_v3 = vpop.eup %6264  ;;  %v4394_v5 = vadd.f32 %v4393_v54, %v3900_v51  ;;  %v4027_v45 = vmul.f32 %v6263_v37, %v9293_v15  ;;  %6284 = vpow2.f32 %v5143_v62  ;;  %v8408_v40 = vpop.f32.mrb[162].mxu0  ;;  %v5026_v54 = vmul.f32 -1.442695, %v8136_v59 }
 0x366   : > { %v6267_v41 = vpop.eup %6266  ;;  %6286 = vrcp.f32 %v2959_v8  ;;  %v3078_v23 = vadd.f32 1.0, %v6265_v3  ;;  %v8411_v30 = vpop.f32.mrb[122].mxu1  ;;  %v5153_v51 = vmul.f32 -1.442695, %v8142_v18 }
 0x367   : > { %v6269_v11 = vpop.eup %6268  ;;  %v4314_v53 = vadd.f32 %v4313_v6, %v4027_v45  ;;  %v2960_v1 = vadd.f32 1.0, %v6267_v41  ;;  %6288 = vpow2.f32 %v5025_v50  ;;  %9308 = vst [vmem:[#allocation8_spill] sm:$0xff] %v8411_v30  ;;  %v8413_v15 = vpop.f32.mrb[163].mxu0  ;;  %v5035_v30 = vmul.f32 -1.442695, %v8144_v0 }
 0x368   : > { %9309 = vst [vmem:[#allocation23_spill] sm:$0xff] %v8413_v15  ;;  %v6271_v62 = vpop.eup %6270  ;;  %v3909_v38 = vmul.f32 %v6269_v11, %v9295_v35  ;;  %6290 = vrcp.f32 %v3078_v23  ;;  %v8417_v37 = vpop.f32.mrb[123].mxu1 }
 0x369   : > { %9310 = vst [vmem:[#allocation36_spill] sm:$0xff] %v8417_v37  ;;  %v6273_v8 = vpop.eup %6272  ;;  %v4028_v3 = vmul.f32 %v6271_v62, %v9296_v52  ;;  %6292 = vrcp.f32 %v2960_v1 }
 0x36a   : > { %v6275_v6 = vpop.eup %6274  ;;  %v4364_v50 = vadd.f32 %v4363_v44, %v3909_v38  ;;  %v3910_v45 = vmul.f32 %v6273_v8, %v9297_v26  ;;  %6294 = vpow2.f32 %v5144_v63  ;;  %v8422_v44 = vpop.f32.mrb[164].mxu0  ;;  %v5036_v8 = vmul.f32 -1.442695, %v8150_v31 }
 0x36b   : > { %v6277_v41 = vpop.eup %6276  ;;  %v4345_v2 = vadd.f32 %v4344_v10, %v4028_v3  ;;  %v3087_v19 = vadd.f32 1.0, %v6275_v6  ;;  %6296 = vpow2.f32 %v5026_v54  ;;  %v8424_v26 = vpop.f32.mrb[124].mxu1 }
 0x36c   : > { %v6279_v15 = vpop.eup %6278  ;;  %v4395_v35 = vadd.f32 %v4394_v5, %v3910_v45  ;;  %v2969_v23 = vadd.f32 1.0, %v6277_v41  ;;  %6298 = vpow2.f32 %v5153_v51  ;;  %v5154_v5 = vmul.f32 -1.442695, %v8148_v32  ;;  %v8428_v54 = vpop.f32.mrb[165].mxu0 }
 0x36d   : > { %v6281_v11 = vpop.eup %6280  ;;  %6300 = vrcp.f32 %v3087_v19  ;;  %v3088_v37 = vadd.f32 1.0, %v6279_v15 }
 0x36e   : > { %v6283_v52 = vpop.eup %6282  ;;  %6302 = vrcp.f32 %v2969_v23  ;;  %v2970_v1 = vadd.f32 1.0, %v6281_v11 }
 0x36f   : > { %v6285_v63 = vpop.eup %6284  ;;  %v4037_v10 = vmul.f32 %v6283_v52, %v9302_v28  ;;  %6304 = vrcp.f32 %v3088_v37  ;;  %v5163_v28 = vmul.f32 -1.442695, %v8153_v47  ;;  %v8433_v37 = vpop.f32.mrb[125].mxu1 }
 0x370   : > { %v6287_v62 = vpop.eup %6286  ;;  %6306 = vrcp.f32 %v2970_v1  ;;  %v3097_v19 = vadd.f32 1.0, %v6285_v63 }
 0x371   : > { %v6289_v15 = vpop.eup %6288  ;;  %v4315_v38 = vadd.f32 %v4314_v53, %v4037_v10  ;;  %v3919_v51 = vmul.f32 %v6287_v62, %v9303_v36  ;;  %6308 = vpow2.f32 %v5035_v30  ;;  %v9311_v62 = vld [vmem:[#allocation42_spill] sm:$0xff] }
 0x372   : > { %v6291_v3 = vpop.eup %6290  ;;  %6310 = vrcp.f32 %v3097_v19  ;;  %v2979_v6 = vadd.f32 1.0, %v6289_v15  ;;  %v5045_v19 = vmul.f32 -1.442695, %v9311_v62  ;;  %v8438_v15 = vpop.f32.mrb[166].mxu0 }
 0x373   : > { %v6293_v45 = vpop.eup %6292  ;;  %v4365_v41 = vadd.f32 %v4364_v50, %v3919_v51  ;;  %v4038_v23 = vmul.f32 %v6291_v3, %v8093_v57  ;;  %6312 = vpow2.f32 %v5154_v5  ;;  %v5164_v5 = vmul.f32 -1.442695, %v8164_v25 }
 0x374   : > { %v6295_v11 = vpop.eup %6294  ;;  %v3920_v53 = vmul.f32 %v6293_v45, %v9304_v22  ;;  %6314 = vrcp.f32 %v2979_v6  ;;  %v5173_v3 = vmul.f32 -1.442695, %v8175_v9  ;;  %v8445_v6 = vpop.f32.mrb[126].mxu1 }
 0x375   : > { %v6297_v36 = vpop.eup %6296  ;;  %v4346_v30 = vadd.f32 %v4345_v2, %v4038_v23  ;;  %v3098_v52 = vadd.f32 1.0, %v6295_v11  ;;  %6316 = vpow2.f32 %v5036_v8  ;;  %v5046_v2 = vmul.f32 -1.442695, %v8166_v17 }
 0x376   : > { %v6299_v1 = vpop.eup %6298  ;;  %v4396_v63 = vadd.f32 %v4395_v35, %v3920_v53  ;;  %v2980_v10 = vadd.f32 1.0, %v6297_v36  ;;  %6318 = vpow2.f32 %v5163_v28  ;;  %v5055_v36 = vmul.f32 -1.442695, %v8177_v56 }
 0x377   : > { %v6301_v50 = vpop.eup %6300  ;;  %6320 = vrcp.f32 %v3098_v52  ;;  %v3107_v57 = vadd.f32 1.0, %v6299_v1  ;;  %v8450_v52 = vpop.f32.mrb[167].mxu0 }
 0x378   : > { %v6303_v51 = vpop.eup %6302  ;;  %v4047_v22 = vmul.f32 %v6301_v50, %v8110_v4  ;;  %6322 = vrcp.f32 %v2980_v10 }
 0x379   : > { %v6305_v8 = vpop.eup %6304  ;;  %v3929_v35 = vmul.f32 %v6303_v51, %v8112_v16  ;;  %6324 = vrcp.f32 %v3107_v57  ;;  %v8452_v16 = vpop.f32.mrb[127].mxu1 }
 0x37a   : > { %v6307_v28 = vpop.eup %6306  ;;  %v4316_v45 = vadd.f32 %v4315_v38, %v4047_v22  ;;  %v4048_v23 = vmul.f32 %v6305_v8, %v8116_v34  ;;  %6326 = vpow2.f32 %v5045_v19  ;;  %v9312_v19 = vld [vmem:[#allocation10_spill] sm:$0xff] }
 0x37b   : > { %v6309_v11 = vpop.eup %6308  ;;  %v4366_v53 = vadd.f32 %v4365_v41, %v3929_v35  ;;  %v3930_v4 = vmul.f32 %v6307_v28, %v8118_v39  ;;  %6328 = vpow2.f32 %v5164_v5  ;;  %v5174_v41 = vmul.f32 -1.442695, %v9312_v19  ;;  %v9313_v28 = vld [vmem:[#allocation43_spill] sm:$0xff] }
 0x37c   : > { %v6311_v1 = vpop.eup %6310  ;;  %v4347_v10 = vadd.f32 %v4346_v30, %v4048_v23  ;;  %v2989_v50 = vadd.f32 1.0, %v6309_v11  ;;  %6330 = vpow2.f32 %v5046_v2  ;;  %v5056_v2 = vmul.f32 -1.442695, %v9313_v28 }
 0x37d   : > { %v6313_v57 = vpop.eup %6312  ;;  %v4397_v38 = vadd.f32 %v4396_v63, %v3930_v4  ;;  %v4057_v34 = vmul.f32 %v6311_v1, %v9305_v21  ;;  %6332 = vpow2.f32 %v5173_v3  ;;  %v5183_v21 = vmul.f32 -1.442695, %v8189_v24  ;;  %v8459_v3 = vpop.f32.mrb[168].mxu0 }
 0x37e   : > { %v6315_v51 = vpop.eup %6314  ;;  %6334 = vrcp.f32 %v2989_v50  ;;  %v3108_v39 = vadd.f32 1.0, %v6313_v57  ;;  %v8461_v4 = vpop.f32.mrb[128].mxu1 }
 0x37f   : > { %v6317_v5 = vpop.eup %6316  ;;  %v4317_v22 = vadd.f32 %v4316_v45, %v4057_v34  ;;  %v3939_v8 = vmul.f32 %v6315_v51, %v9306_v7  ;;  %6336 = vpow2.f32 %v5055_v36  ;;  %9314 = vst [vmem:[#allocation37_spill] sm:$0xff] %v8461_v4  ;;  %v5065_v7 = vmul.f32 -1.442695, %v8191_v60  ;;  %v8465_v36 = vpop.f32.mrb[169].mxu0 }
 0x380   : > { %v6319_v35 = vpop.eup %6318  ;;  %6338 = vrcp.f32 %v3108_v39  ;;  %v2990_v30 = vadd.f32 1.0, %v6317_v5  ;;  %9315 = vst [vmem:[#allocation38_spill] sm:$0xff] %v8465_v36  ;;  %v8467_v50 = vpop.f32.mrb[129].mxu1 }
 0x381   : > { %v6321_v23 = vpop.eup %6320  ;;  %v4367_v63 = vadd.f32 %v4366_v53, %v3939_v8  ;;  %v3117_v11 = vadd.f32 1.0, %v6319_v35  ;;  %6340 = vpow2.f32 %v5174_v41  ;;  %9316 = vst [vmem:[#allocation39_spill] sm:$0xff] %v8467_v50  ;;  %v8470_v34 = vpop.f32.mrb[170].mxu0 }
 0x382   : > { %v6323_v1 = vpop.eup %6322  ;;  %v4058_v45 = vmul.f32 %v6321_v23, %v9307_v43  ;;  %6342 = vrcp.f32 %v2990_v30  ;;  %9317 = vst [vmem:[#allocation40_spill] sm:$0xff] %v8470_v34  ;;  %v8472_v41 = vpop.f32.mrb[130].mxu1  ;;  %v9321_v34 = vld [vmem:[#allocation12_spill] sm:$0xff] }
 0x383   : > { %v6325_v57 = vpop.eup %6324  ;;  %v3940_v53 = vmul.f32 %v6323_v1, %v8136_v59  ;;  %6344 = vrcp.f32 %v3117_v11  ;;  %9318 = vst [vmem:[#allocation11_spill] sm:$0xff] %v8472_v41  ;;  %v8475_v30 = vpop.f32.mrb[171].mxu0 }
 0x384   : > { %v6327_v51 = vpop.eup %6326  ;;  %v4348_v39 = vadd.f32 %v4347_v10, %v4058_v45  ;;  %v4067_v5 = vmul.f32 %v6325_v57, %v8142_v18  ;;  %6346 = vpow2.f32 %v5056_v2  ;;  %9319 = vst [vmem:[#allocation41_spill] sm:$0xff] %v8475_v30  ;;  %v8477_v23 = vpop.f32.mrb[131].mxu1  ;;  %v5184_v10 = vmul.f32 -1.442695, %v9321_v34 }
 0x385   : > { %v6329_v43 = vpop.eup %6328  ;;  %v4398_v8 = vadd.f32 %v4397_v38, %v3940_v53  ;;  %v2999_v35 = vadd.f32 1.0, %v6327_v51  ;;  %6348 = vpow2.f32 %v5183_v21  ;;  %9320 = vst [vmem:[#allocation42_spill] sm:$0xff] %v8477_v23  ;;  %v9322_v21 = vld [vmem:[#allocation44_spill] sm:$0xff] }
 0x386   : > { %v6331_v50 = vpop.eup %6330  ;;  %v4318_v59 = vadd.f32 %v4317_v22, %v4067_v5  ;;  %v3118_v11 = vadd.f32 1.0, %v6329_v43  ;;  %6350 = vpow2.f32 %v5065_v7  ;;  %v5066_v57 = vmul.f32 -1.442695, %v9322_v21 }
 0x387   : > { %v6333_v1 = vpop.eup %6332  ;;  %6352 = vrcp.f32 %v2999_v35  ;;  %v3000_v41 = vadd.f32 1.0, %v6331_v50  ;;  %v9323_v50 = vld [vmem:[#allocation24_spill] sm:$0xff] }
 0x388   : > { %v6335_v45 = vpop.eup %6334  ;;  %6354 = vrcp.f32 %v3118_v11  ;;  %v3127_v18 = vadd.f32 1.0, %v6333_v1  ;;  %v5193_v43 = vmul.f32 -1.442695, %v9323_v50  ;;  %v9324_v1 = vld [vmem:[#allocation13_spill] sm:$0xff] }
 0x389   : > { %v6337_v2 = vpop.eup %6336  ;;  %v3949_v38 = vmul.f32 %v6335_v45, %v8144_v0  ;;  %6356 = vrcp.f32 %v3000_v41  ;;  %v5075_v23 = vmul.f32 -1.442695, %v9324_v1 }
 0x38a   : > { %v6339_v53 = vpop.eup %6338  ;;  %6358 = vrcp.f32 %v3127_v18  ;;  %v3009_v51 = vadd.f32 1.0, %v6337_v2 }
 0x38b   : > { %v6341_v22 = vpop.eup %6340  ;;  %v4368_v5 = vadd.f32 %v4367_v63, %v3949_v38  ;;  %v4068_v7 = vmul.f32 %v6339_v53, %v8148_v32  ;;  %6360 = vpow2.f32 %v5184_v10 }
 0x38c   : > { %v6343_v35 = vpop.eup %6342  ;;  %6362 = vrcp.f32 %v3009_v51  ;;  %v3128_v11 = vadd.f32 1.0, %v6341_v22  ;;  %v9325_v51 = vld [vmem:[#allocation25_spill] sm:$0xff] }
 0x38d   : > { %v6345_v30 = vpop.eup %6344  ;;  %v4349_v0 = vadd.f32 %v4348_v39, %v4068_v7  ;;  %v3950_v41 = vmul.f32 %v6343_v35, %v8150_v31  ;;  %6364 = vpow2.f32 %v5066_v57  ;;  %v5194_v22 = vmul.f32 -1.442695, %v9325_v51  ;;  %v9326_v7 = vld [vmem:[#allocation14_spill] sm:$0xff]  ;;  %v8489_v57 = vpop.f32.mrb[172].mxu0 }
 0x38e   : > { %v6347_v45 = vpop.eup %6346  ;;  %v4077_v18 = vmul.f32 %v6345_v30, %v8153_v47  ;;  %6366 = vrcp.f32 %v3128_v11  ;;  %v5076_v31 = vmul.f32 -1.442695, %v9326_v7  ;;  %9327 = vst [vmem:[#allocation10_spill] sm:$0xff] %v8489_v57  ;;  %v8491_v35 = vpop.f32.mrb[132].mxu1  ;;  %v9329_v30 = vld [vmem:[#allocation45_spill] sm:$0xff]  ;;  %v9330_v11 = vld [vmem:[#allocation47_spill] sm:$0xff] }
 0x38f   : > { %v6349_v63 = vpop.eup %6348  ;;  %v4399_v2 = vadd.f32 %v4398_v8, %v3950_v41  ;;  %v3010_v32 = vadd.f32 1.0, %v6347_v45  ;;  %6368 = vpow2.f32 %v5193_v43  ;;  %9328 = vst [vmem:[#allocation43_spill] sm:$0xff] %v8491_v35  ;;  %v5203_v43 = vmul.f32 -1.442695, %v9329_v30 }
 0x390   : > { %v6351_v10 = vpop.eup %6350  ;;  %v4319_v38 = vadd.f32 %v4318_v59, %v4077_v18  ;;  %v3137_v53 = vadd.f32 1.0, %v6349_v63  ;;  %6370 = vpow2.f32 %v5075_v23  ;;  %v5085_v41 = vmul.f32 -1.442695, %v9330_v11 }
 0x391   : > { %v6353_v36 = vpop.eup %6352  ;;  %6372 = vrcp.f32 %v3010_v32  ;;  %v3019_v39 = vadd.f32 1.0, %v6351_v10  ;;  %v8498_v32 = vpop.f32.mrb[173].mxu0 }
 0x392   : > { %v6355_v47 = vpop.eup %6354  ;;  %v3959_v8 = vmul.f32 %v6353_v36, %v9311_v62  ;;  %6374 = vrcp.f32 %v3137_v53  ;;  %9331 = vst [vmem:[#allocation12_spill] sm:$0xff] %v8498_v32  ;;  %v8500_v10 = vpop.f32.mrb[133].mxu1  ;;  %v9333_v53 = vld [vmem:[#allocation27_spill] sm:$0xff] }
 0x393   : > { %v6357_v59 = vpop.eup %6356  ;;  %v4078_v23 = vmul.f32 %v6355_v47, %v8164_v25  ;;  %6376 = vrcp.f32 %v3019_v39  ;;  %9332 = vst [vmem:[#allocation44_spill] sm:$0xff] %v8500_v10  ;;  %v5204_v57 = vmul.f32 -1.442695, %v9333_v53  ;;  %v8504_v4 = vpop.f32.mrb[174].mxu0 }
 0x394   : > { %v6359_v45 = vpop.eup %6358  ;;  %v4369_v18 = vadd.f32 %v4368_v5, %v3959_v8  ;;  %v3960_v63 = vmul.f32 %v6357_v59, %v8166_v17  ;;  %6378 = vpow2.f32 %v5194_v22  ;;  %9334 = vst [vmem:[#allocation24_spill] sm:$0xff] %v8504_v4  ;;  %v8506_v5 = vpop.f32.mrb[134].mxu1  ;;  %v9336_v59 = vld [vmem:[#allocation48_spill] sm:$0xff] }
 0x395   : > { %v6361_v35 = vpop.eup %6360  ;;  %v4350_v62 = vadd.f32 %v4349_v0, %v4078_v23  ;;  %v4087_v36 = vmul.f32 %v6359_v45, %v8175_v9  ;;  %6380 = vpow2.f32 %v5076_v31  ;;  %9335 = vst [vmem:[#allocation13_spill] sm:$0xff] %v8506_v5  ;;  %v5086_v0 = vmul.f32 -1.442695, %v9336_v59  ;;  %v8510_v31 = vpop.f32.mrb[175].mxu0 }
 0x396   : > { %v6363_v25 = vpop.eup %6362  ;;  %v4400_v39 = vadd.f32 %v4399_v2, %v3960_v63  ;;  %v3138_v47 = vadd.f32 1.0, %v6361_v35  ;;  %6382 = vpow2.f32 %v5203_v43  ;;  %9337 = vst [vmem:[#allocation25_spill] sm:$0xff] %v8510_v31  ;;  %v8512_v45 = vpop.f32.mrb[135].mxu1 }
 0x397   : > { %v6365_v17 = vpop.eup %6364  ;;  %v4320_v22 = vadd.f32 %v4319_v38, %v4087_v36  ;;  %v3969_v8 = vmul.f32 %v6363_v25, %v8177_v56  ;;  %6384 = vpow2.f32 %v5085_v41  ;;  %9338 = vst [vmem:[#allocation14_spill] sm:$0xff] %v8512_v45  ;;  %v9339_v36 = vld [vmem:[#allocation26_spill] sm:$0xff]  ;;  %v9341_v45 = vld [vmem:[#allocation15_spill] sm:$0xff] }
 0x398   : > { %v6367_v23 = vpop.eup %6366  ;;  %6386 = vrcp.f32 %v3138_v47  ;;  %v3020_v9 = vadd.f32 1.0, %v6365_v17  ;;  %v5213_v56 = vmul.f32 -1.442695, %v9339_v36  ;;  %v9340_v47 = vld [vmem:[#allocation7_spill] sm:$0xff] }
 0x399   : > { %v6369_v2 = vpop.eup %6368  ;;  %v4370_v35 = vadd.f32 %v4369_v18, %v3969_v8  ;;  %v4088_v43 = vmul.f32 %v6367_v23, %v9312_v19  ;;  %6388 = vpow2.f32 %v5204_v57  ;;  %v5095_v17 = vmul.f32 -1.442695, %v9340_v47 }
 0x39a   : > { %v6371_v63 = vpop.eup %6370  ;;  %6390 = vrcp.f32 %v3020_v9  ;;  %v3147_v38 = vadd.f32 1.0, %v6369_v2  ;;  %v5214_v18 = vmul.f32 -1.442695, %v9341_v45 }
 0x39b   : > { %v6373_v41 = vpop.eup %6372  ;;  %v4351_v25 = vadd.f32 %v4350_v62, %v4088_v43  ;;  %v3029_v5 = vadd.f32 1.0, %v6371_v63  ;;  %6392 = vpow2.f32 %v5086_v0  ;;  %v8521_v43 = vpop.f32.mrb[136].mxu1 }
 0x39c   : > { %v6375_v4 = vpop.eup %6374  ;;  %v3970_v31 = vmul.f32 %v6373_v41, %v9313_v28  ;;  %6394 = vrcp.f32 %v3147_v38  ;;  %9342 = vst [vmem:[#allocation45_spill] sm:$0xff] %v8521_v43  ;;  %v8523_v41 = vpop.f32.mrb[137].mxu1 }
 0x39d   : > { %v6377_v8 = vpop.eup %6376  ;;  %v4097_v19 = vmul.f32 %v6375_v4, %v8189_v24  ;;  %6396 = vrcp.f32 %v3029_v5  ;;  %9343 = vst [vmem:[#allocation47_spill] sm:$0xff] %v8523_v41  ;;  %v9344_v4 = vld [vmem:[#allocation29_spill] sm:$0xff]  ;;  %v8526_v5 = vpop.f32.mrb[138].mxu1 }
 0x39e   : > { %v6379_v57 = vpop.eup %6378  ;;  %v4401_v23 = vadd.f32 %v4400_v39, %v3970_v31  ;;  %v3979_v9 = vmul.f32 %v6377_v8, %v8191_v60  ;;  %6398 = vpow2.f32 %v5213_v56  ;;  %v5096_v39 = vmul.f32 -1.442695, %v9344_v4  ;;  %9345 = vst [vmem:[#allocation27_spill] sm:$0xff] %v8526_v5  ;;  %v8528_v31 = vpop.f32.mrb[139].mxu1 }
 0x39f   : > { %v6381_v62 = vpop.eup %6380  ;;  %v4321_v2 = vadd.f32 %v4320_v22, %v4097_v19  ;;  %v3148_v0 = vadd.f32 1.0, %v6379_v57  ;;  %6400 = vpow2.f32 %v5095_v17  ;;  %9346 = vst [vmem:[#allocation48_spill] sm:$0xff] %v8528_v31  ;;  %v9349_v31 = vld [vmem:[#allocation30_spill] sm:$0xff] }
 0x3a0   : > { %v6383_v63 = vpop.eup %6382  ;;  %v4371_v28 = vadd.f32 %v4370_v35, %v3979_v9  ;;  %v3030_v38 = vadd.f32 1.0, %v6381_v62  ;;  %6402 = vpow2.f32 %v5214_v18  ;;  %v9347_v35 = vld [vmem:[#allocation28_spill] sm:$0xff]  ;;  %v5224_v5 = vmul.f32 -1.442695, %v9349_v31 }
 0x3a1   : > { %v6385_v10 = vpop.eup %6384  ;;  %6404 = vrcp.f32 %v3148_v0  ;;  %v3157_v24 = vadd.f32 1.0, %v6383_v63  ;;  %v5223_v18 = vmul.f32 -1.442695, %v9347_v35  ;;  %v9348_v0 = vld [vmem:[#allocation31_spill] sm:$0xff] }
 0x3a2   : > { %v6387_v60 = vpop.eup %6386  ;;  %6406 = vrcp.f32 %v3030_v38  ;;  %v3039_v22 = vadd.f32 1.0, %v6385_v10  ;;  %v5105_v63 = vmul.f32 -1.442695, %v9348_v0 }
 0x3a3   : > { %v6389_v56 = vpop.eup %6388  ;;  %v4098_v17 = vmul.f32 %v6387_v60, %v9321_v34  ;;  %6408 = vrcp.f32 %v3157_v24  ;;  %v8536_v60 = vpop.f32.mrb[140].mxu1 }
 0x3a4   : > { %v6391_v8 = vpop.eup %6390  ;;  %6410 = vrcp.f32 %v3039_v22  ;;  %v3158_v19 = vadd.f32 1.0, %v6389_v56  ;;  %9350 = vst [vmem:[#allocation26_spill] sm:$0xff] %v8536_v60  ;;  %v9354_v60 = vld [vmem:[#allocation33_spill] sm:$0xff] }
 0x3a5   : > { %v6393_v57 = vpop.eup %6392  ;;  %v4352_v9 = vadd.f32 %v4351_v25, %v4098_v17  ;;  %v3980_v62 = vmul.f32 %v6391_v8, %v9322_v21  ;;  %6412 = vpow2.f32 %v5096_v39  ;;  %v8539_v21 = vpop.f32.mrb[141].mxu1 }
 0x3a6   : > { %v6395_v38 = vpop.eup %6394  ;;  %6414 = vrcp.f32 %v3158_v19  ;;  %v3040_v10 = vadd.f32 1.0, %v6393_v57  ;;  %9351 = vst [vmem:[#allocation7_spill] sm:$0xff] %v8539_v21 }
 0x3a7   : > { %v6397_v41 = vpop.eup %6396  ;;  %v4402_v34 = vadd.f32 %v4401_v23, %v3980_v62  ;;  %v4107_v24 = vmul.f32 %v6395_v38, %v9323_v50  ;;  %6416 = vpow2.f32 %v5223_v18  ;;  %v9352_v23 = vld [vmem:[#allocation49_spill] sm:$0xff]  ;;  %v8542_v50 = vpop.f32.mrb[142].mxu1 }
 0x3a8   : > { %v6399_v22 = vpop.eup %6398  ;;  %v3989_v25 = vmul.f32 %v6397_v41, %v9324_v1  ;;  %6418 = vrcp.f32 %v3040_v10  ;;  %v5106_v62 = vmul.f32 -1.442695, %v9352_v23  ;;  %9353 = vst [vmem:[#allocation15_spill] sm:$0xff] %v8542_v50  ;;  %v5233_v1 = vmul.f32 -1.442695, %v9354_v60 }
 0x3a9   : > { %v6401_v39 = vpop.eup %6400  ;;  %v4322_v56 = vadd.f32 %v4321_v2, %v4107_v24  ;;  %v3167_v17 = vadd.f32 1.0, %v6399_v22  ;;  %6420 = vpow2.f32 %v5105_v63  ;;  %v9355_v2 = vld [vmem:[#allocation32_spill] sm:$0xff] }
 0x3aa   : > { %v6403_v8 = vpop.eup %6402  ;;  %v4372_v19 = vadd.f32 %v4371_v28, %v3989_v25  ;;  %v3049_v57 = vadd.f32 1.0, %v6401_v39  ;;  %6422 = vpow2.f32 %v5224_v5  ;;  %v5115_v24 = vmul.f32 -1.442695, %v9355_v2  ;;  %v9356_v5 = vld [vmem:[#allocation6_spill] sm:$0xff] }
 0x3ab   : > { %v6405_v18 = vpop.eup %6404  ;;  %6424 = vrcp.f32 %v3167_v17  ;;  %v3168_v38 = vadd.f32 1.0, %v6403_v8  ;;  %v5234_v22 = vmul.f32 -1.442695, %v9356_v5  ;;  %v8550_v17 = vpop.f32.mrb[143].mxu1 }
 0x3ac   : > { %v6407_v41 = vpop.eup %6406  ;;  %v4108_v10 = vmul.f32 %v6405_v18, %v9325_v51  ;;  %6426 = vrcp.f32 %v3049_v57  ;;  %9357 = vst [vmem:[#allocation29_spill] sm:$0xff] %v8550_v17  ;;  %v9358_v57 = vld [vmem:[#allocation16_spill] sm:$0xff] }
 0x3ad   : > { %v6409_v63 = vpop.eup %6408  ;;  %v3990_v28 = vmul.f32 %v6407_v41, %v9326_v7  ;;  %6428 = vrcp.f32 %v3168_v38  ;;  %v5116_v18 = vmul.f32 -1.442695, %v9358_v57 }
 0x3ae   : > { %v6411_v25 = vpop.eup %6410  ;;  %v4353_v39 = vadd.f32 %v4352_v9, %v4108_v10  ;;  %v4117_v50 = vmul.f32 %v6409_v63, %v9329_v30  ;;  %6430 = vpow2.f32 %v5106_v62  ;;  %v9359_v30 = vld [vmem:[#allocation17_spill] sm:$0xff] }
 0x3af   : > { %v6413_v8 = vpop.eup %6412  ;;  %v4403_v21 = vadd.f32 %v4402_v34, %v3990_v28  ;;  %v3999_v51 = vmul.f32 %v6411_v25, %v9330_v11  ;;  %6432 = vpow2.f32 %v5233_v1  ;;  %v5243_v62 = vmul.f32 -1.442695, %v9359_v30  ;;  %v8557_v1 = vpop.f32.mrb[144].mxu1 }
 0x3b0   : > { %v6415_v43 = vpop.eup %6414  ;;  %v4323_v32 = vadd.f32 %v4322_v56, %v4117_v50  ;;  %v3050_v7 = vadd.f32 1.0, %v6413_v8  ;;  %6434 = vpow2.f32 %v5115_v24  ;;  %9360 = vst [vmem:[#allocation28_spill] sm:$0xff] %v8557_v1  ;;  %v9361_v24 = vld [vmem:[#allocation18_spill] sm:$0xff]  ;;  %v8560_v25 = vpop.f32.mrb[145].mxu1  ;;  %v9363_v8 = vld [vmem:[#allocation19_spill] sm:$0xff] }
 0x3b1   : > { %v6417_v38 = vpop.eup %6416  ;;  %v4373_v41 = vadd.f32 %v4372_v19, %v3999_v51  ;;  %v4118_v9 = vmul.f32 %v6415_v43, %v9333_v53  ;;  %6436 = vpow2.f32 %v5234_v22  ;;  %v5125_v19 = vmul.f32 -1.442695, %v9361_v24  ;;  %9362 = vst [vmem:[#allocation31_spill] sm:$0xff] %v8560_v25  ;;  %v9367_v1 = vld [vmem:[#allocation46_spill] sm:$0xff] }
 0x3b2   : > { %v6419_v10 = vpop.eup %6418  ;;  %6438 = vrcp.f32 %v3050_v7  ;;  %v3177_v63 = vadd.f32 1.0, %v6417_v38  ;;  %v5244_v51 = vmul.f32 -1.442695, %v9363_v8  ;;  %v8563_v7 = vpop.f32.mrb[146].mxu1  ;;  %v5135_v17 = vmul.f32 -1.442695, %v9367_v1 }
 0x3b3   : > { %v6421_v34 = vpop.eup %6420  ;;  %v4354_v28 = vadd.f32 %v4353_v39, %v4118_v9  ;;  %v4000_v11 = vmul.f32 %v6419_v10, %v9336_v59  ;;  %6440 = vpow2.f32 %v5116_v18  ;;  %9364 = vst [vmem:[#allocation30_spill] sm:$0xff] %v8563_v7  ;;  %v9365_v18 = vld [vmem:[#allocation50_spill] sm:$0xff]  ;;  %v8567_v9 = vpop.f32.mrb[147].mxu1 }
 0x3b4   : > { %v6423_v56 = vpop.eup %6422  ;;  %6442 = vrcp.f32 %v3177_v63  ;;  %v3059_v50 = vadd.f32 1.0, %v6421_v34  ;;  %v5126_v38 = vmul.f32 -1.442695, %v9365_v18  ;;  %9366 = vst [vmem:[#allocation49_spill] sm:$0xff] %v8567_v9 }
 0x3b5   : > { %v6425_v53 = vpop.eup %6424  ;;  %v4404_v43 = vadd.f32 %v4403_v21, %v4000_v11  ;;  %v3178_v22 = vadd.f32 1.0, %v6423_v56  ;;  %6444 = vpow2.f32 %v5243_v62 }
 0x3b6   : > { %v6427_v39 = vpop.eup %6426  ;;  %v4127_v59 = vmul.f32 %v6425_v53, %v9339_v36  ;;  %6446 = vrcp.f32 %v3059_v50 }
 0x3b7   : > { %v6429_v10 = vpop.eup %6428  ;;  %v4009_v63 = vmul.f32 %v6427_v39, %v9340_v47  ;;  %6448 = vrcp.f32 %v3178_v22  ;;  %v8572_v47 = vpop.f32.mrb[148].mxu1 }
 0x3b8   : > { %v6431_v34 = vpop.eup %6430  ;;  %v4324_v21 = vadd.f32 %v4323_v32, %v4127_v59  ;;  %v4128_v62 = vmul.f32 %v6429_v10, %v9341_v45  ;;  %6450 = vpow2.f32 %v5125_v19  ;;  %v8574_v45 = vpop.f32.mrb[149].mxu1 }
 0x3b9   : > { %v6433_v11 = vpop.eup %6432  ;;  %v4374_v56 = vadd.f32 %v4373_v41, %v4009_v63  ;;  %v3060_v7 = vadd.f32 1.0, %v6431_v34  ;;  %6452 = vpow2.f32 %v5244_v51  ;;  %9368 = vst [vmem:[#allocation33_spill] sm:$0xff] %v8574_v45  ;;  %v9369_v51 = vld [vmem:[#allocation51_spill] sm:$0xff]  ;;  %v8578_v39 = vpop.f32.mrb[150].mxu1  ;;  %v9372_v34 = vld [vmem:[#allocation52_spill] sm:$0xff] }
 0x3ba   : > { %v6435_v25 = vpop.eup %6434  ;;  %v4355_v36 = vadd.f32 %v4354_v28, %v4128_v62  ;;  %v3187_v50 = vadd.f32 1.0, %v6433_v11  ;;  %6454 = vpow2.f32 %v5126_v38  ;;  %v4937_v28 = vmul.f32 -1.442695, %v9369_v51  ;;  %9370 = vst [vmem:[#allocation32_spill] sm:$0xff] %v8578_v39 }
 0x3bb   : > { %v6437_v53 = vpop.eup %6436  ;;  %6456 = vrcp.f32 %v3060_v7  ;;  %v3069_v9 = vadd.f32 1.0, %v6435_v25  ;;  %v8580_v7 = vpop.f32.mrb[151].mxu1  ;;  %v5136_v62 = vmul.f32 -1.442695, %v9372_v34 }
 0x3bc   : > { %v6439_v22 = vpop.eup %6438  ;;  %6458 = vrcp.f32 %v3187_v50  ;;  %v3188_v32 = vadd.f32 1.0, %v6437_v53  ;;  %9371 = vst [vmem:[#allocation6_spill] sm:$0xff] %v8580_v7 }
 0x3bd   : > { %v6441_v19 = vpop.eup %6440  ;;  %v4010_v41 = vmul.f32 %v6439_v22, %v9344_v4  ;;  %6460 = vrcp.f32 %v3069_v9  ;;  %v9373_v9 = vld [vmem:[#allocation20_spill] sm:$0xff] }
 0x3be   : > { %v6443_v59 = vpop.eup %6442  ;;  %6462 = vrcp.f32 %v3188_v32  ;;  %v3070_v25 = vadd.f32 1.0, %v6441_v19  ;;  %v4938_v50 = vmul.f32 -1.442695, %v9373_v9 }
 0x3bf   : > { %v6445_v38 = vpop.eup %6444  ;;  %v4405_v10 = vadd.f32 %v4404_v43, %v4010_v41  ;;  %v4137_v63 = vmul.f32 %v6443_v59, %v9347_v35  ;;  %6464 = vpow2.f32 %v5135_v17 }
 0x3c0   : > { %v6447_v11 = vpop.eup %6446  ;;  %6466 = vrcp.f32 %v3070_v25  ;;  %v3197_v4 = vadd.f32 1.0, %v6445_v38  ;;  %v9374_v25 = vld [vmem:[#allocation9_spill] sm:$0xff] }
 0x3c1   : > { %v6449_v53 = vpop.eup %6448  ;;  %v4325_v22 = vadd.f32 %v4324_v21, %v4137_v63  ;;  %v4019_v39 = vmul.f32 %v6447_v11, %v9348_v0  ;;  %6468 = vpow2.f32 %v4937_v28  ;;  %v5145_v38 = vmul.f32 -1.442695, %v9374_v25  ;;  %v9375_v63 = vld [vmem:[#allocation21_spill] sm:$0xff]  ;;  %v8589_v28 = vpop.f32.mrb[152].mxu1 }
 0x3c2   : > { %v6451_v32 = vpop.eup %6450  ;;  %v4138_v19 = vmul.f32 %v6449_v53, %v9349_v31  ;;  %6470 = vrcp.f32 %v3197_v4  ;;  %v4947_v0 = vmul.f32 -1.442695, %v9375_v63  ;;  %v4948_v4 = vmul.f32 -1.442695, %v8335_v55 }
 0x3c3   : > { %v6453_v43 = vpop.eup %6452  ;;  %v4375_v41 = vadd.f32 %v4374_v56, %v4019_v39  ;;  %v3079_v35 = vadd.f32 1.0, %v6451_v32  ;;  %6472 = vpow2.f32 %v5136_v62  ;;  %v5146_v56 = vmul.f32 -1.442695, %v8333_v29  ;;  %v8593_v39 = vpop.f32.mrb[153].mxu1 }
 0x3c4   : > { %v6455_v17 = vpop.eup %6454  ;;  %v4356_v59 = vadd.f32 %v4355_v36, %v4138_v19  ;;  %v3198_v7 = vadd.f32 1.0, %v6453_v43  ;;  %6474 = vpow2.f32 %v4938_v50  ;;  %v8597_v50 = vpop.f32.mrb[154].mxu1 }
 0x3c5   : > { %v6457_v45 = vpop.eup %6456  ;;  %6476 = vrcp.f32 %v3079_v35  ;;  %v3080_v21 = vadd.f32 1.0, %v6455_v17  ;;  %9376 = vst [vmem:[#allocation16_spill] sm:$0xff] %v8597_v50  ;;  %v8600_v43 = vpop.f32.mrb[155].mxu1  ;;  %v5155_v35 = vmul.f32 -1.442695, %v8345_v48 }
 0x3c6   : > { %v6459_v11 = vpop.eup %6458  ;;  %v4020_v31 = vmul.f32 %v6457_v45, %v9352_v23  ;;  %6478 = vrcp.f32 %v3198_v7 }
 0x3c7   : > { %v6461_v36 = vpop.eup %6460  ;;  %v4147_v62 = vmul.f32 %v6459_v11, %v9354_v60  ;;  %6480 = vrcp.f32 %v3080_v21 }
 0x3c8   : > { %v6463_v53 = vpop.eup %6462  ;;  %v4406_v32 = vadd.f32 %v4405_v10, %v4020_v31  ;;  %v4029_v19 = vmul.f32 %v6461_v36, %v9355_v2  ;;  %6482 = vpow2.f32 %v5145_v38  ;;  %v4957_v2 = vmul.f32 -1.442695, %v8347_v33 }
 0x3c9   : > { %v6465_v23 = vpop.eup %6464  ;;  %v4326_v45 = vadd.f32 %v4325_v22, %v4147_v62  ;;  %v4148_v7 = vmul.f32 %v6463_v53, %v9356_v5  ;;  %6484 = vpow2.f32 %v4947_v0  ;;  %v8607_v0 = vpop.f32.mrb[156].mxu1 }
 0x3ca   : > { %v6467_v60 = vpop.eup %6466  ;;  %v4376_v17 = vadd.f32 %v4375_v41, %v4029_v19  ;;  %v3089_v21 = vadd.f32 1.0, %v6465_v23  ;;  %6486 = vpow2.f32 %v5146_v56  ;;  %v8610_v62 = vpop.f32.mrb[157].mxu1  ;;  %v4958_v19 = vmul.f32 -1.442695, %v8354_v20 }
 0x3cb   : > { %v6469_v11 = vpop.eup %6468  ;;  %v4357_v50 = vadd.f32 %v4356_v59, %v4148_v7  ;;  %v4030_v10 = vmul.f32 %v6467_v60, %v9358_v57  ;;  %6488 = vpow2.f32 %v4948_v4  ;;  %v5156_v59 = vmul.f32 -1.442695, %v8351_v61  ;;  %v8613_v23 = vpop.f32.mrb[158].mxu1 }
 0x3cc   : > { %v6471_v38 = vpop.eup %6470  ;;  %6490 = vrcp.f32 %v3089_v21  ;;  %v2891_v31 = vadd.f32 1.0, %v6469_v11  ;;  %9377 = vst [vmem:[#allocation17_spill] sm:$0xff] %v8613_v23  ;;  %v5165_v7 = vmul.f32 -1.442695, %v8369_v13 }
 0x3cd   : > { %v6473_v22 = vpop.eup %6472  ;;  %v4407_v36 = vadd.f32 %v4406_v32, %v4030_v10  ;;  %v4157_v5 = vmul.f32 %v6471_v38, %v9359_v30  ;;  %6492 = vpow2.f32 %v5155_v35  ;;  %v8617_v35 = vpop.f32.mrb[159].mxu1 }
 0x3ce   : > { %v6475_v41 = vpop.eup %6474  ;;  %6494 = vrcp.f32 %v2891_v31  ;;  %v3090_v56 = vadd.f32 1.0, %v6473_v22  ;;  %9378 = vst [vmem:[#allocation18_spill] sm:$0xff] %v8617_v35 }
 0x3cf   : > { %v6477_v57 = vpop.eup %6476  ;;  %v4327_v4 = vadd.f32 %v4326_v45, %v4157_v5  ;;  %v2892_v53 = vadd.f32 1.0, %v6475_v41  ;;  %6496 = vpow2.f32 %v4957_v2 }
 0x3d0   : > { %v6479_v32 = vpop.eup %6478  ;;  %v4039_v30 = vmul.f32 %v6477_v57, %v9361_v24  ;;  %6498 = vrcp.f32 %v3090_v56 }
 0x3d1   : > { %v6481_v60 = vpop.eup %6480  ;;  %v4540_v21 = vrot.slane %v4327_v4, 4  ;;  %v4158_v11 = vmul.f32 %v6479_v32, %v9363_v8  ;;  %6500 = vrcp.f32 %v2892_v53  ;;  %v8621_v53 = vpop.f32.mrb[160].mxu1 }
 0x3d2   : > { %v6483_v45 = vpop.eup %6482  ;;  %v4377_v10 = vadd.f32 %v4376_v17, %v4039_v30  ;;  %v4040_v2 = vmul.f32 %v6481_v60, %v9365_v18  ;;  %6502 = vpow2.f32 %v5156_v59  ;;  %v4967_v59 = vmul.f32 -1.442695, %v8371_v58 }
 0x3d3   : > { %v6485_v38 = vpop.eup %6484  ;;  %v4541_v31 = vadd.f32 %v4540_v21, %v4327_v4  ;;  %v4358_v22 = vadd.f32 %v4357_v50, %v4158_v11  ;;  %v3099_v5 = vadd.f32 1.0, %v6483_v45  ;;  %6504 = vpow2.f32 %v4958_v19  ;;  %v8624_v4 = vpop.f32.mrb[161].mxu1 }
 0x3d4   : > { %v6487_v24 = vpop.eup %6486  ;;  %v4408_v41 = vadd.f32 %v4407_v36, %v4040_v2  ;;  %v2901_v56 = vadd.f32 1.0, %v6485_v38  ;;  %6506 = vpow2.f32 %v5165_v7  ;;  %v8627_v30 = vpop.f32.mrb[162].mxu1 }
 0x3d5   : > { %v6489_v57 = vpop.eup %6488  ;;  %v4542_v35 = vrot.slane %v4541_v31, 2  ;;  %v4546_v23 = vrot.slane %v4358_v22, 4  ;;  %6508 = vrcp.f32 %v3099_v5  ;;  %v3100_v8 = vadd.f32 1.0, %v6487_v24  ;;  %v8629_v21 = vpop.f32.mrb[163].mxu1 }
 0x3d6   : > { %v6491_v17 = vpop.eup %6490  ;;  %6510 = vrcp.f32 %v2901_v56  ;;  %v2902_v18 = vadd.f32 1.0, %v6489_v57  ;;  %v4968_v57 = vmul.f32 -1.442695, %v8385_v12 }
 0x3d7   : > { %v6493_v50 = vpop.eup %6492  ;;  %v4543_v19 = vadd.f32 %v4542_v35, %v4541_v31  ;;  %v4547_v32 = vadd.f32 %v4546_v23, %v4358_v22  ;;  %v4049_v36 = vmul.f32 %v6491_v17, %v9367_v1  ;;  %6512 = vrcp.f32 %v3100_v8 }
 0x3d8   : > { %v6495_v7 = vpop.eup %6494  ;;  %6514 = vrcp.f32 %v2902_v18  ;;  %v3109_v60 = vadd.f32 1.0, %v6493_v50  ;;  %v5166_v35 = vmul.f32 -1.442695, %v8382_v14 }
 0x3d9   : > { %v6497_v11 = vpop.eup %6496  ;;  %v4544_v45 = vrot.slane %v4543_v19, 1  ;;  %v4548_v2 = vrot.slane %v4547_v32, 2  ;;  %v4378_v38 = vadd.f32 %v4377_v10, %v4049_v36  ;;  %v5175_v10 = vmul.f32 -1.442695, %v8398_v27  ;;  %v8635_v36 = vpop.f32.mrb[164].mxu1 }
 0x3da   : > { %v6499_v5 = vpop.eup %6498  ;;  %6516 = vrcp.f32 %v3109_v60  ;;  %v2911_v24 = vadd.f32 1.0, %v6497_v11  ;;  %9379 = vst [vmem:[#allocation19_spill] sm:$0xff] %v8635_v36 }
 0x3db   : > { %v6501_v23 = vpop.eup %6500  ;;  %v4545_v31 = vadd.f32 %v4544_v45, %v4543_v19  ;;  %v4549_v1 = vadd.f32 %v4548_v2, %v4547_v32  ;;  %v4050_v22 = vmul.f32 %v6499_v5, %v9372_v34  ;;  %6518 = vpow2.f32 %v4967_v59  ;;  %v8639_v59 = vpop.f32.mrb[165].mxu1 }
 0x3dc   : > { %v6503_v56 = vpop.eup %6502  ;;  %6520 = vrcp.f32 %v2911_v24  ;;  %v4977_v19 = vmul.f32 -1.442695, %v8400_v46  ;;  %v5176_v34 = vmul.f32 -1.442695, %v8403_v42  ;;  %9380 = vst [vmem:[#allocation50_spill] sm:$0xff] %v8639_v59  ;;  %v8643_v5 = vpop.f32.mrb[166].mxu1 }
 0x3dd   : > { %v6505_v8 = vpop.eup %6504  ;;  %v4550_v17 = vrot.slane %v4549_v1, 1  ;;  %v4409_v18 = vadd.f32 %v4408_v41, %v4050_v22  ;;  %v3110_v50 = vadd.f32 1.0, %v6503_v56  ;;  %6522 = vpow2.f32 %v5166_v35  ;;  %9381 = vst [vmem:[#allocation46_spill] sm:$0xff] %v8643_v5 }
 0x3de   : > { %v6507_v60 = vpop.eup %6506  ;;  %v2912_v11 = vadd.f32 1.0, %v6505_v8  ;;  %v8641_v45 = vmul.f32 0.00390625, %v4545_v31  ;;  %v4978_v35 = vmul.f32 -1.442695, %v8405_v49  ;;  %v5185_v56 = vmul.f32 -1.442695, %v8408_v40 }
 0x3df   : > { %v6509_v32 = vpop.eup %6508  ;;  %v4551_v2 = vadd.f32 %v4550_v17, %v4549_v1  ;;  %6524 = vrcp.f32 %v3110_v50  ;;  %v3119_v41 = vadd.f32 1.0, %v6507_v60  ;;  %v8648_v8 = vpop.f32.mrb[167].mxu1  ;;  %v3851_v31 = vmul.f32 %v6495_v7, %v9369_v51 }
 0x3e0   : > { %v6511_v24 = vpop.eup %6510  ;;  %v4059_v22 = vmul.f32 %v6509_v32, %v9374_v25  ;;  %6526 = vrcp.f32 %v2912_v11  ;;  %9382 = vst [vmem:[#allocation51_spill] sm:$0xff] %v8648_v8  ;;  %v3852_v50 = vmul.f32 %v6501_v23, %v9373_v9  ;;  %v9383_v9 = vld [vmem:[#allocation8_spill] sm:$0xff]  ;;  %v8661_v23 = vpop.f32.mrb[168].mxu1 }
 0x3e1   : > { %v6513_v36 = vpop.eup %6512  ;;  %v8650_v59 = vmul.f32 0.00390625, %v4551_v2  ;;  %v3861_v1 = vmul.f32 %v6511_v24, %v9375_v63  ;;  %6528 = vrcp.f32 %v3119_v41  ;;  %v8664_v24 = vpop.f32.mrb[169].mxu1 }
 0x3e2   : > { %v6515_v17 = vpop.eup %6514  ;;  %v4379_v60 = vadd.f32 %v4378_v38, %v4059_v22  ;;  %v4060_v25 = vmul.f32 %v6513_v36, %v8333_v29  ;;  %6530 = vpow2.f32 %v4968_v57  ;;  %v4987_v38 = vmul.f32 -1.442695, %v9383_v9  ;;  %v9384_v36 = vld [vmem:[#allocation23_spill] sm:$0xff] }
 0x3e3   : > { %v4598_v11 = vcombine.low %v8641_v45, %v8650_v59  ;;  %v4421_v32 = vadd.f32 %v3861_v1, %v3851_v31  ;;  %v3862_v8 = vmul.f32 %v6515_v17, %v8335_v55  ;;  %6532 = vpow2.f32 %v5175_v10  ;;  %v8667_v10 = vpop.f32.mrb[170].mxu1 }
 0x3e4   : > { %v6517_v2 = vpop.eup %6516  ;;  %v4410_v5 = vadd.f32 %v4409_v18, %v4060_v25  ;;  %6534 = vpow2.f32 %v4977_v19  ;;  %v5186_v41 = vmul.f32 -1.442695, %v9384_v36  ;;  %v8670_v22 = vpop.f32.mrb[171].mxu1 }
 0x3e5   : > { %v6519_v51 = vpop.eup %6518  ;;  %v4452_v63 = vadd.f32 %v3862_v8, %v3852_v50  ;;  %v4069_v7 = vmul.f32 %v6517_v2, %v8345_v48  ;;  %6536 = vpow2.f32 %v5176_v34  ;;  %v9385_v48 = vld [vmem:[#allocation36_spill] sm:$0xff] }
 0x3e6   : > { %v6521_v29 = vpop.eup %6520  ;;  %v2921_v57 = vadd.f32 1.0, %v6519_v51  ;;  %6538 = vpow2.f32 %v4978_v35  ;;  %v4988_v34 = vmul.f32 -1.442695, %v9385_v48  ;;  %v5195_v35 = vmul.f32 -1.442695, %v8422_v44 }
 0x3e7   : > { %v4380_v55 = vadd.f32 %v4379_v60, %v4069_v7  ;;  %v3871_v18 = vmul.f32 %v6521_v29, %v8347_v33  ;;  %6540 = vpow2.f32 %v5185_v56  ;;  %v6523_v19 = vpop.eup %6522  ;;  %v4997_v33 = vmul.f32 -1.442695, %v8424_v26  ;;  %v8677_v29 = vpop.f32.mrb[172].mxu1 }
 0x3e8   : > { %6542 = vrcp.f32 %v2921_v57  ;;  %v3120_v1 = vadd.f32 1.0, %v6523_v19 }
 0x3e9   : > { %v6525_v8 = vpop.eup %6524  ;;  %v4422_v31 = vadd.f32 %v4421_v32, %v3871_v18  ;;  %6544 = vpow2.f32 %v4987_v38  ;;  %v8679_v18 = vpop.f32.mrb[173].mxu1 }
 0x3ea   : > { %v6527_v17 = vpop.eup %6526  ;;  %v4070_v50 = vmul.f32 %v6525_v8, %v8351_v61  ;;  %6546 = vpow2.f32 %v5186_v41  ;;  %v8681_v8 = vpop.f32.mrb[174].mxu1 }
 0x3eb   : > { %v6529_v56 = vpop.eup %6528  ;;  %v3872_v60 = vmul.f32 %v6527_v17, %v8354_v20  ;;  %6548 = vrcp.f32 %v3120_v1 }
 0x3ec   : > { %v6531_v25 = vpop.eup %6530  ;;  %v4411_v2 = vadd.f32 %v4410_v5, %v4070_v50  ;;  %v4079_v51 = vmul.f32 %v6529_v56, %v8369_v13  ;;  %6550 = vpow2.f32 %v4988_v34  ;;  %v8683_v34 = vpop.f32.mrb[175].mxu1 }
 0x3ed   : > { %v6533_v32 = vpop.eup %6532  ;;  %v4453_v7 = vadd.f32 %v4452_v63, %v3872_v60  ;;  %v2922_v38 = vadd.f32 1.0, %v6531_v25  ;;  %6552 = vpow2.f32 %v5195_v35  ;;  %v5196_v35 = vmul.f32 -1.442695, %v8428_v54 }
 0x3ee   : > { %v6535_v57 = vpop.eup %6534  ;;  %v4381_v61 = vadd.f32 %v4380_v55, %v4079_v51  ;;  %v3129_v41 = vadd.f32 1.0, %v6533_v32  ;;  %6554 = vpow2.f32 %v4997_v33  ;;  %v4998_v25 = vmul.f32 -1.442695, %v8433_v37 }
 0x3ef   : > { %v6537_v19 = vpop.eup %6536  ;;  %6556 = vrcp.f32 %v2922_v38  ;;  %v2931_v20 = vadd.f32 1.0, %v6535_v57 }
 0x3f0   : > { %v6539_v5 = vpop.eup %6538  ;;  %6558 = vrcp.f32 %v3129_v41  ;;  %v3130_v13 = vadd.f32 1.0, %v6537_v19 }
 0x3f1   : > { %v6541_v63 = vpop.eup %6540  ;;  %6560 = vrcp.f32 %v2931_v20  ;;  %v2932_v1 = vadd.f32 1.0, %v6539_v5 }
 0x3f2   : > { %v6543_v55 = vpop.eup %6542  ;;  %6562 = vrcp.f32 %v3130_v13  ;;  %v3139_v17 = vadd.f32 1.0, %v6541_v63  ;;  %v5205_v63 = vmul.f32 -1.442695, %v8438_v15 }
 0x3f3   : > { %v6545_v50 = vpop.eup %6544  ;;  %v3881_v33 = vmul.f32 %v6543_v55, %v8371_v58  ;;  %6564 = vrcp.f32 %v2932_v1 }
 0x3f4   : > { %v6547_v56 = vpop.eup %6546  ;;  %6566 = vrcp.f32 %v3139_v17  ;;  %v2941_v60 = vadd.f32 1.0, %v6545_v50 }
 0x3f5   : > { %v6549_v51 = vpop.eup %6548  ;;  %v4423_v32 = vadd.f32 %v4422_v31, %v3881_v33  ;;  %v3140_v38 = vadd.f32 1.0, %v6547_v56  ;;  %6568 = vpow2.f32 %v5196_v35  ;;  %v5007_v31 = vmul.f32 -1.442695, %v8445_v6 }
 0x3f6   : > { %v6551_v57 = vpop.eup %6550  ;;  %v4080_v41 = vmul.f32 %v6549_v51, %v8382_v14  ;;  %6570 = vrcp.f32 %v2941_v60  ;;  %v5206_v14 = vmul.f32 -1.442695, %v8450_v52  ;;  %v5215_v51 = vmul.f32 -1.442695, %v8459_v3 }
 0x3f7   : > { %v6553_v19 = vpop.eup %6552  ;;  %6572 = vrcp.f32 %v3140_v38  ;;  %v2942_v20 = vadd.f32 1.0, %v6551_v57 }
 0x3f8   : > { %v6555_v5 = vpop.eup %6554  ;;  %v4412_v13 = vadd.f32 %v4411_v2, %v4080_v41  ;;  %v3149_v58 = vadd.f32 1.0, %v6553_v19  ;;  %6574 = vpow2.f32 %v4998_v25  ;;  %v5008_v2 = vmul.f32 -1.442695, %v8452_v16  ;;  %v9386_v41 = vld [vmem:[#allocation37_spill] sm:$0xff] }
 0x3f9   : > { %v6557_v1 = vpop.eup %6556  ;;  %6576 = vrcp.f32 %v2942_v20  ;;  %v2951_v55 = vadd.f32 1.0, %v6555_v5  ;;  %v5017_v19 = vmul.f32 -1.442695, %v9386_v41 }
 0x3fa   : > { %v6559_v17 = vpop.eup %6558  ;;  %v3882_v35 = vmul.f32 %v6557_v1, %v8385_v12  ;;  %6578 = vrcp.f32 %v3149_v58 }
 0x3fb   : > { %v6561_v50 = vpop.eup %6560  ;;  %v4089_v33 = vmul.f32 %v6559_v17, %v8398_v27  ;;  %6580 = vrcp.f32 %v2951_v55 }
 0x3fc   : > { %v6563_v56 = vpop.eup %6562  ;;  %v4454_v60 = vadd.f32 %v4453_v7, %v3882_v35  ;;  %v3891_v25 = vmul.f32 %v6561_v50, %v8400_v46  ;;  %6582 = vpow2.f32 %v5205_v63  ;;  %v9387_v46 = vld [vmem:[#allocation38_spill] sm:$0xff] }
 0x3fd   : > { %v6565_v38 = vpop.eup %6564  ;;  %v4382_v57 = vadd.f32 %v4381_v61, %v4089_v33  ;;  %v4090_v12 = vmul.f32 %v6563_v56, %v8403_v42  ;;  %6584 = vpow2.f32 %v5007_v31  ;;  %v5216_v63 = vmul.f32 -1.442695, %v9387_v46  ;;  %v9388_v42 = vld [vmem:[#allocation39_spill] sm:$0xff] }
 0x3fe   : > { %v6567_v20 = vpop.eup %6566  ;;  %v4424_v5 = vadd.f32 %v4423_v32, %v3891_v25  ;;  %v3892_v27 = vmul.f32 %v6565_v38, %v8405_v49  ;;  %6586 = vpow2.f32 %v5206_v14  ;;  %v5018_v31 = vmul.f32 -1.442695, %v9388_v42 }
 0x3ff   : > { %v6569_v58 = vpop.eup %6568  ;;  %v4413_v1 = vadd.f32 %v4412_v13, %v4090_v12  ;;  %v4099_v7 = vmul.f32 %v6567_v20, %v8408_v40  ;;  %6588 = vpow2.f32 %v5008_v2  ;;  %v9389_v13 = vld [vmem:[#allocation40_spill] sm:$0xff] }
 0x400   : > { %v6571_v55 = vpop.eup %6570  ;;  %v4455_v17 = vadd.f32 %v4454_v60, %v3892_v27  ;;  %v3150_v61 = vadd.f32 1.0, %v6569_v58  ;;  %6590 = vpow2.f32 %v5215_v51  ;;  %v5225_v40 = vmul.f32 -1.442695, %v9389_v13  ;;  %v9390_v60 = vld [vmem:[#allocation11_spill] sm:$0xff] }
 0x401   : > { %v6573_v35 = vpop.eup %6572  ;;  %v4383_v50 = vadd.f32 %v4382_v57, %v4099_v7  ;;  %v3901_v32 = vmul.f32 %v6571_v55, %v9383_v9  ;;  %6592 = vpow2.f32 %v5017_v19  ;;  %v5027_v25 = vmul.f32 -1.442695, %v9390_v60  ;;  %v9391_v57 = vld [vmem:[#allocation41_spill] sm:$0xff] }
 0x402   : > { %v6575_v49 = vpop.eup %6574  ;;  %v4100_v14 = vmul.f32 %v6573_v35, %v9384_v36  ;;  %6594 = vrcp.f32 %v3150_v61  ;;  %v5226_v9 = vmul.f32 -1.442695, %v9391_v57 }
 0x403   : > { %v6577_v33 = vpop.eup %6576  ;;  %v4425_v2 = vadd.f32 %v4424_v5, %v3901_v32  ;;  %v2952_v56 = vadd.f32 1.0, %v6575_v49  ;;  %6596 = vpow2.f32 %v5216_v63  ;;  %v9392_v49 = vld [vmem:[#allocation42_spill] sm:$0xff] }
 0x404   : > { %v6579_v51 = vpop.eup %6578  ;;  %v4414_v38 = vadd.f32 %v4413_v1, %v4100_v14  ;;  %v3902_v12 = vmul.f32 %v6577_v33, %v9385_v48  ;;  %6598 = vpow2.f32 %v5018_v31 }
 0x405   : > { %v6581_v19 = vpop.eup %6580  ;;  %v4109_v20 = vmul.f32 %v6579_v51, %v8422_v44  ;;  %6600 = vrcp.f32 %v2952_v56 }
 0x406   : > { %v6583_v36 = vpop.eup %6582  ;;  %v4456_v27 = vadd.f32 %v4455_v17, %v3902_v12  ;;  %v3911_v58 = vmul.f32 %v6581_v19, %v8424_v26  ;;  %6602 = vpow2.f32 %v5225_v40  ;;  %v5028_v26 = vmul.f32 -1.442695, %v9392_v49 }
 0x407   : > { %v6585_v5 = vpop.eup %6584  ;;  %v4384_v7 = vadd.f32 %v4383_v50, %v4109_v20  ;;  %v3159_v63 = vadd.f32 1.0, %v6583_v36  ;;  %6604 = vpow2.f32 %v5027_v25  ;;  %v9393_v25 = vld [vmem:[#allocation10_spill] sm:$0xff] }
 0x408   : > { %v6587_v55 = vpop.eup %6586  ;;  %v4426_v1 = vadd.f32 %v4425_v2, %v3911_v58  ;;  %v2961_v61 = vadd.f32 1.0, %v6585_v5  ;;  %6606 = vpow2.f32 %v5226_v9  ;;  %v5235_v51 = vmul.f32 -1.442695, %v9393_v25 }
 0x409   : > { %v6589_v48 = vpop.eup %6588  ;;  %6608 = vrcp.f32 %v3159_v63  ;;  %v3160_v31 = vadd.f32 1.0, %v6587_v55 }
 0x40a   : > { %v6591_v35 = vpop.eup %6590  ;;  %6610 = vrcp.f32 %v2961_v61  ;;  %v2962_v44 = vadd.f32 1.0, %v6589_v48  ;;  %v9394_v61 = vld [vmem:[#allocation43_spill] sm:$0xff] }
 0x40b   : > { %v6593_v32 = vpop.eup %6592  ;;  %6612 = vrcp.f32 %v3160_v31  ;;  %v3169_v17 = vadd.f32 1.0, %v6591_v35  ;;  %v5037_v48 = vmul.f32 -1.442695, %v9394_v61 }
 0x40c   : > { %v6595_v14 = vpop.eup %6594  ;;  %6614 = vrcp.f32 %v2962_v44  ;;  %v2971_v50 = vadd.f32 1.0, %v6593_v32  ;;  %v9395_v44 = vld [vmem:[#allocation12_spill] sm:$0xff] }
 0x40d   : > { %v6597_v40 = vpop.eup %6596  ;;  %v4110_v33 = vmul.f32 %v6595_v14, %v8428_v54  ;;  %6616 = vrcp.f32 %v3169_v17 }
 0x40e   : > { %v6599_v2 = vpop.eup %6598  ;;  %6618 = vrcp.f32 %v2971_v50  ;;  %v3170_v56 = vadd.f32 1.0, %v6597_v40 }
 0x40f   : > { %v6601_v12 = vpop.eup %6600  ;;  %v4415_v9 = vadd.f32 %v4414_v38, %v4110_v33  ;;  %v2972_v19 = vadd.f32 1.0, %v6599_v2  ;;  %6620 = vpow2.f32 %v5028_v26  ;;  %v5236_v38 = vmul.f32 -1.442695, %v9395_v44 }
 0x410   : > { %v6603_v20 = vpop.eup %6602  ;;  %v3912_v36 = vmul.f32 %v6601_v12, %v8433_v37  ;;  %6622 = vrcp.f32 %v3170_v56  ;;  %v9396_v37 = vld [vmem:[#allocation44_spill] sm:$0xff] }
 0x411   : > { %v6605_v58 = vpop.eup %6604  ;;  %6624 = vrcp.f32 %v2972_v19  ;;  %v3179_v5 = vadd.f32 1.0, %v6603_v20  ;;  %v5038_v26 = vmul.f32 -1.442695, %v9396_v37 }
 0x412   : > { %v6607_v63 = vpop.eup %6606  ;;  %v4457_v55 = vadd.f32 %v4456_v27, %v3912_v36  ;;  %v2981_v54 = vadd.f32 1.0, %v6605_v58  ;;  %6626 = vpow2.f32 %v5235_v51  ;;  %v9397_v27 = vld [vmem:[#allocation24_spill] sm:$0xff]  ;;  %v9398_v51 = vld [vmem:[#allocation13_spill] sm:$0xff] }
 0x413   : > { %v6609_v31 = vpop.eup %6608  ;;  %6628 = vrcp.f32 %v3179_v5  ;;  %v3180_v35 = vadd.f32 1.0, %v6607_v63  ;;  %v5245_v40 = vmul.f32 -1.442695, %v9397_v27  ;;  %v5047_v12 = vmul.f32 -1.442695, %v9398_v51  ;;  %v9399_v36 = vld [vmem:[#allocation25_spill] sm:$0xff] }
 0x414   : > { %v6611_v32 = vpop.eup %6610  ;;  %v4119_v17 = vmul.f32 %v6609_v31, %v8438_v15  ;;  %6630 = vrcp.f32 %v2981_v54  ;;  %v5246_v58 = vmul.f32 -1.442695, %v9399_v36 }
 0x415   : > { %v6613_v14 = vpop.eup %6612  ;;  %v3921_v50 = vmul.f32 %v6611_v32, %v8445_v6  ;;  %6632 = vrcp.f32 %v3180_v35 }
 0x416   : > { %v6615_v33 = vpop.eup %6614  ;;  %v4385_v2 = vadd.f32 %v4384_v7, %v4119_v17  ;;  %v4120_v56 = vmul.f32 %v6613_v14, %v8450_v52  ;;  %6634 = vpow2.f32 %v5037_v48  ;;  %v9400_v52 = vld [vmem:[#allocation14_spill] sm:$0xff] }
 0x417   : > { %v6617_v19 = vpop.eup %6616  ;;  %v4427_v20 = vadd.f32 %v4426_v1, %v3921_v50  ;;  %v3922_v15 = vmul.f32 %v6615_v33, %v8452_v16  ;;  %6636 = vpow2.f32 %v5236_v38  ;;  %v5048_v48 = vmul.f32 -1.442695, %v9400_v52  ;;  %v9401_v16 = vld [vmem:[#allocation45_spill] sm:$0xff] }
 0x418   : > { %v6619_v5 = vpop.eup %6618  ;;  %v4416_v63 = vadd.f32 %v4415_v9, %v4120_v56  ;;  %v4129_v6 = vmul.f32 %v6617_v19, %v8459_v3  ;;  %6638 = vpow2.f32 %v5038_v26  ;;  %v5057_v38 = vmul.f32 -1.442695, %v9401_v16 }
 0x419   : > { %v6621_v54 = vpop.eup %6620  ;;  %v4458_v31 = vadd.f32 %v4457_v55, %v3922_v15  ;;  %v3931_v7 = vmul.f32 %v6619_v5, %v9386_v41  ;;  %6640 = vpow2.f32 %v5245_v40  ;;  %v9402_v55 = vld [vmem:[#allocation47_spill] sm:$0xff] }
 0x41a   : > { %v6623_v35 = vpop.eup %6622  ;;  %v4386_v32 = vadd.f32 %v4385_v2, %v4129_v6  ;;  %v2982_v1 = vadd.f32 1.0, %v6621_v54  ;;  %6642 = vpow2.f32 %v5047_v12  ;;  %v5058_v41 = vmul.f32 -1.442695, %v9402_v55  ;;  %v9403_v2 = vld [vmem:[#allocation27_spill] sm:$0xff] }
 0x41b   : > { %v6625_v17 = vpop.eup %6624  ;;  %v4428_v14 = vadd.f32 %v4427_v20, %v3931_v7  ;;  %v4130_v9 = vmul.f32 %v6623_v35, %v9387_v46  ;;  %6644 = vpow2.f32 %v5246_v58  ;;  %v5067_v56 = vmul.f32 -1.442695, %v9403_v2  ;;  %v9404_v20 = vld [vmem:[#allocation48_spill] sm:$0xff] }
 0x41c   : > { %v6627_v3 = vpop.eup %6626  ;;  %v3932_v26 = vmul.f32 %v6625_v17, %v9388_v42  ;;  %6646 = vrcp.f32 %v2982_v1  ;;  %v5068_v46 = vmul.f32 -1.442695, %v9404_v20 }
 0x41d   : > { %v6629_v50 = vpop.eup %6628  ;;  %v4417_v40 = vadd.f32 %v4416_v63, %v4130_v9  ;;  %v3189_v33 = vadd.f32 1.0, %v6627_v3  ;;  %6648 = vpow2.f32 %v5048_v48  ;;  %v9405_v3 = vld [vmem:[#allocation26_spill] sm:$0xff] }
 0x41e   : > { %v6631_v12 = vpop.eup %6630  ;;  %v4459_v19 = vadd.f32 %v4458_v31, %v3932_v26  ;;  %v4139_v15 = vmul.f32 %v6629_v50, %v9389_v13  ;;  %6650 = vpow2.f32 %v5057_v38 }
 0x41f   : > { %v6633_v58 = vpop.eup %6632  ;;  %v3941_v5 = vmul.f32 %v6631_v12, %v9390_v60  ;;  %6652 = vrcp.f32 %v3189_v33 }
 0x420   : > { %v6635_v42 = vpop.eup %6634  ;;  %v4387_v6 = vadd.f32 %v4386_v32, %v4139_v15  ;;  %v4140_v54 = vmul.f32 %v6633_v58, %v9391_v57  ;;  %6654 = vpow2.f32 %v5058_v41  ;;  %v5077_v57 = vmul.f32 -1.442695, %v9405_v3 }
 0x421   : > { %v6637_v63 = vpop.eup %6636  ;;  %v4429_v7 = vadd.f32 %v4428_v14, %v3941_v5  ;;  %v2991_v48 = vadd.f32 1.0, %v6635_v42  ;;  %6656 = vpow2.f32 %v5067_v56  ;;  %v9406_v56 = vld [vmem:[#allocation7_spill] sm:$0xff] }
 0x422   : > { %v6639_v35 = vpop.eup %6638  ;;  %v4418_v31 = vadd.f32 %v4417_v40, %v4140_v54  ;;  %v3190_v1 = vadd.f32 1.0, %v6637_v63  ;;  %6658 = vpow2.f32 %v5068_v46  ;;  %v5078_v12 = vmul.f32 -1.442695, %v9406_v56 }
 0x423   : > { %v6641_v13 = vpop.eup %6640  ;;  %6660 = vrcp.f32 %v2991_v48  ;;  %v2992_v38 = vadd.f32 1.0, %v6639_v35 }
 0x424   : > { %v6643_v17 = vpop.eup %6642  ;;  %6662 = vrcp.f32 %v3190_v1  ;;  %v3199_v60 = vadd.f32 1.0, %v6641_v13  ;;  %v9407_v1 = vld [vmem:[#allocation15_spill] sm:$0xff] }
 0x425   : > { %v6645_v9 = vpop.eup %6644  ;;  %6664 = vrcp.f32 %v2992_v38  ;;  %v3001_v32 = vadd.f32 1.0, %v6643_v17  ;;  %v5087_v13 = vmul.f32 -1.442695, %v9407_v1 }
 0x426   : > { %v6647_v26 = vpop.eup %6646  ;;  %6666 = vrcp.f32 %v3199_v60  ;;  %v3200_v14 = vadd.f32 1.0, %v6645_v9  ;;  %v9408_v60 = vld [vmem:[#allocation29_spill] sm:$0xff] }
 0x427   : > { %v6649_v41 = vpop.eup %6648  ;;  %v3942_v50 = vmul.f32 %v6647_v26, %v9392_v49  ;;  %6668 = vrcp.f32 %v3001_v32 }
 0x428   : > { %v6651_v40 = vpop.eup %6650  ;;  %6670 = vrcp.f32 %v3200_v14  ;;  %v3002_v33 = vadd.f32 1.0, %v6649_v41 }
 0x429   : > { %v6653_v15 = vpop.eup %6652  ;;  %v4460_v46 = vadd.f32 %v4459_v19, %v3942_v50  ;;  %v3011_v58 = vadd.f32 1.0, %v6651_v40  ;;  %6672 = vpow2.f32 %v5077_v57  ;;  %v5088_v19 = vmul.f32 -1.442695, %v9408_v60 }
 0x42a   : > { %v6655_v5 = vpop.eup %6654  ;;  %v4149_v42 = vmul.f32 %v6653_v15, %v9393_v25  ;;  %6674 = vrcp.f32 %v3002_v33  ;;  %v9409_v25 = vld [vmem:[#allocation28_spill] sm:$0xff] }
 0x42b   : > { %v6657_v54 = vpop.eup %6656  ;;  %6676 = vrcp.f32 %v3011_v58  ;;  %v3012_v63 = vadd.f32 1.0, %v6655_v5  ;;  %v5097_v57 = vmul.f32 -1.442695, %v9409_v25 }
 0x42c   : > { %v6659_v48 = vpop.eup %6658  ;;  %v4388_v35 = vadd.f32 %v4387_v6, %v4149_v42  ;;  %v3021_v49 = vadd.f32 1.0, %v6657_v54  ;;  %6678 = vpow2.f32 %v5078_v12  ;;  %v9410_v6 = vld [vmem:[#allocation31_spill] sm:$0xff]  ;;  %v9411_v12 = vld [vmem:[#allocation30_spill] sm:$0xff]  ;;  %v9412_v42 = vld [vmem:[#allocation49_spill] sm:$0xff] }
 0x42d   : > { %v6661_v38 = vpop.eup %6660  ;;  %6680 = vrcp.f32 %v3012_v63  ;;  %v3022_v17 = vadd.f32 1.0, %v6659_v48  ;;  %v5098_v41 = vmul.f32 -1.442695, %v9410_v6  ;;  %v5107_v15 = vmul.f32 -1.442695, %v9411_v12 }
 0x42e   : > { %v6663_v9 = vpop.eup %6662  ;;  %v3951_v32 = vmul.f32 %v6661_v38, %v9394_v61  ;;  %6682 = vrcp.f32 %v3021_v49  ;;  %v5108_v54 = vmul.f32 -1.442695, %v9412_v42 }
 0x42f   : > { %v6665_v26 = vpop.eup %6664  ;;  %v4150_v14 = vmul.f32 %v6663_v9, %v9395_v44  ;;  %6684 = vrcp.f32 %v3022_v17 }
 0x430   : > { %v6667_v50 = vpop.eup %6666  ;;  %v4430_v40 = vadd.f32 %v4429_v7, %v3951_v32  ;;  %v3952_v33 = vmul.f32 %v6665_v26, %v9396_v37  ;;  %6686 = vpow2.f32 %v5087_v13 }
 0x431   : > { %v6669_v58 = vpop.eup %6668  ;;  %v4419_v5 = vadd.f32 %v4418_v31, %v4150_v14  ;;  %v4159_v61 = vmul.f32 %v6667_v50, %v9397_v27  ;;  %6688 = vpow2.f32 %v5088_v19  ;;  %v5117_v31 = vmul.f32 -1.442695, %v8572_v47 }
 0x432   : > { %v6671_v63 = vpop.eup %6670  ;;  %v4461_v48 = vadd.f32 %v4460_v46, %v3952_v33  ;;  %v3961_v44 = vmul.f32 %v6669_v58, %v9398_v51  ;;  %6690 = vpow2.f32 %v5097_v57  ;;  %v9414_v58 = vld [vmem:[#allocation32_spill] sm:$0xff] }
 0x433   : > { %v6673_v49 = vpop.eup %6672  ;;  %v4389_v38 = vadd.f32 %v4388_v35, %v4159_v61  ;;  %v4160_v7 = vmul.f32 %v6671_v63, %v9399_v36  ;;  %6692 = vpow2.f32 %v5098_v41  ;;  %v9413_v35 = vld [vmem:[#allocation33_spill] sm:$0xff] }
 0x434   : > { %v6675_v37 = vpop.eup %6674  ;;  %v4431_v13 = vadd.f32 %v4430_v40, %v3961_v44  ;;  %v3031_v17 = vadd.f32 1.0, %v6673_v49  ;;  %6694 = vpow2.f32 %v5107_v15  ;;  %v5118_v57 = vmul.f32 -1.442695, %v9413_v35 }
 0x435   : > { %v6677_v27 = vpop.eup %6676  ;;  %v4552_v19 = vrot.slane %v4389_v38, 4  ;;  %v4420_v9 = vadd.f32 %v4419_v5, %v4160_v7  ;;  %v3962_v32 = vmul.f32 %v6675_v37, %v9400_v52  ;;  %6696 = vpow2.f32 %v5108_v54 }
 0x436   : > { %v6679_v46 = vpop.eup %6678  ;;  %v3971_v51 = vmul.f32 %v6677_v27, %v9401_v16  ;;  %6698 = vrcp.f32 %v3031_v17  ;;  %v5127_v5 = vmul.f32 -1.442695, %v9414_v58 }
 0x437   : > { %v6681_v36 = vpop.eup %6680  ;;  %v4553_v26 = vadd.f32 %v4552_v19, %v4389_v38  ;;  %v4558_v14 = vrot.slane %v4420_v9, 4  ;;  %v4462_v41 = vadd.f32 %v4461_v48, %v3962_v32  ;;  %v3032_v50 = vadd.f32 1.0, %v6679_v46 }
 0x438   : > { %v6683_v40 = vpop.eup %6682  ;;  %v4432_v33 = vadd.f32 %v4431_v13, %v3971_v51  ;;  %v3972_v15 = vmul.f32 %v6681_v36, %v9402_v55  ;;  %6700 = vpow2.f32 %v5117_v31  ;;  %v9415_v51 = vld [vmem:[#allocation6_spill] sm:$0xff] }
 0x439   : > { %v6685_v52 = vpop.eup %6684  ;;  %v4554_v61 = vrot.slane %v4553_v26, 2  ;;  %v4559_v54 = vadd.f32 %v4558_v14, %v4420_v9  ;;  %v3981_v16 = vmul.f32 %v6683_v40, %v9403_v2  ;;  %6702 = vrcp.f32 %v3032_v50 }
 0x43a   : > { %v6687_v63 = vpop.eup %6686  ;;  %v4463_v44 = vadd.f32 %v4462_v41, %v3972_v15  ;;  %v3982_v49 = vmul.f32 %v6685_v52, %v9404_v20  ;;  %6704 = vpow2.f32 %v5118_v57  ;;  %v5128_v20 = vmul.f32 -1.442695, %v9415_v51 }
 0x43b   : > { %v6689_v48 = vpop.eup %6688  ;;  %v4555_v38 = vadd.f32 %v4554_v61, %v4553_v26  ;;  %v4560_v7 = vrot.slane %v4559_v54, 2  ;;  %v4433_v37 = vadd.f32 %v4432_v33, %v3981_v16  ;;  %v3041_v13 = vadd.f32 1.0, %v6687_v63 }
 0x43c   : > { %v6691_v55 = vpop.eup %6690  ;;  %v4464_v17 = vadd.f32 %v4463_v44, %v3982_v49  ;;  %v3042_v31 = vadd.f32 1.0, %v6689_v48  ;;  %6706 = vpow2.f32 %v5127_v5  ;;  %v5137_v40 = vmul.f32 -1.442695, %v8589_v28 }
 0x43d   : > { %v6693_v27 = vpop.eup %6692  ;;  %v4556_v19 = vrot.slane %v4555_v38, 1  ;;  %v4561_v9 = vadd.f32 %v4560_v7, %v4559_v54  ;;  %6708 = vrcp.f32 %v3041_v13  ;;  %v3051_v2 = vadd.f32 1.0, %v6691_v55  ;;  %v9417_v55 = vld [vmem:[#allocation34_spill] sm:$0xff] }
 0x43e   : > { %v6695_v32 = vpop.eup %6694  ;;  %6710 = vrcp.f32 %v3042_v31  ;;  %v3052_v46 = vadd.f32 1.0, %v6693_v27  ;;  %v5138_v61 = vmul.f32 -1.442695, %v8593_v39  ;;  %v9418_v31 = vld [vmem:[#allocation22_spill] sm:$0xff]  ;;  %v9419_v27 = vld [vmem:[#allocation35_spill] sm:$0xff] }
 0x43f   : > { %v6697_v57 = vpop.eup %6696  ;;  %v4557_v36 = vadd.f32 %v4556_v19, %v4555_v38  ;;  %v4562_v26 = vrot.slane %v4561_v9, 1  ;;  %6712 = vrcp.f32 %v3051_v2  ;;  %v3061_v14 = vadd.f32 1.0, %v6695_v32  ;;  %v9416_v38 = vld [vmem:[#allocation16_spill] sm:$0xff] }
 0x440   : > { %v6699_v41 = vpop.eup %6698  ;;  %6714 = vrcp.f32 %v3052_v46  ;;  %v3062_v50 = vadd.f32 1.0, %v6697_v57  ;;  %v5147_v7 = vmul.f32 -1.442695, %v9416_v38  ;;  %v9420_v19 = vcombine.low %v9418_v31, %v9419_v27 }
 0x441   : > { %v4582_v33 = vmul.f32 0.00390625, %v4557_v36  ;;  %v4563_v15 = vadd.f32 %v4562_v26, %v4561_v9  ;;  %v3991_v5 = vmul.f32 %v6699_v41, %v9405_v3  ;;  %6716 = vrcp.f32 %v3061_v14  ;;  %v9421_v41 = vld [vmem:[#allocation17_spill] sm:$0xff] }
 0x442   : > { %v6701_v52 = vpop.eup %6700  ;;  %6718 = vrcp.f32 %v3062_v50  ;;  %v4636_v9 = vrot.slane %v9420_v19, %v9417_v55  ;;  %v5148_v32 = vmul.f32 -1.442695, %v8600_v43  ;;  %v4620_v57 = vrot.slane %v4598_v11, %v9417_v55 }
 0x443   : > { %v6703_v54 = vpop.eup %6702  ;;  %v4583_v16 = vmul.f32 0.00390625, %v4563_v15  ;;  %v4434_v63 = vadd.f32 %v4433_v37, %v3991_v5  ;;  %v3071_v44 = vadd.f32 1.0, %v6701_v52  ;;  %6720 = vpow2.f32 %v5128_v20  ;;  %v9422_v15 = vld [vmem:[#allocation18_spill] sm:$0xff] }
 0x444   : > { %v6705_v49 = vpop.eup %6704  ;;  %v3992_v48 = vmul.f32 %v6703_v54, %v9406_v56  ;;  %6722 = vpow2.f32 %v5137_v40  ;;  %v5157_v56 = vmul.f32 -1.442695, %v8607_v0  ;;  %v5167_v50 = vmul.f32 -1.442695, %v9421_v41 }
 0x445   : > { %v4599_v13 = vcombine.low %v4582_v33, %v4583_v16  ;;  %6724 = vrcp.f32 %v3071_v44  ;;  %v3072_v3 = vadd.f32 1.0, %v6705_v49  ;;  %v5168_v59 = vmul.f32 -1.442695, %v9422_v15 }
 0x446   : > { %v6707_v2 = vpop.eup %6706  ;;  %v4465_v37 = vadd.f32 %v4464_v17, %v3992_v48  ;;  %6726 = vpow2.f32 %v5138_v61  ;;  %v5158_v17 = vmul.f32 -1.442695, %v8610_v62 }
 0x447   : > { %v6709_v46 = vpop.eup %6708  ;;  %6728 = vrcp.f32 %v3072_v3  ;;  %v3081_v20 = vadd.f32 1.0, %v6707_v2  ;;  %v4627_v36 = vrot.slane %v4599_v13, %v9417_v55 }
 0x448   : > { %v6711_v26 = vpop.eup %6710  ;;  %v4001_v14 = vmul.f32 %v6709_v46, %v9407_v1  ;;  %6730 = vpow2.f32 %v5147_v7  ;;  %v5177_v1 = vmul.f32 -1.442695, %v8621_v53 }
 0x449   : > { %v6713_v40 = vpop.eup %6712  ;;  %v4002_v33 = vmul.f32 %v6711_v26, %v9408_v60  ;;  %6732 = vrcp.f32 %v3081_v20  ;;  %v4629_v45 = vcombine.low %v4620_v57, %v4627_v36  ;;  %v5188_v36 = vmul.f32 -1.442695, %v8629_v21 }
 0x44a   : > { %v6715_v11 = vpop.eup %6714  ;;  %v4435_v5 = vadd.f32 %v4434_v63, %v4001_v14  ;;  %v4011_v52 = vmul.f32 %v6713_v40, %v9409_v25  ;;  %6734 = vpow2.f32 %v5148_v32 }
 0x44b   : > { %v6717_v61 = vpop.eup %6716  ;;  %v4466_v54 = vadd.f32 %v4465_v37, %v4002_v33  ;;  %v4012_v16 = vmul.f32 %v6715_v11, %v9410_v6  ;;  %6736 = vpow2.f32 %v5157_v56  ;;  %v4643_v44 = vrot.slane %v4629_v45, %v9417_v55 }
 0x44c   : > { %v6719_v49 = vpop.eup %6718  ;;  %v4436_v60 = vadd.f32 %v4435_v5, %v4011_v52  ;;  %v4021_v48 = vmul.f32 %v6717_v61, %v9411_v12  ;;  %6738 = vpow2.f32 %v5158_v17  ;;  %v5178_v6 = vmul.f32 -1.442695, %v8624_v4 }
 0x44d   : > { %v6721_v7 = vpop.eup %6720  ;;  %v4467_v63 = vadd.f32 %v4466_v54, %v4012_v16  ;;  %v4022_v25 = vmul.f32 %v6719_v49, %v9412_v42  ;;  %6740 = vpow2.f32 %v5167_v50  ;;  %v4644_v13 = vcombine.low %v4636_v9, %v4643_v44  ;;  %v9423_v16 = vld [vmem:[#allocation19_spill] sm:$0xff] }
 0x44e   : > { %v6723_v3 = vpop.eup %6722  ;;  %v4437_v31 = vadd.f32 %v4436_v60, %v4021_v48  ;;  %v3082_v27 = vadd.f32 1.0, %v6721_v7  ;;  %6742 = vpow2.f32 %v5168_v59  ;;  %v5187_v42 = vmul.f32 -1.442695, %v8627_v30  ;;  %v9424_v60 = vld [vmem:[#allocation50_spill] sm:$0xff] }
 0x44f   : > { %v6725_v19 = vpop.eup %6724  ;;  %v4468_v2 = vadd.f32 %v4467_v63, %v4022_v25  ;;  %v3091_v37 = vadd.f32 1.0, %v6723_v3  ;;  %6744 = vpow2.f32 %v5177_v1  ;;  %4662 = vst [vmem:[%s8796_s26] sm:$0xff] %v4644_v13  ;;  %v5197_v44 = vmul.f32 -1.442695, %v9423_v16  ;;  %v9425_v3 = vld [vmem:[#allocation46_spill] sm:$0xff] }
 0x450   : > { %v6727_v12 = vpop.eup %6726  ;;  %v4031_v32 = vmul.f32 %v6725_v19, %v8572_v47  ;;  %6746 = vrcp.f32 %v3082_v27  ;;  %v5198_v48 = vmul.f32 -1.442695, %v9424_v60 }
 0x451   : > { %v6729_v9 = vpop.eup %6728  ;;  %6748 = vrcp.f32 %v3091_v37  ;;  %v3092_v56 = vadd.f32 1.0, %v6727_v12 }
 0x452   : > { %v6731_v46 = vpop.eup %6730  ;;  %v4438_v20 = vadd.f32 %v4437_v31, %v4031_v32  ;;  %v4032_v57 = vmul.f32 %v6729_v9, %v9413_v35  ;;  %6750 = vpow2.f32 %v5178_v6  ;;  %v5207_v31 = vmul.f32 -1.442695, %v9425_v3  ;;  %v9426_v32 = vld [vmem:[#allocation51_spill] sm:$0xff] }
 0x453   : > { %v6733_v26 = vpop.eup %6732  ;;  %6752 = vrcp.f32 %v3092_v56  ;;  %v3101_v14 = vadd.f32 1.0, %v6731_v46 }
 0x454   : > { %v6735_v17 = vpop.eup %6734  ;;  %v4469_v50 = vadd.f32 %v4468_v2, %v4032_v57  ;;  %v4041_v47 = vmul.f32 %v6733_v26, %v9414_v58  ;;  %6754 = vpow2.f32 %v5187_v42  ;;  %v5208_v42 = vmul.f32 -1.442695, %v9426_v32 }
 0x455   : > { %v6737_v40 = vpop.eup %6736  ;;  %6756 = vrcp.f32 %v3101_v14  ;;  %v3102_v33 = vadd.f32 1.0, %v6735_v17  ;;  %v5218_v26 = vmul.f32 -1.442695, %v8664_v24 }
 0x456   : > { %v6739_v59 = vpop.eup %6738  ;;  %v4439_v45 = vadd.f32 %v4438_v20, %v4041_v47  ;;  %v3111_v11 = vadd.f32 1.0, %v6737_v40  ;;  %6758 = vpow2.f32 %v5188_v36  ;;  %v5217_v20 = vmul.f32 -1.442695, %v8661_v23 }
 0x457   : > { %v6741_v5 = vpop.eup %6740  ;;  %6760 = vrcp.f32 %v3102_v33  ;;  %v3112_v35 = vadd.f32 1.0, %v6739_v59 }
 0x458   : > { %v6743_v52 = vpop.eup %6742  ;;  %6762 = vrcp.f32 %v3111_v11  ;;  %v3121_v1 = vadd.f32 1.0, %v6741_v5  ;;  %v5237_v11 = vmul.f32 -1.442695, %v8677_v29 }
 0x459   : > { %v6745_v61 = vpop.eup %6744  ;;  %6764 = vrcp.f32 %v3112_v35  ;;  %v3122_v54 = vadd.f32 1.0, %v6743_v52  ;;  %v5238_v52 = vmul.f32 -1.442695, %v8679_v18 }
 0x45a   : > { %v6747_v58 = vpop.eup %6746  ;;  %6766 = vrcp.f32 %v3121_v1  ;;  %v3131_v49 = vadd.f32 1.0, %v6745_v61 }
 0x45b   : > { %v6749_v7 = vpop.eup %6748  ;;  %v4042_v63 = vmul.f32 %v6747_v58, %v9415_v51  ;;  %6768 = vrcp.f32 %v3122_v54 }
 0x45c   : > { %v6751_v25 = vpop.eup %6750  ;;  %v4051_v13 = vmul.f32 %v6749_v7, %v8589_v28  ;;  %6770 = vrcp.f32 %v3131_v49  ;;  %v5247_v7 = vmul.f32 -1.442695, %v8681_v8 }
 0x45d   : > { %v6753_v27 = vpop.eup %6752  ;;  %v4470_v6 = vadd.f32 %v4469_v50, %v4042_v63  ;;  %v3132_v19 = vadd.f32 1.0, %v6751_v25  ;;  %6772 = vpow2.f32 %v5197_v44  ;;  %v5227_v50 = vmul.f32 -1.442695, %v8667_v10 }
 0x45e   : > { %v6755_v2 = vpop.eup %6754  ;;  %v4440_v37 = vadd.f32 %v4439_v45, %v4051_v13  ;;  %v4052_v12 = vmul.f32 %v6753_v27, %v8593_v39  ;;  %6774 = vpow2.f32 %v5198_v48 }
 0x45f   : > { %v6757_v9 = vpop.eup %6756  ;;  %6776 = vrcp.f32 %v3132_v19  ;;  %v3141_v51 = vadd.f32 1.0, %v6755_v2 }
 0x460   : > { %v6759_v56 = vpop.eup %6758  ;;  %v4471_v46 = vadd.f32 %v4470_v6, %v4052_v12  ;;  %v4061_v28 = vmul.f32 %v6757_v9, %v9416_v38  ;;  %6778 = vpow2.f32 %v5207_v31  ;;  %v5228_v38 = vmul.f32 -1.442695, %v8670_v22 }
 0x461   : > { %v6761_v57 = vpop.eup %6760  ;;  %6780 = vrcp.f32 %v3141_v51  ;;  %v3142_v36 = vadd.f32 1.0, %v6759_v56 }
 0x462   : > { %v6763_v14 = vpop.eup %6762  ;;  %v4441_v39 = vadd.f32 %v4440_v37, %v4061_v28  ;;  %v4062_v17 = vmul.f32 %v6761_v57, %v8600_v43  ;;  %6782 = vpow2.f32 %v5208_v42 }
 0x463   : > { %v6765_v47 = vpop.eup %6764  ;;  %v4071_v40 = vmul.f32 %v6763_v14, %v8607_v0  ;;  %6784 = vrcp.f32 %v3142_v36 }
 0x464   : > { %v6767_v33 = vpop.eup %6766  ;;  %v4472_v59 = vadd.f32 %v4471_v46, %v4062_v17  ;;  %v4072_v45 = vmul.f32 %v6765_v47, %v8610_v62  ;;  %6786 = vpow2.f32 %v5217_v20 }
 0x465   : > { %v6769_v5 = vpop.eup %6768  ;;  %v4442_v35 = vadd.f32 %v4441_v39, %v4071_v40  ;;  %v4081_v43 = vmul.f32 %v6767_v33, %v9421_v41  ;;  %6788 = vpow2.f32 %v5218_v26 }
 0x466   : > { %v6771_v1 = vpop.eup %6770  ;;  %v4473_v61 = vadd.f32 %v4472_v59, %v4072_v45  ;;  %v4082_v0 = vmul.f32 %v6769_v5, %v9422_v15  ;;  %6790 = vpow2.f32 %v5227_v50  ;;  %v5248_v15 = vmul.f32 -1.442695, %v8683_v34 }
 0x467   : > { %v6773_v54 = vpop.eup %6772  ;;  %v4443_v44 = vadd.f32 %v4442_v35, %v4081_v43  ;;  %v4091_v58 = vmul.f32 %v6771_v1, %v8621_v53  ;;  %6792 = vpow2.f32 %v5228_v38 }
 0x468   : > { %v6775_v62 = vpop.eup %6774  ;;  %v4474_v49 = vadd.f32 %v4473_v61, %v4082_v0  ;;  %v3151_v48 = vadd.f32 1.0, %v6773_v54  ;;  %6794 = vpow2.f32 %v5237_v11 }
 0x469   : > { %v6777_v41 = vpop.eup %6776  ;;  %v4444_v63 = vadd.f32 %v4443_v44, %v4091_v58  ;;  %v3152_v25 = vadd.f32 1.0, %v6775_v62  ;;  %6796 = vpow2.f32 %v5238_v52 }
 0x46a   : > { %v6779_v13 = vpop.eup %6778  ;;  %v4092_v31 = vmul.f32 %v6777_v41, %v8624_v4  ;;  %6798 = vrcp.f32 %v3151_v48 }
 0x46b   : > { %v6781_v27 = vpop.eup %6780  ;;  %6800 = vrcp.f32 %v3152_v25  ;;  %v3161_v53 = vadd.f32 1.0, %v6779_v13 }
 0x46c   : > { %v6783_v6 = vpop.eup %6782  ;;  %v4475_v19 = vadd.f32 %v4474_v49, %v4092_v31  ;;  %v4101_v2 = vmul.f32 %v6781_v27, %v8627_v30  ;;  %6802 = vpow2.f32 %v5247_v7 }
 0x46d   : > { %v6785_v37 = vpop.eup %6784  ;;  %6804 = vrcp.f32 %v3161_v53  ;;  %v3162_v12 = vadd.f32 1.0, %v6783_v6 }
 0x46e   : > { %v6787_v42 = vpop.eup %6786  ;;  %v4445_v9 = vadd.f32 %v4444_v63, %v4101_v2  ;;  %v4102_v51 = vmul.f32 %v6785_v37, %v8629_v21  ;;  %6806 = vpow2.f32 %v5248_v15 }
 0x46f   : > { %v6789_v4 = vpop.eup %6788  ;;  %6808 = vrcp.f32 %v3162_v12  ;;  %v3171_v56 = vadd.f32 1.0, %v6787_v42 }
 0x470   : > { %v6791_v46 = vpop.eup %6790  ;;  %v4476_v28 = vadd.f32 %v4475_v19, %v4102_v51  ;;  %v3172_v20 = vadd.f32 1.0, %v6789_v4 }
 0x471   : > { %v6793_v57 = vpop.eup %6792  ;;  %6810 = vrcp.f32 %v3171_v56  ;;  %v3181_v36 = vadd.f32 1.0, %v6791_v46 }
 0x472   : > { %v6795_v26 = vpop.eup %6794  ;;  %6812 = vrcp.f32 %v3172_v20  ;;  %v3182_v30 = vadd.f32 1.0, %v6793_v57  ;;  %v9427_v57 = vlaneseq }
 0x473   : > { %v6797_v14 = vpop.eup %6796  ;;  %6814 = vrcp.f32 %v3181_v36  ;;  %v3191_v39 = vadd.f32 1.0, %v6795_v26 }
 0x474   : > { %v6799_v17 = vpop.eup %6798  ;;  %6816 = vrcp.f32 %v3182_v30  ;;  %v3192_v50 = vadd.f32 1.0, %v6797_v14  ;;  %vm4665_vm1 = vcmp.lt.s32.totalorder %v9427_v57, 256 }
 0x475   : > { %v6801_v21 = vpop.eup %6800  ;;  %v4111_v47 = vmul.f32 %v6799_v17, %v9423_v16  ;;  %6818 = vrcp.f32 %v3191_v39 }
 0x476   : > { %v6803_v40 = vpop.eup %6802  ;;  %v4112_v38 = vmul.f32 %v6801_v21, %v9424_v60  ;;  %6820 = vrcp.f32 %v3192_v50 }
 0x477   : > { %v6805_v33 = vpop.eup %6804  ;;  %v4446_v59 = vadd.f32 %v4445_v9, %v4111_v47  ;;  %v3201_v45 = vadd.f32 1.0, %v6803_v40 }
 0x478   : > { %v6807_v11 = vpop.eup %6806  ;;  %v4477_v5 = vadd.f32 %v4476_v28, %v4112_v38  ;;  %v4121_v35 = vmul.f32 %v6805_v33, %v9425_v3 }
 0x479   : > { %v6809_v43 = vpop.eup %6808  ;;  %6822 = vrcp.f32 %v3201_v45  ;;  %v3202_v52 = vadd.f32 1.0, %v6807_v11 }
 0x47a   : > { %v4447_v1 = vadd.f32 %v4446_v59, %v4121_v35  ;;  %v4122_v61 = vmul.f32 %v6809_v43, %v9426_v32 }
 0x47b   : > { %v6811_v0 = vpop.eup %6810  ;;  %6824 = vrcp.f32 %v3202_v52 }
 0x47c   : > { %v6813_v16 = vpop.eup %6812  ;;  %v4478_v54 = vadd.f32 %v4477_v5, %v4122_v61  ;;  %v4131_v60 = vmul.f32 %v6811_v0, %v8661_v23 }
 0x47d   : > { %v6815_v44 = vpop.eup %6814  ;;  %v4132_v58 = vmul.f32 %v6813_v16, %v8664_v24 }
 0x47e   : > { %v6817_v62 = vpop.eup %6816  ;;  %v4448_v49 = vadd.f32 %v4447_v1, %v4131_v60  ;;  %v4141_v48 = vmul.f32 %v6815_v44, %v8667_v10 }
 0x47f   : > { %v6819_v3 = vpop.eup %6818  ;;  %v4479_v7 = vadd.f32 %v4478_v54, %v4132_v58  ;;  %v4142_v41 = vmul.f32 %v6817_v62, %v8670_v22 }
 0x480   : > { %v6821_v63 = vpop.eup %6820  ;;  %v4449_v25 = vadd.f32 %v4448_v49, %v4141_v48  ;;  %v4151_v32 = vmul.f32 %v6819_v3, %v8677_v29 }
 0x481   : > { %v4480_v13 = vadd.f32 %v4479_v7, %v4142_v41  ;;  %v4152_v31 = vmul.f32 %v6821_v63, %v8679_v18 }
 0x482   : > { %v4450_v15 = vadd.f32 %v4449_v25, %v4151_v32 }
 0x483   : > { %v6823_v23 = vpop.eup %6822  ;;  %v4481_v27 = vadd.f32 %v4480_v13, %v4152_v31 }
 0x484   : > { %v4161_v24 = vmul.f32 %v6823_v23, %v8681_v8 }
 0x485   : > { %v6825_v53 = vpop.eup %6824 }
 0x486   : > { %v4451_v6 = vadd.f32 %v4450_v15, %v4161_v24  ;;  %v4162_v10 = vmul.f32 %v6825_v53, %v8683_v34 }
 0x488   : > { %v4564_v19 = vrot.slane %v4451_v6, 4  ;;  %v4482_v2 = vadd.f32 %v4481_v27, %v4162_v10 }
 0x48a   : > { %v4565_v22 = vadd.f32 %v4564_v19, %v4451_v6  ;;  %v4570_v37 = vrot.slane %v4482_v2, 4 }
 0x48c   : > { %v4566_v12 = vrot.slane %v4565_v22, 2  ;;  %v4571_v29 = vadd.f32 %v4570_v37, %v4482_v2 }
 0x48e   : > { %v4567_v42 = vadd.f32 %v4566_v12, %v4565_v22  ;;  %v4572_v9 = vrot.slane %v4571_v29, 2 }
 0x490   : > { %v4568_v18 = vrot.slane %v4567_v42, 1  ;;  %v4573_v51 = vadd.f32 %v4572_v9, %v4571_v29 }
 0x492   : > { %v4569_v4 = vadd.f32 %v4568_v18, %v4567_v42  ;;  %v4574_v8 = vrot.slane %v4573_v51, 1 }
 0x494   : > { %v4584_v56 = vmul.f32 0.00390625, %v4569_v4  ;;  %v4575_v46 = vadd.f32 %v4574_v8, %v4573_v51 }
 0x496   : > { %v4585_v34 = vmul.f32 0.00390625, %v4575_v46 }
 0x498   : > { %v4645_v28 = vcombine.low %v4584_v56, %v4585_v34 }
 0x49a   : > { %v4652_v20 = vrot.slane %v4645_v28, %v9417_v55 }
 0x49c   : > { %v4659_v36 = vrot.slane %v4652_v20, %v9417_v55 }
 0x49e   : > { %4667 = vst.msk [vmem:[%s8796_s26 + $0x8] sm:$0x3] %vm4665_vm1, %v4659_v36 }
 0x49f   : > { %6839 = shalt.err (!%p6836_p5)
}
 0x4a0   : > { %s6840_s9 = scalar_lea.hbm %s8849_s4, 160  ;;  %s6844_s18 = scalar_lea.hbm %s8902_s3, 320 }
 0x4a1   : > { %p6841_p6 = scmp.ne.s32.totalorder %s8849_s4, %s6840_s9  ;;  %p6845_p10 = scmp.lt.u32.totalorder %s8849_s4, %s8902_s3 }
 0x4a2   : > { %p6846_p11 = scmp.lt.u32.totalorder %s6844_s18, %s6840_s9  ;;  %p6848_p13 = scmp.lt.u32.totalorder %s6840_s9, %s8849_s4 }
 0x4a3   : > { %p6842_p7 = pnand %p6841_p6, %p6969_p4 }
 0x4a4   : > { %p6847_p12 = por %p6846_p11, %p6845_p10 }
 0x4a5   : > { %p6843_p9 = pneg %p6842_p7 }
 0x4a6   : > { %p6849_p0 = por %p6848_p13, %p6847_p12 }
 0x4a8   : > { %p6850_p1 = pnand %p6849_p0, %p6843_p9 }
 0x4aa   : > { %6853 = shalt.err (!%p6850_p1)
}
 0x4ab   : > { %5313 = dma.vmem_to_hbm [thread:$0]  (%p6969_p4), %s8851_s28, 160, %s8849_s4, %s4669_s15  }
 0x4ac PF: > { %p5319_p2 = scmp.ge.s32.totalorder %s6904_s17, 2  ;;  %s4695_s23 = sand.u32 1, %s6884_s12  }
 0x4ad   : > { %s4696_s26 = scalar_lea.sflag [#allocation4], %s4695_s23 }
 0x4ae   : > { %p5316_p3 = pnand %p5319_p2, %p6976_p8 }
 0x4b0   : > { %6879 = dma.done.wait (!%p5316_p3), %s4696_s26, 160  }
 0x4b1   : > { %6881 = vsyncadd (!%p5316_p3), %s4696_s26, 4294967136  ;;  %s16_s17 = sadd.s32 1, %s6904_s17   ;;  %s9428_s12 = smov %s6888_s13 }
 0x4b2   : > { %p13_p5 = scmp.ge.s32.totalorder %s16_s17, 4   ;;  %s9429_s13 = smov %s6892_s14 }
 0x4b3   : > { %s9430_s14 = smov %s6982_s25  ;;  %s9431_s15 = smov %s6900_s16 }
 0x4b4   : > { %s9432_s16 = smov %s9434_s20  ;;  %15 = sbr.rel (!%p13_p5) target bundleno = 4 (0x4), region = 75 }
 0x4bb   :  { %4701 = vsyncpa [#allocation4], 1 }
 0x4bc   :  { %4703 = vsyncpa [#allocation4 + $0x1], 1 }

</bundles_post_ra>
